<compile_context>
chip_gen: v7x
topology: tpu7x:2x2x1
jax: 0.10.0
libtpu: 0.0.40
codegen_flags: <defaults>
</compile_context>

<pallas_src>
import jax
import jax.numpy as jnp
from jax.experimental import pallas as pl

LANE = 128


def _round_up(x, m):
    return (x + m - 1) // m * m


def _se_pointwise_conv_kernel(gate_ref, x_ref, w_ref, o_ref):
    # gate_ref: (C_in, 1)        f32  pre-sigmoid SE logits
    # x_ref:    (C_in, HW_pad)   bf16 activations in native (channel, spatial) layout
    # w_ref:    (C_out, C_in)    bf16 1x1-conv weight (native PyTorch orientation)
    # o_ref:    (C_out, HW_pad)  f32  output
    g = jax.nn.sigmoid(gate_ref[...])                                # (C_in, 1) f32, EUP
    xg = (x_ref[...].astype(jnp.float32) * g).astype(jnp.bfloat16)   # lane-broadcast of g
    o_ref[...] = jnp.dot(w_ref[...], xg, preferred_element_type=jnp.float32)


def prepare_weight(weight):
    """One-time relayout: (C_out, C_in, 1, 1) f32 -> (C_out, C_in) bf16. No transpose, no pad."""
    c_out, c_in = weight.shape[0], weight.shape[1]
    return weight.reshape(c_out, c_in).astype(jnp.bfloat16)


def se_pointwise_conv_prepared(x552, x548, w_prep):
    """Hot path. x552: (1, C_in, 1, 1) f32, x548: (1, C_in, H, W) f32, w_prep from prepare_weight."""
    n, c_in, h, w = x548.shape
    assert n == 1, "kernel written for batch=1 (as in the reference module)"
    c_out = w_prep.shape[0]
    assert w_prep.shape[1] == c_in
    hw = h * w
    hw_pad = _round_up(hw, LANE)

    # Native layout: NCHW -> (C_in, HW) is a pure reshape (no transpose). Pad HW to a lane
    # multiple and cast to bf16 in one fused XLA op.
    x_mat = jnp.pad(x548.reshape(c_in, hw), ((0, 0), (0, hw_pad - hw))).astype(jnp.bfloat16)
    gate = x552.reshape(c_in, 1)

    cost = pl.CostEstimate(
        flops=2 * hw * c_in * c_out,
        transcendentals=c_in,
        bytes_accessed=(
            x_mat.size * x_mat.dtype.itemsize
            + gate.size * gate.dtype.itemsize
            + w_prep.size * w_prep.dtype.itemsize
            + c_out * hw_pad * 4
        ),
    )

    out_mat = pl.pallas_call(
        _se_pointwise_conv_kernel,
        out_shape=jax.ShapeDtypeStruct((c_out, hw_pad), jnp.float32),
        grid=(1,),
        in_specs=[
            pl.BlockSpec((c_in, 1), lambda i: (0, 0)),        # gate
            pl.BlockSpec((c_in, hw_pad), lambda i: (0, 0)),   # activations
            pl.BlockSpec((c_out, c_in), lambda i: (0, 0)),    # weight
        ],
        out_specs=pl.BlockSpec((c_out, hw_pad), lambda i: (0, 0)),
        cost_estimate=cost,
    )(gate, x_mat, w_prep)

    # (C_out, HW_pad) -> drop HW padding -> (1, C_out, H, W). Pure slice+reshape, no transpose.
    return out_mat[:, :hw].reshape(1, c_out, h, w)


def se_pointwise_conv(x552, x548, weight):
    """Module-equivalent convenience wrapper (prepares the weight per call)."""
    return se_pointwise_conv_prepared(x552, x548, prepare_weight(weight))


if __name__ == "__main__":
    key = jax.random.PRNGKey(0)
    k1, k2, k3 = jax.random.split(key, 3)

    N, C_IN, C_OUT, H, W = 1, 1824, 304, 7, 7

    x548 = jax.random.normal(k1, (N, C_IN, H, W), dtype=jnp.float32)
    x552 = jax.random.normal(k2, (N, C_IN, 1, 1), dtype=jnp.float32)
    weight = jax.random.normal(k3, (C_OUT, C_IN, 1, 1), dtype=jnp.float32) * 0.02

    # One-time weight relayout (hoisted out of the hot path).
    w_prep = jax.block_until_ready(prepare_weight(weight))

    fwd = jax.jit(se_pointwise_conv_prepared)
    out = jax.block_until_ready(fwd(x552, x548, w_prep))
    assert out.shape == (N, C_OUT, H, W), out.shape

    # Reference 1: exact module semantics in f32 (loose tolerance: kernel uses bf16 operands on
    # the MXU with f32 accumulation, and x is shipped as bf16).
    gated = jax.nn.sigmoid(x552) * x548
    ref_f32 = jnp.einsum(
        "nchw,oc->nohw", gated, weight.reshape(C_OUT, C_IN),
        precision=jax.lax.Precision.HIGHEST,
    )
    assert jnp.allclose(out, ref_f32, atol=5e-2, rtol=5e-2), float(
        jnp.max(jnp.abs(out - ref_f32))
    )

    # Reference 2: same rounding sequence as the kernel (x -> bf16, f32 gating, product -> bf16,
    # bf16 matmul with f32 accumulation).
    gated_bf16 = (
        jax.nn.sigmoid(x552) * x548.astype(jnp.bfloat16).astype(jnp.float32)
    ).astype(jnp.bfloat16)
    ref_bf16 = jnp.einsum(
        "nchw,oc->nohw",
        gated_bf16,
        weight.reshape(C_OUT, C_IN).astype(jnp.bfloat16),
        preferred_element_type=jnp.float32,
    )
    assert jnp.allclose(out, ref_bf16, atol=5e-3, rtol=5e-3), float(
        jnp.max(jnp.abs(out - ref_bf16))
    )

    print("KERNEL_OK")
</pallas_src>

<mosaic_0001>
module attributes {stable_mosaic.version = 11 : i64} {
  func.func @_se_pointwise_conv_kernel(%arg0: i32, %arg1: memref<1824x1xf32, #tpu.memory_space<vmem>>, %arg2: memref<1824x128xbf16, #tpu.memory_space<vmem>>, %arg3: memref<304x1824xbf16, #tpu.memory_space<vmem>>, %arg4: memref<304x128xf32, #tpu.memory_space<vmem>>) attributes {dimension_semantics = [#tpu.dimension_semantics<arbitrary>], iteration_bounds = array<i64: 1>, scalar_prefetch = 0 : i64, scratch_operands = 0 : i64, tpu.core_type = #tpu.core_type<tc>, window_params = [{pipeline_mode = #tpu.pipeline_mode<synchronous>, transform_indices = @transform_0, window_bounds = array<i64: 1824, 1>}, {pipeline_mode = #tpu.pipeline_mode<synchronous>, transform_indices = @transform_1, window_bounds = array<i64: 1824, 128>}, {pipeline_mode = #tpu.pipeline_mode<synchronous>, transform_indices = @transform_2, window_bounds = array<i64: 304, 1824>}, {pipeline_mode = #tpu.pipeline_mode<synchronous>, transform_indices = @transform_3, window_bounds = array<i64: 304, 128>}]} {
    %c0 = arith.constant 0 : index
    %c0_0 = arith.constant 0 : index
    %0 = vector.load %arg1[%c0, %c0_0] : memref<1824x1xf32, #tpu.memory_space<vmem>>, vector<1824x1xf32>
    %1 = arith.negf %0 : vector<1824x1xf32>
    %2 = math.exp %1 : vector<1824x1xf32>
    %cst = arith.constant 1.000000e+00 : f32
    %3 = vector.broadcast %cst : f32 to vector<1824x1xf32>
    %4 = arith.addf %3, %2 : vector<1824x1xf32>
    %5 = arith.divf %3, %4 : vector<1824x1xf32>
    %c0_1 = arith.constant 0 : index
    %c0_2 = arith.constant 0 : index
    %6 = vector.load %arg2[%c0_1, %c0_2] : memref<1824x128xbf16, #tpu.memory_space<vmem>>, vector<1824x128xbf16>
    %7 = arith.extf %6 : vector<1824x128xbf16> to vector<1824x128xf32>
    %8 = vector.broadcast %5 : vector<1824x1xf32> to vector<1824x128xf32>
    %9 = arith.mulf %7, %8 : vector<1824x128xf32>
    %10 = arith.truncf %9 : vector<1824x128xf32> to vector<1824x128xbf16>
    %c0_3 = arith.constant 0 : index
    %c0_4 = arith.constant 0 : index
    %11 = vector.load %arg3[%c0_3, %c0_4] : memref<304x1824xbf16, #tpu.memory_space<vmem>>, vector<304x1824xbf16>
    %cst_5 = arith.constant dense<0.000000e+00> : vector<304x128xf32>
    %12 = tpu.matmul %11, %10, %cst_5 {dimension_numbers = #tpu.dot_dimension_numbers<[1], [0], [0], [1], [0, 0, 1, 1], [], []>} : vector<304x1824xbf16>, vector<1824x128xbf16>, vector<304x128xf32> -> vector<304x128xf32>
    %c0_6 = arith.constant 0 : index
    %c0_7 = arith.constant 0 : index
    %13 = vector.load %arg4[%c0_6, %c0_7] : memref<304x128xf32, #tpu.memory_space<vmem>>, vector<304x128xf32>
    tpu.vector_store %arg4[%c0_6, %c0_7], %12 {strides = array<i32>} : memref<304x128xf32, #tpu.memory_space<vmem>>, vector<304x128xf32>,
    return
  }
  func.func @transform_0(%arg0: i32) -> (i32, i32) {
    %c0_i32 = arith.constant 0 : i32
    %c0_i32_0 = arith.constant 0 : i32
    %c0_i32_1 = arith.constant 0 : i32
    return %c0_i32, %c0_i32_0 : i32, i32
  }
  func.func @transform_1(%arg0: i32) -> (i32, i32) {
    %c0_i32 = arith.constant 0 : i32
    %c0_i32_0 = arith.constant 0 : i32
    %c0_i32_1 = arith.constant 0 : i32
    return %c0_i32, %c0_i32_0 : i32, i32
  }
  func.func @transform_2(%arg0: i32) -> (i32, i32) {
    %c0_i32 = arith.constant 0 : i32
    %c0_i32_0 = arith.constant 0 : i32
    %c0_i32_1 = arith.constant 0 : i32
    return %c0_i32, %c0_i32_0 : i32, i32
  }
  func.func @transform_3(%arg0: i32) -> (i32, i32) {
    %c0_i32 = arith.constant 0 : i32
    %c0_i32_0 = arith.constant 0 : i32
    %c0_i32_1 = arith.constant 0 : i32
    return %c0_i32, %c0_i32_0 : i32, i32
  }
}

</mosaic_0001>

<bundles_post_ra>
// kernel: se_pointwise_conv_prepared.1
= control target key start
LH: loop header
LB: loop body
LE: loop exit
PB: predicated region body
PF: predicated region fallthrough
CT: control target
= control target key end

     0   :  { %v9889_v0 = vmov 0   ;;  %vm9891_vm0 = vmmov 0   ;;  %vm5278_vm1 = vcmask 261120   ;;  %s12629_s0 = inlined_call_operand.vmem [shape: f32[1824,1], index: 0, kind: input, shape index: {}]   ;;  %s12630_s1 = inlined_call_operand.vmem [shape: bf16[1824,128], index: 1, kind: input, shape index: {}]   ;;  %s12631_s2 = inlined_call_operand.vmem [shape: bf16[304,1824], index: 2, kind: input, shape index: {}]   ;;  %s12632_s3 = inlined_call_operand.vmem [shape: f32[304,128], index: 3, kind: output, shape index: {}]  }
   0x1   :  { %8558 = vset.pattern.permute.xlu1 %v9889_v0  ;;  %8557 = vset.pattern.permute.xlu0 %v9889_v0  ;;  %v143_v1 = vld [vmem:[%s12629_s0 + $0x400] sm:$0xff]  ;;  %v144_v3 = vld [vmem:[%s12629_s0 + $0x408] sm:$0xff]  ;;  %v18_v8 = vld [vmem:[%s12629_s0 + $0x18] sm:$0xff] }
   0x2   :  { %v15_v2 = vld [vmem:[%s12629_s0] sm:$0xff]  ;;  %v6986_v4 = vmul.f32 -1.442695, %v143_v1  ;;  %v6987_v6 = vmul.f32 -1.442695, %v144_v3  ;;  %5336 = vmatprep.subr.bf16.mxu1 %v9889_v0  ;;  %6076 = vmatprep.subr.bf16.mxu0 %v9889_v0  ;;  %v16_v7 = vld [vmem:[%s12629_s0 + $0x8] sm:$0xff] }
   0x3   :  { %v6858_v5 = vmul.f32 -1.442695, %v15_v2  ;;  %v17_v9 = vld [vmem:[%s12629_s0 + $0x10] sm:$0xff]  ;;  %v6859_v10 = vmul.f32 -1.442695, %v16_v7  ;;  %v146_v13 = vld [vmem:[%s12629_s0 + $0x418] sm:$0xff] }
   0x4   :  { %8977 = vpow2.f32 %v6986_v4  ;;  %v6861_v11 = vmul.f32 -1.442695, %v18_v8  ;;  %v6860_v12 = vmul.f32 -1.442695, %v17_v9  ;;  %v145_v14 = vld [vmem:[%s12629_s0 + $0x410] sm:$0xff]  ;;  %v20_v15 = vld [vmem:[%s12629_s0 + $0x28] sm:$0xff] }
   0x5   :  { %8979 = vpow2.f32 %v6858_v5  ;;  %v6989_v16 = vmul.f32 -1.442695, %v146_v13  ;;  %v6988_v17 = vmul.f32 -1.442695, %v145_v14  ;;  %v19_v18 = vld [vmem:[%s12629_s0 + $0x20] sm:$0xff]  ;;  %v148_v19 = vld [vmem:[%s12629_s0 + $0x428] sm:$0xff] }
   0x6   :  { %8981 = vpow2.f32 %v6987_v6  ;;  %v6863_v20 = vmul.f32 -1.442695, %v20_v15  ;;  %v147_v21 = vld [vmem:[%s12629_s0 + $0x420] sm:$0xff]  ;;  %v6862_v22 = vmul.f32 -1.442695, %v19_v18  ;;  %v22_v23 = vld [vmem:[%s12629_s0 + $0x38] sm:$0xff] }
   0x7   :  { %8983 = vpow2.f32 %v6859_v10  ;;  %v6991_v24 = vmul.f32 -1.442695, %v148_v19  ;;  %v6990_v25 = vmul.f32 -1.442695, %v147_v21  ;;  %v6865_v26 = vmul.f32 -1.442695, %v22_v23 }
   0x8   :  { %8985 = vpow2.f32 %v6861_v11  ;;  %v21_v46 = vld [vmem:[%s12629_s0 + $0x30] sm:$0xff]  ;;  %v150_v49 = vld [vmem:[%s12629_s0 + $0x438] sm:$0xff]  ;;  %v24_v56 = vld [vmem:[%s12629_s0 + $0x48] sm:$0xff] }
   0x9   :  { %8987 = vpow2.f32 %v6860_v12  ;;  %v149_v52 = vld [vmem:[%s12629_s0 + $0x430] sm:$0xff]  ;;  %v6864_v55 = vmul.f32 -1.442695, %v21_v46  ;;  %v6993_v59 = vmul.f32 -1.442695, %v150_v49  ;;  %v23_v60 = vld [vmem:[%s12629_s0 + $0x40] sm:$0xff] }
   0xa   :  { %8989 = vpow2.f32 %v6989_v16  ;;  %v6992_v62 = vmul.f32 -1.442695, %v149_v52  ;;  %v152_v63 = vld [vmem:[%s12629_s0 + $0x448] sm:$0xff]  ;;  %v6867_v2 = vmul.f32 -1.442695, %v24_v56  ;;  %v151_v3 = vld [vmem:[%s12629_s0 + $0x440] sm:$0xff] }
   0xb   :  { %8991 = vpow2.f32 %v6988_v17  ;;  %v6866_v5 = vmul.f32 -1.442695, %v23_v60  ;;  %v26_v6 = vld [vmem:[%s12629_s0 + $0x58] sm:$0xff]  ;;  %v6995_v8 = vmul.f32 -1.442695, %v152_v63  ;;  %v25_v9 = vld [vmem:[%s12629_s0 + $0x50] sm:$0xff] }
   0xc   :  { %8993 = vpow2.f32 %v6863_v20  ;;  %v6994_v11 = vmul.f32 -1.442695, %v151_v3  ;;  %v154_v12 = vld [vmem:[%s12629_s0 + $0x458] sm:$0xff]  ;;  %v6869_v14 = vmul.f32 -1.442695, %v26_v6  ;;  %v153_v15 = vld [vmem:[%s12629_s0 + $0x450] sm:$0xff] }
   0xd   :  { %8995 = vpow2.f32 %v6862_v22  ;;  %v6868_v17 = vmul.f32 -1.442695, %v25_v9  ;;  %v28_v18 = vld [vmem:[%s12629_s0 + $0x68] sm:$0xff]  ;;  %v6997_v20 = vmul.f32 -1.442695, %v154_v12  ;;  %v27_v21 = vld [vmem:[%s12629_s0 + $0x60] sm:$0xff] }
   0xe   :  { %v8978_v27 = vpop.eup %8977  ;;  %8997 = vpow2.f32 %v6991_v24  ;;  %v6996_v23 = vmul.f32 -1.442695, %v153_v15 }
   0xf   :  { %v8980_v28 = vpop.eup %8979  ;;  %v1055_v29 = vadd.f32 1.0, %v8978_v27  ;;  %8999 = vpow2.f32 %v6990_v25  ;;  %v6871_v25 = vmul.f32 -1.442695, %v28_v18  ;;  %v6870_v27 = vmul.f32 -1.442695, %v27_v21 }
  0x10   :  { %v8982_v30 = vpop.eup %8981  ;;  %v927_v31 = vadd.f32 1.0, %v8980_v28  ;;  %9001 = vpow2.f32 %v6865_v26 }
  0x11   :  { %v8984_v32 = vpop.eup %8983  ;;  %9003 = vrcp.f32 %v1055_v29  ;;  %v1056_v33 = vadd.f32 1.0, %v8982_v30 }
  0x12   :  { %v8986_v34 = vpop.eup %8985  ;;  %9005 = vrcp.f32 %v927_v31  ;;  %v928_v35 = vadd.f32 1.0, %v8984_v32 }
  0x13   :  { %v8988_v36 = vpop.eup %8987  ;;  %9007 = vrcp.f32 %v1056_v33  ;;  %v930_v37 = vadd.f32 1.0, %v8986_v34 }
  0x14   :  { %v8990_v38 = vpop.eup %8989  ;;  %9009 = vrcp.f32 %v928_v35  ;;  %v929_v39 = vadd.f32 1.0, %v8988_v36 }
  0x15   :  { %v8992_v40 = vpop.eup %8991  ;;  %9011 = vrcp.f32 %v930_v37  ;;  %v1058_v41 = vadd.f32 1.0, %v8990_v38 }
  0x16   :  { %v8994_v42 = vpop.eup %8993  ;;  %9013 = vrcp.f32 %v929_v39  ;;  %v1057_v43 = vadd.f32 1.0, %v8992_v40 }
  0x17   :  { %v8996_v44 = vpop.eup %8995  ;;  %9015 = vrcp.f32 %v1058_v41  ;;  %v932_v45 = vadd.f32 1.0, %v8994_v42 }
  0x18   :  { %v8998_v47 = vpop.eup %8997  ;;  %9017 = vrcp.f32 %v1057_v43  ;;  %v931_v48 = vadd.f32 1.0, %v8996_v44 }
  0x19   :  { %v9000_v50 = vpop.eup %8999  ;;  %9019 = vrcp.f32 %v932_v45  ;;  %v1060_v51 = vadd.f32 1.0, %v8998_v47 }
  0x1a   :  { %v9002_v53 = vpop.eup %9001  ;;  %9021 = vrcp.f32 %v931_v48  ;;  %v1059_v54 = vadd.f32 1.0, %v9000_v50  ;;  %v156_v48 = vld [vmem:[%s12629_s0 + $0x468] sm:$0xff] }
  0x1b   :  { %v9004_v57 = vpop.eup %9003  ;;  %9023 = vrcp.f32 %v1060_v51  ;;  %v934_v58 = vadd.f32 1.0, %v9002_v53  ;;  %v155_v51 = vld [vmem:[%s12629_s0 + $0x460] sm:$0xff] }
  0x1c   :  { %v9006_v61 = vpop.eup %9005  ;;  %2709 = vperm.xlu1 %8558, %v9004_v57   ;;  %9025 = vrcp.f32 %v1059_v54  ;;  %v30_v54 = vld [vmem:[%s12629_s0 + $0x78] sm:$0xff]  ;;  %v6999_v57 = vmul.f32 -1.442695, %v156_v48 }
  0x1d   :  { %v9008_v1 = vpop.eup %9007  ;;  %2069 = vperm.xlu0 %8557, %v9006_v61   ;;  %9027 = vrcp.f32 %v934_v58  ;;  %v29_v58 = vld [vmem:[%s12629_s0 + $0x70] sm:$0xff]  ;;  %v6998_v61 = vmul.f32 -1.442695, %v155_v51 }
  0x1e   :  { %v9010_v4 = vpop.eup %9009  ;;  %9029 = vpow2.f32 %v6864_v55 }
  0x1f   :  { %v9012_v7 = vpop.eup %9011  ;;  %9031 = vpow2.f32 %v6993_v59 }
  0x20   :  { %v9014_v10 = vpop.eup %9013  ;;  %2714 = vperm.xlu1 %8558, %v9008_v1   ;;  %9033 = vpow2.f32 %v6992_v62  ;;  %v158_v62 = vld [vmem:[%s12629_s0 + $0x478] sm:$0xff]  ;;  %v6873_v1 = vmul.f32 -1.442695, %v30_v54 }
  0x21   :  { %v9016_v13 = vpop.eup %9015  ;;  %2074 = vperm.xlu0 %8557, %v9010_v4   ;;  %9035 = vpow2.f32 %v6867_v2  ;;  %v157_v2 = vld [vmem:[%s12629_s0 + $0x470] sm:$0xff]  ;;  %v6872_v4 = vmul.f32 -1.442695, %v29_v58 }
  0x22   :  { %v9018_v16 = vpop.eup %9017  ;;  %9037 = vpow2.f32 %v6866_v5  ;;  %v32_v5 = vld [vmem:[%s12629_s0 + $0x88] sm:$0xff] }
  0x23   :  { %v9020_v19 = vpop.eup %9019  ;;  %9039 = vpow2.f32 %v6995_v8  ;;  %v31_v8 = vld [vmem:[%s12629_s0 + $0x80] sm:$0xff] }
  0x24   :  { %v9022_v22 = vpop.eup %9021  ;;  %2084 = vperm.xlu1 %8558, %v9012_v7   ;;  %9041 = vpow2.f32 %v6994_v11  ;;  %v7001_v7 = vmul.f32 -1.442695, %v158_v62  ;;  %v160_v11 = vld [vmem:[%s12629_s0 + $0x488] sm:$0xff] }
  0x25   :  { %v9024_v24 = vpop.eup %9023  ;;  %2079 = vperm.xlu0 %8557, %v9014_v10   ;;  %9043 = vpow2.f32 %v6869_v14  ;;  %v7000_v10 = vmul.f32 -1.442695, %v157_v2  ;;  %v159_v14 = vld [vmem:[%s12629_s0 + $0x480] sm:$0xff] }
  0x26   :  { %v9026_v26 = vpop.eup %9025  ;;  %9045 = vpow2.f32 %v6868_v17  ;;  %v34_v17 = vld [vmem:[%s12629_s0 + $0x98] sm:$0xff] }
  0x27   :  { %v9028_v28 = vpop.eup %9027  ;;  %9047 = vpow2.f32 %v6997_v20  ;;  %v33_v20 = vld [vmem:[%s12629_s0 + $0x90] sm:$0xff] }
  0x28   :  { %v9030_v29 = vpop.eup %9029  ;;  %2724 = vperm.xlu1 %8558, %v9016_v13   ;;  %9049 = vpow2.f32 %v6996_v23  ;;  %v6875_v13 = vmul.f32 -1.442695, %v32_v5  ;;  %v162_v23 = vld [vmem:[%s12629_s0 + $0x498] sm:$0xff] }
  0x29   :  { %v9032_v30 = vpop.eup %9031  ;;  %2719 = vperm.xlu0 %8557, %v9018_v16   ;;  %v933_v31 = vadd.f32 1.0, %v9030_v29  ;;  %9051 = vpow2.f32 %v6871_v25  ;;  %v6874_v16 = vmul.f32 -1.442695, %v31_v8  ;;  %v6877_v25 = vmul.f32 -1.442695, %v34_v17 }
  0x2a   :  { %v9034_v32 = vpop.eup %9033  ;;  %v1062_v33 = vadd.f32 1.0, %v9032_v30  ;;  %9053 = vpow2.f32 %v6870_v27  ;;  %v6876_v27 = vmul.f32 -1.442695, %v33_v20  ;;  %v7005_v29 = vmul.f32 -1.442695, %v162_v23 }
  0x2b   :  { %v9036_v34 = vpop.eup %9035  ;;  %9055 = vrcp.f32 %v933_v31  ;;  %v1061_v35 = vadd.f32 1.0, %v9034_v32 }
  0x2c   :  { %v9038_v36 = vpop.eup %9037  ;;  %2094 = vperm.xlu1 %8558, %v9020_v19   ;;  %9057 = vrcp.f32 %v1062_v33  ;;  %v936_v37 = vadd.f32 1.0, %v9036_v34  ;;  %v7003_v19 = vmul.f32 -1.442695, %v160_v11 }
  0x2d   :  { %v9040_v38 = vpop.eup %9039  ;;  %2089 = vperm.xlu0 %8557, %v9022_v22   ;;  %9059 = vrcp.f32 %v1061_v35  ;;  %v935_v39 = vadd.f32 1.0, %v9038_v36  ;;  %v7002_v22 = vmul.f32 -1.442695, %v159_v14 }
  0x2e   :  { %v9042_v40 = vpop.eup %9041  ;;  %9061 = vrcp.f32 %v936_v37  ;;  %v1064_v41 = vadd.f32 1.0, %v9040_v38 }
  0x2f   :  { %v9044_v42 = vpop.eup %9043  ;;  %9063 = vrcp.f32 %v935_v39  ;;  %v1063_v43 = vadd.f32 1.0, %v9042_v40 }
  0x30   :  { %v9046_v44 = vpop.eup %9045  ;;  %2734 = vperm.xlu1 %8558, %v9024_v24   ;;  %9065 = vrcp.f32 %v1064_v41  ;;  %v938_v45 = vadd.f32 1.0, %v9044_v42 }
  0x31   :  { %v9048_v46 = vpop.eup %9047  ;;  %2729 = vperm.xlu0 %8557, %v9026_v26   ;;  %9067 = vrcp.f32 %v1063_v43  ;;  %v937_v47 = vadd.f32 1.0, %v9046_v44 }
  0x32   :  { %v9050_v49 = vpop.eup %9049  ;;  %9069 = vrcp.f32 %v938_v45  ;;  %v1066_v50 = vadd.f32 1.0, %v9048_v46 }
  0x33   :  { %v9052_v52 = vpop.eup %9051  ;;  %9071 = vrcp.f32 %v937_v47  ;;  %v1065_v53 = vadd.f32 1.0, %v9050_v49 }
  0x34   :  { %v9054_v55 = vpop.eup %9053  ;;  %2104 = vperm.xlu1 %8558, %v9028_v28   ;;  %9073 = vrcp.f32 %v1066_v50  ;;  %v940_v56 = vadd.f32 1.0, %v9052_v52  ;;  %v161_v50 = vld [vmem:[%s12629_s0 + $0x490] sm:$0xff] }
  0x35   :  { %v9056_v59 = vpop.eup %9055  ;;  %9075 = vrcp.f32 %v1065_v53  ;;  %v939_v60 = vadd.f32 1.0, %v9054_v55  ;;  %v36_v53 = vld [vmem:[%s12629_s0 + $0xa8] sm:$0xff] }
  0x36   :  { %v9058_v63 = vpop.eup %9057  ;;  %2099 = vperm.xlu0 %8557, %v9056_v59   ;;  %9077 = vrcp.f32 %v940_v56  ;;  %v35_v56 = vld [vmem:[%s12629_s0 + $0xa0] sm:$0xff]  ;;  %v7004_v59 = vmul.f32 -1.442695, %v161_v50 }
  0x37   :  { %v9060_v3 = vpop.eup %9059  ;;  %9079 = vrcp.f32 %v939_v60  ;;  %v164_v60 = vld [vmem:[%s12629_s0 + $0x4a8] sm:$0xff] }
  0x38   :  { %v9062_v6 = vpop.eup %9061  ;;  %2744 = vperm.xlu1 %8558, %v9058_v63   ;;  %9081 = vpow2.f32 %v6999_v57  ;;  %v6879_v63 = vmul.f32 -1.442695, %v36_v53 }
  0x39   :  { %v9064_v9 = vpop.eup %9063  ;;  %9083 = vpow2.f32 %v6998_v61 }
  0x3a   :  { %v9066_v12 = vpop.eup %9065  ;;  %2739 = vperm.xlu0 %8557, %v9060_v3   ;;  %9085 = vpow2.f32 %v6873_v1  ;;  %v163_v1 = vld [vmem:[%s12629_s0 + $0x4a0] sm:$0xff]  ;;  %v6878_v3 = vmul.f32 -1.442695, %v35_v56 }
  0x3b   :  { %v9068_v15 = vpop.eup %9067  ;;  %9087 = vpow2.f32 %v6872_v4  ;;  %v38_v4 = vld [vmem:[%s12629_s0 + $0xb8] sm:$0xff] }
  0x3c   :  { %v9070_v18 = vpop.eup %9069  ;;  %2114 = vperm.xlu1 %8558, %v9062_v6   ;;  %9089 = vpow2.f32 %v7001_v7  ;;  %v7007_v6 = vmul.f32 -1.442695, %v164_v60  ;;  %v37_v7 = vld [vmem:[%s12629_s0 + $0xb0] sm:$0xff] }
  0x3d   :  { %v9072_v21 = vpop.eup %9071  ;;  %9091 = vpow2.f32 %v7000_v10  ;;  %v166_v10 = vld [vmem:[%s12629_s0 + $0x4b8] sm:$0xff] }
  0x3e   :  { %v9074_v24 = vpop.eup %9073  ;;  %2109 = vperm.xlu0 %8557, %v9064_v9   ;;  %9093 = vpow2.f32 %v6875_v13  ;;  %v7006_v9 = vmul.f32 -1.442695, %v163_v1  ;;  %v165_v13 = vld [vmem:[%s12629_s0 + $0x4b0] sm:$0xff] }
  0x3f   :  { %v9076_v26 = vpop.eup %9075  ;;  %9095 = vpow2.f32 %v6874_v16  ;;  %v40_v16 = vld [vmem:[%s12629_s0 + $0xc8] sm:$0xff] }
  0x40   :  { %v9078_v28 = vpop.eup %9077  ;;  %2754 = vperm.xlu1 %8558, %v9066_v12   ;;  %9097 = vpow2.f32 %v7003_v19  ;;  %v6881_v12 = vmul.f32 -1.442695, %v38_v4  ;;  %v39_v19 = vld [vmem:[%s12629_s0 + $0xc0] sm:$0xff] }
  0x41   :  { %v9080_v30 = vpop.eup %9079  ;;  %9099 = vpow2.f32 %v7002_v22  ;;  %v168_v22 = vld [vmem:[%s12629_s0 + $0x4c8] sm:$0xff] }
  0x42   :  { %v9082_v31 = vpop.eup %9081  ;;  %2749 = vperm.xlu0 %8557, %v9068_v15   ;;  %9101 = vpow2.f32 %v6877_v25  ;;  %v6880_v15 = vmul.f32 -1.442695, %v37_v7  ;;  %v167_v25 = vld [vmem:[%s12629_s0 + $0x4c0] sm:$0xff] }
  0x43   :  { %v9084_v32 = vpop.eup %9083  ;;  %v1068_v33 = vadd.f32 1.0, %v9082_v31  ;;  %9103 = vpow2.f32 %v6876_v27  ;;  %v6882_v27 = vmul.f32 -1.442695, %v39_v19  ;;  %v7010_v31 = vmul.f32 -1.442695, %v167_v25 }
  0x44   :  { %v9086_v34 = vpop.eup %9085  ;;  %2124 = vperm.xlu1 %8558, %v9070_v18   ;;  %v1067_v35 = vadd.f32 1.0, %v9084_v32  ;;  %9105 = vpow2.f32 %v7005_v29  ;;  %v7009_v18 = vmul.f32 -1.442695, %v166_v10  ;;  %v7011_v29 = vmul.f32 -1.442695, %v168_v22 }
  0x45   :  { %v9088_v36 = vpop.eup %9087  ;;  %9107 = vrcp.f32 %v1068_v33  ;;  %v942_v37 = vadd.f32 1.0, %v9086_v34 }
  0x46   :  { %v9090_v38 = vpop.eup %9089  ;;  %2119 = vperm.xlu0 %8557, %v9072_v21   ;;  %9109 = vrcp.f32 %v1067_v35  ;;  %v941_v39 = vadd.f32 1.0, %v9088_v36  ;;  %v7008_v21 = vmul.f32 -1.442695, %v165_v13 }
  0x47   :  { %v9092_v40 = vpop.eup %9091  ;;  %9111 = vrcp.f32 %v942_v37  ;;  %v1070_v41 = vadd.f32 1.0, %v9090_v38 }
  0x48   :  { %v9094_v42 = vpop.eup %9093  ;;  %2764 = vperm.xlu1 %8558, %v9074_v24   ;;  %9113 = vrcp.f32 %v941_v39  ;;  %v1069_v43 = vadd.f32 1.0, %v9092_v40  ;;  %v6883_v24 = vmul.f32 -1.442695, %v40_v16 }
  0x49   :  { %v9096_v44 = vpop.eup %9095  ;;  %9115 = vrcp.f32 %v1070_v41  ;;  %v944_v45 = vadd.f32 1.0, %v9094_v42 }
  0x4a   :  { %v9098_v46 = vpop.eup %9097  ;;  %2759 = vperm.xlu0 %8557, %v9076_v26   ;;  %9117 = vrcp.f32 %v1069_v43  ;;  %v943_v47 = vadd.f32 1.0, %v9096_v44 }
  0x4b   :  { %v9100_v48 = vpop.eup %9099  ;;  %9119 = vrcp.f32 %v944_v45  ;;  %v1072_v49 = vadd.f32 1.0, %v9098_v46 }
  0x4c   :  { %v9102_v51 = vpop.eup %9101  ;;  %2134 = vperm.xlu1 %8558, %v9078_v28   ;;  %9121 = vrcp.f32 %v943_v47  ;;  %v1071_v52 = vadd.f32 1.0, %v9100_v48 }
  0x4d   :  { %v9104_v54 = vpop.eup %9103  ;;  %9123 = vrcp.f32 %v1072_v49  ;;  %v946_v55 = vadd.f32 1.0, %v9102_v51 }
  0x4e   :  { %v9106_v57 = vpop.eup %9105  ;;  %2129 = vperm.xlu0 %8557, %v9080_v30   ;;  %9125 = vrcp.f32 %v1071_v52  ;;  %v945_v58 = vadd.f32 1.0, %v9104_v54  ;;  %v42_v52 = vld [vmem:[%s12629_s0 + $0xd8] sm:$0xff] }
  0x4f   :  { %v9108_v61 = vpop.eup %9107  ;;  %9127 = vrcp.f32 %v946_v55  ;;  %v1074_v62 = vadd.f32 1.0, %v9106_v57  ;;  %v41_v55 = vld [vmem:[%s12629_s0 + $0xd0] sm:$0xff] }
  0x50   :  { %v9110_v2 = vpop.eup %9109  ;;  %2774 = vperm.xlu1 %8558, %v9108_v61   ;;  %9129 = vrcp.f32 %v945_v58  ;;  %v170_v58 = vld [vmem:[%s12629_s0 + $0x4d8] sm:$0xff]  ;;  %v6885_v61 = vmul.f32 -1.442695, %v42_v52 }
  0x51   :  { %v9112_v5 = vpop.eup %9111  ;;  %9131 = vrcp.f32 %v1074_v62  ;;  %v169_v62 = vld [vmem:[%s12629_s0 + $0x4d0] sm:$0xff] }
  0x52   :  { %v9114_v8 = vpop.eup %9113  ;;  %2769 = vperm.xlu0 %8557, %v9110_v2   ;;  %9133 = vpow2.f32 %v7004_v59  ;;  %v6884_v2 = vmul.f32 -1.442695, %v41_v55 }
  0x53   :  { %v9116_v11 = vpop.eup %9115  ;;  %9135 = vpow2.f32 %v6879_v63 }
  0x54   :  { %v9118_v14 = vpop.eup %9117  ;;  %2144 = vperm.xlu1 %8558, %v9112_v5   ;;  %9137 = vpow2.f32 %v6878_v3  ;;  %v44_v3 = vld [vmem:[%s12629_s0 + $0xe8] sm:$0xff]  ;;  %v7013_v5 = vmul.f32 -1.442695, %v170_v58 }
  0x55   :  { %v9120_v17 = vpop.eup %9119  ;;  %9139 = vpow2.f32 %v7007_v6  ;;  %v43_v6 = vld [vmem:[%s12629_s0 + $0xe0] sm:$0xff] }
  0x56   :  { %v9122_v20 = vpop.eup %9121  ;;  %2139 = vperm.xlu0 %8557, %v9114_v8   ;;  %9141 = vpow2.f32 %v7006_v9  ;;  %v7012_v8 = vmul.f32 -1.442695, %v169_v62  ;;  %v172_v9 = vld [vmem:[%s12629_s0 + $0x4e8] sm:$0xff] }
  0x57   :  { %v9124_v23 = vpop.eup %9123  ;;  %9143 = vpow2.f32 %v6881_v12  ;;  %v171_v12 = vld [vmem:[%s12629_s0 + $0x4e0] sm:$0xff] }
  0x58   :  { %v9126_v26 = vpop.eup %9125  ;;  %2784 = vperm.xlu1 %8558, %v9116_v11   ;;  %9145 = vpow2.f32 %v6880_v15  ;;  %v6887_v11 = vmul.f32 -1.442695, %v44_v3  ;;  %v46_v15 = vld [vmem:[%s12629_s0 + $0xf8] sm:$0xff] }
  0x59   :  { %v9128_v28 = vpop.eup %9127  ;;  %9147 = vpow2.f32 %v7009_v18  ;;  %v45_v18 = vld [vmem:[%s12629_s0 + $0xf0] sm:$0xff] }
  0x5a   :  { %v9130_v30 = vpop.eup %9129  ;;  %2779 = vperm.xlu0 %8557, %v9118_v14   ;;  %9149 = vpow2.f32 %v7008_v21  ;;  %v6886_v14 = vmul.f32 -1.442695, %v43_v6  ;;  %v174_v21 = vld [vmem:[%s12629_s0 + $0x4f8] sm:$0xff] }
  0x5b   :  { %v9132_v32 = vpop.eup %9131  ;;  %9151 = vpow2.f32 %v6883_v24  ;;  %v173_v24 = vld [vmem:[%s12629_s0 + $0x4f0] sm:$0xff] }
  0x5c   :  { %v9134_v33 = vpop.eup %9133  ;;  %2154 = vperm.xlu1 %8558, %v9120_v17   ;;  %9153 = vpow2.f32 %v6882_v27  ;;  %v7015_v17 = vmul.f32 -1.442695, %v172_v9  ;;  %v48_v27 = vld [vmem:[%s12629_s0 + $0x108] sm:$0xff] }
  0x5d   :  { %v9136_v34 = vpop.eup %9135  ;;  %v1073_v35 = vadd.f32 1.0, %v9134_v33  ;;  %9155 = vpow2.f32 %v7011_v29  ;;  %v7017_v29 = vmul.f32 -1.442695, %v174_v21  ;;  %v6891_v33 = vmul.f32 -1.442695, %v48_v27 }
  0x5e   :  { %v9138_v36 = vpop.eup %9137  ;;  %2149 = vperm.xlu0 %8557, %v9122_v20   ;;  %v948_v37 = vadd.f32 1.0, %v9136_v34  ;;  %9157 = vpow2.f32 %v7010_v31  ;;  %v7014_v20 = vmul.f32 -1.442695, %v171_v12  ;;  %v7016_v31 = vmul.f32 -1.442695, %v173_v24 }
  0x5f   :  { %v9140_v38 = vpop.eup %9139  ;;  %9159 = vrcp.f32 %v1073_v35  ;;  %v947_v39 = vadd.f32 1.0, %v9138_v36 }
  0x60   :  { %v9142_v40 = vpop.eup %9141  ;;  %2794 = vperm.xlu1 %8558, %v9124_v23   ;;  %9161 = vrcp.f32 %v948_v37  ;;  %v1076_v41 = vadd.f32 1.0, %v9140_v38  ;;  %v6889_v23 = vmul.f32 -1.442695, %v46_v15 }
  0x61   :  { %v9144_v42 = vpop.eup %9143  ;;  %9163 = vrcp.f32 %v947_v39  ;;  %v1075_v43 = vadd.f32 1.0, %v9142_v40 }
  0x62   :  { %v9146_v44 = vpop.eup %9145  ;;  %2789 = vperm.xlu0 %8557, %v9126_v26   ;;  %9165 = vrcp.f32 %v1076_v41  ;;  %v950_v45 = vadd.f32 1.0, %v9144_v42  ;;  %v6888_v26 = vmul.f32 -1.442695, %v45_v18 }
  0x63   :  { %v9148_v46 = vpop.eup %9147  ;;  %9167 = vrcp.f32 %v1075_v43  ;;  %v949_v47 = vadd.f32 1.0, %v9146_v44 }
  0x64   :  { %v9150_v48 = vpop.eup %9149  ;;  %2164 = vperm.xlu1 %8558, %v9128_v28   ;;  %9169 = vrcp.f32 %v950_v45  ;;  %v1078_v49 = vadd.f32 1.0, %v9148_v46 }
  0x65   :  { %v9152_v50 = vpop.eup %9151  ;;  %9171 = vrcp.f32 %v949_v47  ;;  %v1077_v51 = vadd.f32 1.0, %v9150_v48 }
  0x66   :  { %v9154_v53 = vpop.eup %9153  ;;  %2159 = vperm.xlu0 %8557, %v9130_v30   ;;  %9173 = vrcp.f32 %v1078_v49  ;;  %v952_v54 = vadd.f32 1.0, %v9152_v50 }
  0x67   :  { %v9156_v56 = vpop.eup %9155  ;;  %9175 = vrcp.f32 %v1077_v51  ;;  %v951_v57 = vadd.f32 1.0, %v9154_v53 }
  0x68   :  { %v9158_v59 = vpop.eup %9157  ;;  %2804 = vperm.xlu1 %8558, %v9132_v32   ;;  %9177 = vrcp.f32 %v952_v54  ;;  %v1080_v60 = vadd.f32 1.0, %v9156_v56  ;;  %v47_v54 = vld [vmem:[%s12629_s0 + $0x100] sm:$0xff] }
  0x69   :  { %v9160_v63 = vpop.eup %9159  ;;  %9179 = vrcp.f32 %v951_v57  ;;  %v1079_v1 = vadd.f32 1.0, %v9158_v59  ;;  %v176_v57 = vld [vmem:[%s12629_s0 + $0x508] sm:$0xff] }
  0x6a   :  { %v9162_v4 = vpop.eup %9161  ;;  %2799 = vperm.xlu0 %8557, %v9160_v63   ;;  %9181 = vrcp.f32 %v1080_v60  ;;  %v175_v60 = vld [vmem:[%s12629_s0 + $0x500] sm:$0xff]  ;;  %v6890_v63 = vmul.f32 -1.442695, %v47_v54 }
  0x6b   :  { %v9164_v7 = vpop.eup %9163  ;;  %9183 = vrcp.f32 %v1079_v1  ;;  %v50_v1 = vld [vmem:[%s12629_s0 + $0x118] sm:$0xff]  ;;  %v10156_v54 = vld [vmem:[%s12630_s1] sm:$0xff]  }
  0x6c   :  { %v9166_v10 = vpop.eup %9165  ;;  %2174 = vperm.xlu1 %8558, %v9162_v4   ;;  %9185 = vpow2.f32 %v6885_v61  ;;  %v7019_v4 = vmul.f32 -1.442695, %v176_v57 }
  0x6d   :  { %v9168_v13 = vpop.eup %9167  ;;  %9187 = vpow2.f32 %v6884_v2 }
  0x6e   :  { %v9170_v16 = vpop.eup %9169  ;;  %2169 = vperm.xlu0 %8557, %v9164_v7   ;;  %9189 = vpow2.f32 %v7013_v5  ;;  %v49_v5 = vld [vmem:[%s12629_s0 + $0x110] sm:$0xff]  ;;  %v7018_v7 = vmul.f32 -1.442695, %v175_v60  ;;  %v56_v60 = vld [vmem:[%s12629_s0 + $0x148] sm:$0xff] }
  0x6f   :  { %v9172_v19 = vpop.eup %9171  ;;  %9191 = vpow2.f32 %v7012_v8  ;;  %v178_v8 = vld [vmem:[%s12629_s0 + $0x518] sm:$0xff] }
  0x70   :  { %v9174_v22 = vpop.eup %9173  ;;  %2814 = vperm.xlu1 %8558, %v9166_v10   ;;  %9193 = vpow2.f32 %v6887_v11  ;;  %v6893_v10 = vmul.f32 -1.442695, %v50_v1  ;;  %v177_v11 = vld [vmem:[%s12629_s0 + $0x510] sm:$0xff]  ;;  %v8561_v1 = vld [vmem:[%s12631_s2 + $0x4] ss:$60 sps:$4 sm:$0xff]  }
  0x71   :  { %v9176_v25 = vpop.eup %9175  ;;  %9195 = vpow2.f32 %v6886_v14  ;;  %v52_v14 = vld [vmem:[%s12629_s0 + $0x128] sm:$0xff]  ;;  %5368 = vmatprep.mubr.bf16.mxu1 %v8561_v1 }
  0x72   :  { %v9178_v28 = vpop.eup %9177  ;;  %2809 = vperm.xlu0 %8557, %v9168_v13   ;;  %9197 = vpow2.f32 %v7015_v17  ;;  %v6892_v13 = vmul.f32 -1.442695, %v49_v5  ;;  %v51_v17 = vld [vmem:[%s12629_s0 + $0x120] sm:$0xff]  ;;  %v7392_v5 = vunpack.c.l.bf16 %v10156_v54 }
  0x73   :  { %v9180_v30 = vpop.eup %9179  ;;  %9199 = vpow2.f32 %v7014_v20  ;;  %v180_v20 = vld [vmem:[%s12629_s0 + $0x528] sm:$0xff] }
  0x74   :  { %v9182_v32 = vpop.eup %9181  ;;  %2184 = vperm.xlu1 %8558, %v9170_v16   ;;  %9201 = vpow2.f32 %v6889_v23  ;;  %v7021_v16 = vmul.f32 -1.442695, %v178_v8  ;;  %v179_v23 = vld [vmem:[%s12629_s0 + $0x520] sm:$0xff]  ;;  %v184_v8 = vld [vmem:[%s12629_s0 + $0x548] sm:$0xff] }
  0x75   :  { %v9184_v34 = vpop.eup %9183  ;;  %9203 = vpow2.f32 %v6888_v26  ;;  %v54_v26 = vld [vmem:[%s12629_s0 + $0x138] sm:$0xff] }
  0x76   :  { %v9186_v35 = vpop.eup %9185  ;;  %2179 = vperm.xlu0 %8557, %v9172_v19   ;;  %9205 = vpow2.f32 %v7017_v29  ;;  %v7020_v19 = vmul.f32 -1.442695, %v177_v11  ;;  %v53_v29 = vld [vmem:[%s12629_s0 + $0x130] sm:$0xff] }
  0x77   :  { %v9188_v36 = vpop.eup %9187  ;;  %v954_v37 = vadd.f32 1.0, %v9186_v35  ;;  %9207 = vpow2.f32 %v7016_v31  ;;  %v7022_v31 = vmul.f32 -1.442695, %v179_v23  ;;  %v6896_v35 = vmul.f32 -1.442695, %v53_v29 }
  0x78   :  { %v9190_v38 = vpop.eup %9189  ;;  %2824 = vperm.xlu1 %8558, %v9174_v22   ;;  %v953_v39 = vadd.f32 1.0, %v9188_v36  ;;  %9209 = vpow2.f32 %v6891_v33  ;;  %v6895_v22 = vmul.f32 -1.442695, %v52_v14  ;;  %v6897_v33 = vmul.f32 -1.442695, %v54_v26  ;;  %v183_v14 = vld [vmem:[%s12629_s0 + $0x540] sm:$0xff] }
  0x79   :  { %v9192_v40 = vpop.eup %9191  ;;  %9211 = vrcp.f32 %v954_v37  ;;  %v1082_v41 = vadd.f32 1.0, %v9190_v38  ;;  %v10194_v26 = vld [vmem:[%s12630_s1 + $0x208] sm:$0xff]  }
  0x7a   :  { %v9194_v42 = vpop.eup %9193  ;;  %2819 = vperm.xlu0 %8557, %v9176_v25   ;;  %9213 = vrcp.f32 %v953_v39  ;;  %v1081_v43 = vadd.f32 1.0, %v9192_v40  ;;  %v6894_v25 = vmul.f32 -1.442695, %v51_v17 }
  0x7b   :  { %v9196_v44 = vpop.eup %9195  ;;  %9215 = vrcp.f32 %v1082_v41  ;;  %v956_v45 = vadd.f32 1.0, %v9194_v42 }
  0x7c   :  { %v9198_v46 = vpop.eup %9197  ;;  %2194 = vperm.xlu1 %8558, %v9178_v28   ;;  %9217 = vrcp.f32 %v1081_v43  ;;  %v955_v47 = vadd.f32 1.0, %v9196_v44  ;;  %v7023_v28 = vmul.f32 -1.442695, %v180_v20  ;;  %v6899_v20 = vmul.f32 -1.442695, %v56_v60  ;;  %v188_v60 = vld [vmem:[%s12629_s0 + $0x568] sm:$0xff] }
  0x7d   :  { %v9200_v48 = vpop.eup %9199  ;;  %9219 = vrcp.f32 %v956_v45  ;;  %v1084_v49 = vadd.f32 1.0, %v9198_v46 }
  0x7e   :  { %v9202_v50 = vpop.eup %9201  ;;  %2189 = vperm.xlu0 %8557, %v9180_v30   ;;  %9221 = vrcp.f32 %v955_v47  ;;  %v1083_v51 = vadd.f32 1.0, %v9200_v48 }
  0x7f   :  { %v9204_v52 = vpop.eup %9203  ;;  %9223 = vrcp.f32 %v1084_v49  ;;  %v958_v53 = vadd.f32 1.0, %v9202_v50 }
  0x80   :  { %v9206_v55 = vpop.eup %9205  ;;  %2834 = vperm.xlu1 %8558, %v9182_v32   ;;  %9225 = vrcp.f32 %v1083_v51  ;;  %v957_v56 = vadd.f32 1.0, %v9204_v52 }
  0x81   :  { %v9208_v58 = vpop.eup %9207  ;;  %9227 = vrcp.f32 %v958_v53  ;;  %v1086_v59 = vadd.f32 1.0, %v9206_v55  ;;  %v7909_v53 = vld [vmem:[%s12630_s1 + $0x200] sm:$0xff]  }
  0x82   :  { %v9210_v61 = vpop.eup %9209  ;;  %2829 = vperm.xlu0 %8557, %v9184_v34   ;;  %9229 = vrcp.f32 %v957_v56  ;;  %v1085_v62 = vadd.f32 1.0, %v9208_v58  ;;  %v182_v58 = vld [vmem:[%s12629_s0 + $0x538] sm:$0xff]  ;;  %v7649_v11 = vunpack.c.h.bf16 %v7909_v53 }
  0x83   :  { %v9212_v2 = vpop.eup %9211  ;;  %9231 = vrcp.f32 %v1086_v59  ;;  %v960_v3 = vadd.f32 1.0, %v9210_v61  ;;  %v181_v59 = vld [vmem:[%s12629_s0 + $0x530] sm:$0xff] }
  0x84   :  { %v9214_v6 = vpop.eup %9213  ;;  %2204 = vperm.xlu1 %8558, %v9212_v2   ;;  %9233 = vrcp.f32 %v1085_v62  ;;  %v10170_v62 = vld [vmem:[%s12630_s1 + $0x8] sm:$0xff]  }
  0x85   :  { %v9216_v9 = vpop.eup %9215  ;;  %9235 = vrcp.f32 %v960_v3  ;;  %v7648_v3 = vunpack.c.l.bf16 %v7909_v53  ;;  %v7847_v53 = vld [vmem:[%s12630_s1 + $0x10] sm:$0xff]  }
  0x86   :  { %v9218_v12 = vpop.eup %9217  ;;  %2199 = vperm.xlu0 %8557, %v9214_v6   ;;  %9237 = vpow2.f32 %v6890_v63 }
  0x87   :  { %v9220_v15 = vpop.eup %9219  ;;  %9239 = vpow2.f32 %v7019_v4 }
  0x88   :  { %v9222_v18 = vpop.eup %9221  ;;  %2844 = vperm.xlu1 %8558, %v9216_v9   ;;  %9241 = vpow2.f32 %v7018_v7  ;;  %v55_v7 = vld [vmem:[%s12629_s0 + $0x140] sm:$0xff] }
  0x89   :  { %v9224_v21 = vpop.eup %9223  ;;  %9243 = vpow2.f32 %v6893_v10 }
  0x8a   :  { %v9226_v24 = vpop.eup %9225  ;;  %2839 = vperm.xlu0 %8557, %v9218_v12   ;;  %9245 = vpow2.f32 %v6892_v13  ;;  %v7025_v13 = vmul.f32 -1.442695, %v182_v58  ;;  %v7652_v58 = vunpack.c.l.bf16 %v10194_v26 }
  0x8b   :  { %v9228_v27 = vpop.eup %9227  ;;  %9247 = vpow2.f32 %v7021_v16  ;;  %v7393_v16 = vunpack.c.h.bf16 %v10156_v54 }
  0x8c   :  { %v9230_v30 = vpop.eup %9229  ;;  %2214 = vperm.xlu1 %8558, %v9220_v15   ;;  %9249 = vpow2.f32 %v7020_v19 }
  0x8d   :  { %v9232_v32 = vpop.eup %9231  ;;  %9251 = vpow2.f32 %v6895_v22 }
  0x8e   :  { %v9234_v34 = vpop.eup %9233  ;;  %2209 = vperm.xlu0 %8557, %v9222_v18   ;;  %9253 = vpow2.f32 %v6894_v25  ;;  %v7024_v18 = vmul.f32 -1.442695, %v181_v59  ;;  %v7396_v25 = vunpack.c.l.bf16 %v10170_v62 }
  0x8f   :  { %v9236_v36 = vpop.eup %9235  ;;  %9255 = vpow2.f32 %v7023_v28  ;;  %v58_v28 = vld [vmem:[%s12629_s0 + $0x158] sm:$0xff] }
  0x90   :  { %v9238_v37 = vpop.eup %9237  ;;  %2854 = vperm.xlu1 %8558, %v9224_v21   ;;  %9257 = vpow2.f32 %v7022_v31  ;;  %v8564_v21 = vld [vmem:[%s12631_s2 + $0x24] ss:$60 sps:$4 sm:$0xff]  }
  0x91   :  { %v9240_v38 = vpop.eup %9239  ;;  %v959_v39 = vadd.f32 1.0, %v9238_v37  ;;  %9259 = vpow2.f32 %v6897_v33  ;;  %v7027_v33 = vmul.f32 -1.442695, %v184_v8  ;;  %6108 = vmatprep.mubr.bf16.mxu0 %v8564_v21  ;;  %v7031_v8 = vmul.f32 -1.442695, %v188_v60 }
  0x92   :  { %v9242_v40 = vpop.eup %9241  ;;  %2849 = vperm.xlu0 %8557, %v9226_v24   ;;  %v1088_v41 = vadd.f32 1.0, %v9240_v38  ;;  %9261 = vpow2.f32 %v6896_v35  ;;  %v7397_v24 = vunpack.c.h.bf16 %v10170_v62  ;;  %v7026_v38 = vmul.f32 -1.442695, %v183_v14 }
  0x93   :  { %v9244_v42 = vpop.eup %9243  ;;  %9263 = vrcp.f32 %v959_v39  ;;  %v1087_v43 = vadd.f32 1.0, %v9242_v40  ;;  %v186_v39 = vld [vmem:[%s12629_s0 + $0x558] sm:$0xff] }
  0x94   :  { %v9246_v44 = vpop.eup %9245  ;;  %2224 = vperm.xlu1 %8558, %v9228_v27   ;;  %9265 = vrcp.f32 %v1088_v41  ;;  %v962_v45 = vadd.f32 1.0, %v9244_v42  ;;  %v6898_v27 = vmul.f32 -1.442695, %v55_v7  ;;  %v6901_v42 = vmul.f32 -1.442695, %v58_v28 }
  0x95   :  { %v9248_v46 = vpop.eup %9247  ;;  %9267 = vrcp.f32 %v1087_v43  ;;  %v961_v47 = vadd.f32 1.0, %v9246_v44  ;;  %v185_v43 = vld [vmem:[%s12629_s0 + $0x550] sm:$0xff]  ;;  %v7029_v54 = vmul.f32 -1.442695, %v186_v39  ;;  %v7401_v7 = vunpack.c.h.bf16 %v7847_v53 }
  0x96   :  { %v9250_v48 = vpop.eup %9249  ;;  %2219 = vperm.xlu0 %8557, %v9230_v30   ;;  %9269 = vrcp.f32 %v962_v45  ;;  %v1090_v49 = vadd.f32 1.0, %v9248_v46  ;;  %v7028_v59 = vmul.f32 -1.442695, %v185_v43 }
  0x97   :  { %v9252_v50 = vpop.eup %9251  ;;  %9271 = vrcp.f32 %v961_v47  ;;  %v1089_v51 = vadd.f32 1.0, %v9250_v48  ;;  %v60_v48 = vld [vmem:[%s12629_s0 + $0x168] sm:$0xff] }
  0x98   :  { %v9254_v52 = vpop.eup %9253  ;;  %2864 = vperm.xlu1 %8558, %v9232_v32   ;;  %9273 = vrcp.f32 %v1090_v49  ;;  %v964_v55 = vadd.f32 1.0, %v9252_v50  ;;  %v6903_v62 = vmul.f32 -1.442695, %v60_v48 }
  0x99   :  { %v9256_v56 = vpop.eup %9255  ;;  %9275 = vrcp.f32 %v1089_v51  ;;  %v963_v57 = vadd.f32 1.0, %v9254_v52  ;;  %v7653_v52 = vunpack.c.h.bf16 %v10194_v26 }
  0x9a   :  { %v9258_v61 = vpop.eup %9257  ;;  %2859 = vperm.xlu0 %8557, %v9234_v34   ;;  %9277 = vrcp.f32 %v964_v55  ;;  %v1092_v63 = vadd.f32 1.0, %v9256_v56  ;;  %v57_v34 = vld [vmem:[%s12629_s0 + $0x150] sm:$0xff]  ;;  %v59_v55 = vld [vmem:[%s12629_s0 + $0x160] sm:$0xff] }
  0x9b   :  { %v9260_v2 = vpop.eup %9259  ;;  %v2710_v4 = vpop.permute.xlu1 %2709  ;;  %9279 = vrcp.f32 %v963_v57  ;;  %v1091_v6 = vadd.f32 1.0, %v9258_v61  ;;  %v6900_v47 = vmul.f32 -1.442695, %v57_v34 }
  0x9c   :  { %v9262_v9 = vpop.eup %9261  ;;  %v2070_v10 = vpop.permute.xlu0 %2069  ;;  %2234 = vperm.xlu1 %8558, %v9236_v36   ;;  %9281 = vrcp.f32 %v1092_v63  ;;  %v966_v12 = vadd.f32 1.0, %v9260_v2  ;;  %v3335_v30 = vmul.f32 %v7648_v3, %v2710_v4  ;;  %v6902_v3 = vmul.f32 -1.442695, %v59_v55 }
  0x9d   :  { %v9264_v15 = vpop.eup %9263  ;;  %9283 = vrcp.f32 %v1091_v6  ;;  %v965_v17 = vadd.f32 1.0, %v9262_v9  ;;  %v3207_v36 = vmul.f32 %v7392_v5, %v2070_v10 }
  0x9e   :  { %v9266_v19 = vpop.eup %9265  ;;  %2229 = vperm.xlu0 %8557, %v9264_v15   ;;  %9285 = vrcp.f32 %v966_v12  ;;  %v7911_v12 = vld [vmem:[%s12630_s1 + $0x210] sm:$0xff]  }
  0x9f   :  { %v9268_v22 = vpop.eup %9267  ;;  %v2715_v23 = vpop.permute.xlu1 %2714  ;;  %9287 = vrcp.f32 %v965_v17  ;;  %v7657_v21 = vunpack.c.h.bf16 %v7911_v12  ;;  %v7656_v26 = vunpack.c.l.bf16 %v7911_v12 }
  0xa0   :  { %v9270_v29 = vpop.eup %9269  ;;  %v3336_v31 = vmul.f32 %v7649_v11, %v2715_v23  ;;  %v2075_v32 = vpop.permute.xlu0 %2074  ;;  %2874 = vperm.xlu1 %8558, %v9266_v19   ;;  %9289 = vpow2.f32 %v7025_v13  ;;  %v7400_v11 = vunpack.c.l.bf16 %v7847_v53 }
  0xa1   :  { %v9272_v35 = vpop.eup %9271  ;;  %v3208_v37 = vmul.f32 %v7393_v16, %v2075_v32  ;;  %9291 = vpow2.f32 %v7024_v18 }
  0xa2   :  { %v9274_v40 = vpop.eup %9273  ;;  %2869 = vperm.xlu0 %8557, %v9268_v22   ;;  %v3499_v41 = vpack.c.bf16 %v3336_v31, %v3335_v30  ;;  %9293 = vpow2.f32 %v6899_v20  ;;  %v7848_v22 = vld [vmem:[%s12630_s1 + $0x18] sm:$0xff]  }
  0xa3   :  { %v9276_v44 = vpop.eup %9275  ;;  %v2085_v45 = vpop.permute.xlu1 %2084  ;;  %v3435_v46 = vpack.c.bf16 %v3208_v37, %v3207_v36  ;;  %9295 = vpow2.f32 %v6898_v27  ;;  %v7405_v37 = vunpack.c.h.bf16 %v7848_v22 }
  0xa4   :  { %v9278_v49 = vpop.eup %9277  ;;  %v3210_v50 = vmul.f32 %v7397_v24, %v2085_v45  ;;  %v2080_v51 = vpop.permute.xlu0 %2079  ;;  %6077 = vmatpush1.bf16.msra.mxu0 %v3499_v41  ;;  %2244 = vperm.xlu1 %8558, %v9270_v29   ;;  %9297 = vpow2.f32 %v7027_v33 }
  0xa5   :  { %v9280_v56 = vpop.eup %9279  ;;  %v3209_v57 = vmul.f32 %v7396_v25, %v2080_v51  ;;  %5337 = vmatpush1.bf16.msra.mxu1 %v3435_v46  ;;  %6078 = vmatprep.subr.bf16.mxu0 %v9889_v0  ;;  %9299 = vpow2.f32 %v7026_v38  ;;  %v10241_v38 = vld [vmem:[%s12630_s1 + $0x218] sm:$0xff]   ;;  %v187_v51 = vld [vmem:[%s12629_s0 + $0x560] sm:$0xff] }
  0xa6   :  { %v9282_v61 = vpop.eup %9281  ;;  %2239 = vperm.xlu0 %8557, %v9272_v35   ;;  %5338 = vmatprep.subr.bf16.mxu1 %v9889_v0  ;;  %9301 = vpow2.f32 %v6901_v42  ;;  %v7660_v60 = vunpack.c.l.bf16 %v10241_v38 }
  0xa7   :  { %v10224_v63 = vpop.eup %9283  ;;  %v3436_v1 = vpack.c.bf16 %v3210_v50, %v3209_v57  ;;  %v2725_v2 = vpop.permute.xlu1 %2724  ;;  %9303 = vpow2.f32 %v6900_v47  ;;  %v61_v57 = vld [vmem:[%s12629_s0 + $0x170] sm:$0xff] }
  0xa8   :  { %v10226_v4 = vpop.eup %9285  ;;  %v3338_v5 = vmul.f32 %v7653_v52, %v2725_v2  ;;  %v2720_v6 = vpop.permute.xlu0 %2719  ;;  %2884 = vperm.xlu1 %8558, %v9274_v40   ;;  %9305 = vpow2.f32 %v7029_v54  ;;  %v7661_v54 = vunpack.c.h.bf16 %v10241_v38  ;;  %v7030_v2 = vmul.f32 -1.442695, %v187_v51 }
  0xa9   :  { %v10228_v9 = vpop.eup %9287  ;;  %v3337_v10 = vmul.f32 %v7652_v58, %v2720_v6  ;;  %5339 = vmatpush1.bf16.msra.mxu1 %v3436_v1  ;;  %9307 = vpow2.f32 %v7028_v59 }
  0xaa   :  { %v9290_v13 = vpop.eup %9289  ;;  %2879 = vperm.xlu0 %8557, %v9276_v44   ;;  %5340 = vmatprep.subr.bf16.mxu1 %v9889_v0  ;;  %9309 = vpow2.f32 %v6903_v62  ;;  %v7404_v44 = vunpack.c.l.bf16 %v7848_v22 }
  0xab   :  { %v9292_v14 = vpop.eup %9291  ;;  %v3500_v15 = vpack.c.bf16 %v3338_v5, %v3337_v10  ;;  %v2095_v16 = vpop.permute.xlu1 %2094  ;;  %v1094_v17 = vadd.f32 1.0, %v9290_v13  ;;  %9311 = vpow2.f32 %v6902_v3  ;;  %v190_v3 = vld [vmem:[%s12629_s0 + $0x578] sm:$0xff]  ;;  %v189_v10 = vld [vmem:[%s12629_s0 + $0x570] sm:$0xff] }
  0xac   :  { %v9294_v18 = vpop.eup %9293  ;;  %v3212_v19 = vmul.f32 %v7401_v7, %v2095_v16  ;;  %v2090_v20 = vpop.permute.xlu0 %2089  ;;  %2254 = vperm.xlu1 %8558, %v9278_v49   ;;  %v1093_v23 = vadd.f32 1.0, %v9292_v14  ;;  %9313 = vpow2.f32 %v7031_v8  ;;  %v10248_v49 = vld [vmem:[%s12630_s1 + $0x20] sm:$0xff]   ;;  %v6904_v14 = vmul.f32 -1.442695, %v61_v57 }
  0xad   :  { %v9296_v24 = vpop.eup %9295  ;;  %v3211_v25 = vmul.f32 %v7400_v11, %v2090_v20  ;;  %6079 = vmatpush1.bf16.msra.mxu0 %v3500_v15  ;;  %9315 = vrcp.f32 %v1094_v17  ;;  %v968_v27 = vadd.f32 1.0, %v9294_v18  ;;  %v7409_v6 = vunpack.c.h.bf16 %v10248_v49  ;;  %v10271_v7 = vld [vmem:[%s12630_s1 + $0x220] sm:$0xff]   ;;  %v64_v15 = vld [vmem:[%s12629_s0 + $0x188] sm:$0xff] }
  0xae   :  { %v9298_v28 = vpop.eup %9297  ;;  %2249 = vperm.xlu0 %8557, %v9280_v56   ;;  %6080 = vmatprep.subr.bf16.mxu0 %v9889_v0  ;;  %9317 = vrcp.f32 %v1093_v23  ;;  %v967_v29 = vadd.f32 1.0, %v9296_v24  ;;  %v62_v56 = vld [vmem:[%s12629_s0 + $0x178] sm:$0xff]  ;;  %v7033_v18 = vmul.f32 -1.442695, %v190_v3  ;;  %v7408_v22 = vunpack.c.l.bf16 %v10248_v49  ;;  %v192_v24 = vld [vmem:[%s12629_s0 + $0x588] sm:$0xff]  ;;  %v193_v49 = vld [vmem:[%s12629_s0 + $0x590] sm:$0xff] }
  0xaf   :  { %v9300_v30 = vpop.eup %9299  ;;  %v3437_v31 = vpack.c.bf16 %v3212_v19, %v3211_v25  ;;  %v2735_v32 = vpop.permute.xlu1 %2734  ;;  %9319 = vrcp.f32 %v968_v27  ;;  %v1096_v33 = vadd.f32 1.0, %v9298_v28  ;;  %v63_v19 = vld [vmem:[%s12629_s0 + $0x180] sm:$0xff]  ;;  %v7032_v23 = vmul.f32 -1.442695, %v189_v10  ;;  %v10291_v28 = vld [vmem:[%s12630_s1 + $0x28] sm:$0xff]  }
  0xb0   :  { %v9302_v34 = vpop.eup %9301  ;;  %v3340_v35 = vmul.f32 %v7657_v21, %v2735_v32  ;;  %v2730_v36 = vpop.permute.xlu0 %2729  ;;  %2894 = vperm.xlu1 %8558, %v9282_v61   ;;  %9321 = vrcp.f32 %v967_v29  ;;  %v1095_v39 = vadd.f32 1.0, %v9300_v30  ;;  %v7665_v27 = vunpack.c.h.bf16 %v10271_v7  ;;  %v191_v30 = vld [vmem:[%s12629_s0 + $0x580] sm:$0xff] }
  0xb1   :  { %v9304_v40 = vpop.eup %9303  ;;  %v3339_v41 = vmul.f32 %v7656_v26, %v2730_v36  ;;  %5341 = vmatpush1.bf16.msra.mxu1 %v3437_v31  ;;  %9323 = vrcp.f32 %v1096_v33  ;;  %v970_v42 = vadd.f32 1.0, %v9302_v34  ;;  %v6907_v29 = vmul.f32 -1.442695, %v64_v15 }
  0xb2   :  { %v9306_v43 = vpop.eup %9305  ;;  %2889 = vperm.xlu0 %8557, %v10224_v63   ;;  %5342 = vmatprep.subr.bf16.mxu1 %v9889_v0  ;;  %9325 = vrcp.f32 %v1095_v39  ;;  %v969_v45 = vadd.f32 1.0, %v9304_v40  ;;  %v6906_v34 = vmul.f32 -1.442695, %v63_v19  ;;  %v7035_v38 = vmul.f32 -1.442695, %v192_v24  ;;  %v65_v39 = vld [vmem:[%s12629_s0 + $0x190] sm:$0xff] }
  0xb3   :  { %v9308_v46 = vpop.eup %9307  ;;  %v3501_v47 = vpack.c.bf16 %v3340_v35, %v3339_v41  ;;  %v2105_v48 = vpop.permute.xlu1 %2104  ;;  %9327 = vrcp.f32 %v970_v42  ;;  %v1098_v50 = vadd.f32 1.0, %v9306_v43  ;;  %v66_v35 = vld [vmem:[%s12629_s0 + $0x198] sm:$0xff]  ;;  %v7664_v42 = vunpack.c.l.bf16 %v10271_v7 }
  0xb4   :  { %v9310_v52 = vpop.eup %9309  ;;  %v3214_v53 = vmul.f32 %v7405_v37, %v2105_v48  ;;  %2264 = vperm.xlu1 %8558, %v10226_v4   ;;  %9329 = vrcp.f32 %v969_v45  ;;  %v1097_v55 = vadd.f32 1.0, %v9308_v46  ;;  %v7034_v43 = vmul.f32 -1.442695, %v191_v30 }
  0xb5   :  { %v9312_v58 = vpop.eup %9311  ;;  %v2100_v59 = vpop.permute.xlu0 %2099  ;;  %6081 = vmatpush1.bf16.msra.mxu0 %v3501_v47  ;;  %9331 = vrcp.f32 %v1098_v50  ;;  %v972_v61 = vadd.f32 1.0, %v9310_v52  ;;  %v7413_v47 = vunpack.c.h.bf16 %v10291_v28  ;;  %v6909_v48 = vmul.f32 -1.442695, %v66_v35 }
  0xb6   :  { %v9314_v62 = vpop.eup %9313  ;;  %v3213_v63 = vmul.f32 %v7404_v44, %v2100_v59  ;;  %2259 = vperm.xlu0 %8557, %v10228_v9   ;;  %6082 = vmatprep.subr.bf16.mxu0 %v9889_v0  ;;  %9333 = vrcp.f32 %v1097_v55  ;;  %v971_v1 = vadd.f32 1.0, %v9312_v58  ;;  %v6905_v9 = vmul.f32 -1.442695, %v62_v56  ;;  %v194_v44 = vld [vmem:[%s12629_s0 + $0x598] sm:$0xff]  ;;  %v7914_v56 = vld [vmem:[%s12630_s1 + $0x228] sm:$0xff]  }
  0xb7   :  { %v9316_v4 = vpop.eup %9315  ;;  %v2745_v5 = vpop.permute.xlu1 %2744  ;;  %9335 = vrcp.f32 %v972_v61  ;;  %v1100_v8 = vadd.f32 1.0, %v9314_v62  ;;  %v7037_v57 = vmul.f32 -1.442695, %v194_v44  ;;  %v7036_v61 = vmul.f32 -1.442695, %v193_v49 }
  0xb8   :  { %v9318_v11 = vpop.eup %9317  ;;  %v3438_v12 = vpack.c.bf16 %v3214_v53, %v3213_v63  ;;  %v3342_v13 = vmul.f32 %v7661_v54, %v2745_v5  ;;  %2904 = vperm.xlu1 %8558, %v9316_v4   ;;  %9337 = vrcp.f32 %v971_v1  ;;  %v6908_v53 = vmul.f32 -1.442695, %v65_v39  ;;  %v7851_v5 = vld [vmem:[%s12630_s1 + $0x30] sm:$0xff]  }
  0xb9   :  { %v9320_v16 = vpop.eup %9319  ;;  %v2740_v17 = vpop.permute.xlu0 %2739  ;;  %9339 = vrcp.f32 %v1100_v8  ;;  %v7669_v4 = vunpack.c.h.bf16 %v7914_v56  ;;  %v7417_v15 = vunpack.c.h.bf16 %v7851_v5 }
  0xba   :  { %v9322_v20 = vpop.eup %9321  ;;  %v3341_v21 = vmul.f32 %v7660_v60, %v2740_v17  ;;  %2899 = vperm.xlu0 %8557, %v9318_v11   ;;  %5343 = vmatpush1.bf16.msra.mxu1 %v3438_v12  ;;  %9341 = vpow2.f32 %v7030_v2  ;;  %v7412_v60 = vunpack.c.l.bf16 %v10291_v28  ;;  %v7668_v11 = vunpack.c.l.bf16 %v7914_v56 }
  0xbb   :  { %v9324_v25 = vpop.eup %9323  ;;  %v2115_v26 = vpop.permute.xlu1 %2114  ;;  %5344 = vmatprep.subr.bf16.mxu1 %v9889_v0  ;;  %9343 = vpow2.f32 %v6905_v9 }
  0xbc   :  { %v9326_v31 = vpop.eup %9325  ;;  %v3502_v32 = vpack.c.bf16 %v3342_v13, %v3341_v21  ;;  %v3216_v33 = vmul.f32 %v7409_v6, %v2115_v26  ;;  %2274 = vperm.xlu1 %8558, %v9320_v16   ;;  %9345 = vpow2.f32 %v6904_v14 }
  0xbd   :  { %v9328_v36 = vpop.eup %9327  ;;  %v2110_v37 = vpop.permute.xlu0 %2109  ;;  %9347 = vpow2.f32 %v7033_v18 }
  0xbe   :  { %v9330_v40 = vpop.eup %9329  ;;  %v3215_v41 = vmul.f32 %v7408_v22, %v2110_v37  ;;  %2269 = vperm.xlu0 %8557, %v9322_v20   ;;  %6083 = vmatpush1.bf16.msra.mxu0 %v3502_v32  ;;  %9349 = vpow2.f32 %v7032_v23  ;;  %v10329_v20 = vld [vmem:[%s12630_s1 + $0x230] sm:$0xff]  }
  0xbf   :  { %v9332_v45 = vpop.eup %9331  ;;  %v2755_v46 = vpop.permute.xlu1 %2754  ;;  %6084 = vmatprep.subr.bf16.mxu0 %v9889_v0  ;;  %9351 = vpow2.f32 %v6907_v29  ;;  %v7672_v44 = vunpack.c.l.bf16 %v10329_v20 }
  0xc0   :  { %v9334_v50 = vpop.eup %9333  ;;  %v3439_v51 = vpack.c.bf16 %v3216_v33, %v3215_v41  ;;  %v3344_v52 = vmul.f32 %v7665_v27, %v2755_v46  ;;  %2914 = vperm.xlu1 %8558, %v9324_v25   ;;  %9353 = vpow2.f32 %v6906_v34  ;;  %v7416_v27 = vunpack.c.l.bf16 %v7851_v5  ;;  %v67_v46 = vld [vmem:[%s12629_s0 + $0x1a0] sm:$0xff]  ;;  %v69_v5 = vld [vmem:[%s12629_s0 + $0x1b0] sm:$0xff] }
  0xc1   :  { %v10311_v54 = vpop.eup %9335  ;;  %v2750_v55 = vpop.permute.xlu0 %2749  ;;  %9355 = vpow2.f32 %v7035_v38  ;;  %v68_v38 = vld [vmem:[%s12629_s0 + $0x1a8] sm:$0xff] }
  0xc2   :  { %v10316_v58 = vpop.eup %9337  ;;  %v3343_v59 = vmul.f32 %v7664_v42, %v2750_v55  ;;  %2909 = vperm.xlu0 %8557, %v9326_v31   ;;  %5345 = vmatpush1.bf16.msra.mxu1 %v3439_v51  ;;  %9357 = vpow2.f32 %v7034_v43  ;;  %v7673_v31 = vunpack.c.h.bf16 %v10329_v20  ;;  %v72_v20 = vld [vmem:[%s12629_s0 + $0x1c8] sm:$0xff] }
  0xc3   :  { %v10319_v62 = vpop.eup %9339  ;;  %v2125_v63 = vpop.permute.xlu1 %2124  ;;  %5346 = vmatprep.subr.bf16.mxu1 %v9889_v0  ;;  %9359 = vpow2.f32 %v6909_v48 }
  0xc4   :  { %v9342_v1 = vpop.eup %9341  ;;  %v3503_v2 = vpack.c.bf16 %v3344_v52, %v3343_v59  ;;  %v3218_v3 = vmul.f32 %v7413_v47, %v2125_v63  ;;  %2284 = vperm.xlu1 %8558, %v9328_v36   ;;  %9361 = vpow2.f32 %v6908_v53  ;;  %v10337_v36 = vld [vmem:[%s12630_s1 + $0x38] sm:$0xff]   ;;  %v6911_v52 = vmul.f32 -1.442695, %v68_v38  ;;  %v196_v53 = vld [vmem:[%s12629_s0 + $0x5a8] sm:$0xff] }
  0xc5   :  { %v9344_v6 = vpop.eup %9343  ;;  %v2120_v7 = vpop.permute.xlu0 %2119  ;;  %v1099_v8 = vadd.f32 1.0, %v9342_v1  ;;  %9363 = vpow2.f32 %v7037_v57  ;;  %v7421_v49 = vunpack.c.h.bf16 %v10337_v36  ;;  %v70_v59 = vld [vmem:[%s12629_s0 + $0x1b8] sm:$0xff]  ;;  %v6910_v1 = vmul.f32 -1.442695, %v67_v46 }
  0xc6   :  { %v9346_v9 = vpop.eup %9345  ;;  %v3217_v10 = vmul.f32 %v7412_v60, %v2120_v7  ;;  %2279 = vperm.xlu0 %8557, %v9330_v40   ;;  %6085 = vmatpush1.bf16.msra.mxu0 %v3503_v2  ;;  %v974_v12 = vadd.f32 1.0, %v9344_v6  ;;  %9365 = vpow2.f32 %v7036_v61 }
  0xc7   :  { %v9348_v13 = vpop.eup %9347  ;;  %v2765_v14 = vpop.permute.xlu1 %2764  ;;  %6086 = vmatprep.subr.bf16.mxu0 %v9889_v0  ;;  %9367 = vrcp.f32 %v1099_v8  ;;  %v973_v16 = vadd.f32 1.0, %v9346_v9  ;;  %v10373_v9 = vld [vmem:[%s12630_s1 + $0x40] sm:$0xff]  }
  0xc8   :  { %v9350_v17 = vpop.eup %9349  ;;  %v3440_v18 = vpack.c.bf16 %v3218_v3, %v3217_v10  ;;  %v3346_v19 = vmul.f32 %v7669_v4, %v2765_v14  ;;  %2924 = vperm.xlu1 %8558, %v9332_v45   ;;  %9369 = vrcp.f32 %v974_v12  ;;  %v1102_v21 = vadd.f32 1.0, %v9348_v13 }
  0xc9   :  { %v9352_v22 = vpop.eup %9351  ;;  %v2760_v23 = vpop.permute.xlu0 %2759  ;;  %9371 = vrcp.f32 %v973_v16  ;;  %v1101_v24 = vadd.f32 1.0, %v9350_v17  ;;  %v7039_v4 = vmul.f32 -1.442695, %v196_v53  ;;  %v197_v16 = vld [vmem:[%s12629_s0 + $0x5b0] sm:$0xff] }
  0xca   :  { %v9354_v25 = vpop.eup %9353  ;;  %v3345_v26 = vmul.f32 %v7668_v11, %v2760_v23  ;;  %2919 = vperm.xlu0 %8557, %v9334_v50   ;;  %5347 = vmatpush1.bf16.msra.mxu1 %v3440_v18  ;;  %9373 = vrcp.f32 %v1102_v21  ;;  %v976_v28 = vadd.f32 1.0, %v9352_v22  ;;  %v10352_v50 = vld [vmem:[%s12630_s1 + $0x238] sm:$0xff]  }
  0xcb   :  { %v9356_v29 = vpop.eup %9355  ;;  %v2135_v30 = vpop.permute.xlu1 %2134  ;;  %5348 = vmatprep.subr.bf16.mxu1 %v9889_v0  ;;  %9375 = vrcp.f32 %v1101_v24  ;;  %v975_v32 = vadd.f32 1.0, %v9354_v25  ;;  %v7677_v8 = vunpack.c.h.bf16 %v10352_v50  ;;  %v198_v11 = vld [vmem:[%s12629_s0 + $0x5b8] sm:$0xff]  ;;  %v7676_v23 = vunpack.c.l.bf16 %v10352_v50  ;;  %v71_v25 = vld [vmem:[%s12629_s0 + $0x1c0] sm:$0xff] }
  0xcc   :  { %v9358_v33 = vpop.eup %9357  ;;  %v3504_v34 = vpack.c.bf16 %v3346_v19, %v3345_v26  ;;  %v3220_v35 = vmul.f32 %v7417_v15, %v2135_v30  ;;  %2294 = vperm.xlu1 %8558, %v10311_v54   ;;  %9377 = vrcp.f32 %v976_v28  ;;  %v1104_v37 = vadd.f32 1.0, %v9356_v29  ;;  %v10393_v29 = vld [vmem:[%s12630_s1 + $0x240] sm:$0xff]  }
  0xcd   :  { %v9360_v39 = vpop.eup %9359  ;;  %v2130_v40 = vpop.permute.xlu0 %2129  ;;  %9379 = vrcp.f32 %v975_v32  ;;  %v1103_v41 = vadd.f32 1.0, %v9358_v33  ;;  %v6913_v15 = vmul.f32 -1.442695, %v70_v59  ;;  %v6912_v19 = vmul.f32 -1.442695, %v69_v5 }
  0xce   :  { %v9362_v42 = vpop.eup %9361  ;;  %v3219_v43 = vmul.f32 %v7416_v27, %v2130_v40  ;;  %2289 = vperm.xlu0 %8557, %v10316_v58   ;;  %6087 = vmatpush1.bf16.msra.mxu0 %v3504_v34  ;;  %9381 = vrcp.f32 %v1104_v37  ;;  %v978_v45 = vadd.f32 1.0, %v9360_v39  ;;  %v195_v58 = vld [vmem:[%s12629_s0 + $0x5a0] sm:$0xff]  ;;  %v7041_v24 = vmul.f32 -1.442695, %v198_v11  ;;  %v74_v40 = vld [vmem:[%s12629_s0 + $0x1d8] sm:$0xff] }
  0xcf   :  { %v9364_v47 = vpop.eup %9363  ;;  %v2775_v48 = vpop.permute.xlu1 %2774  ;;  %6088 = vmatprep.subr.bf16.mxu0 %v9889_v0  ;;  %9383 = vrcp.f32 %v1103_v41  ;;  %v977_v51 = vadd.f32 1.0, %v9362_v42  ;;  %v7038_v10 = vmul.f32 -1.442695, %v195_v58  ;;  %v7425_v28 = vunpack.c.h.bf16 %v10373_v9 }
  0xd0   :  { %v9366_v54 = vpop.eup %9365  ;;  %v3441_v55 = vpack.c.bf16 %v3220_v35, %v3219_v43  ;;  %v3348_v56 = vmul.f32 %v7673_v31, %v2775_v48  ;;  %2934 = vperm.xlu1 %8558, %v10319_v62   ;;  %9385 = vrcp.f32 %v978_v45  ;;  %v1106_v57 = vadd.f32 1.0, %v9364_v47  ;;  %v200_v31 = vld [vmem:[%s12629_s0 + $0x5c8] sm:$0xff] }
  0xd1   :  { %v9368_v60 = vpop.eup %9367  ;;  %v2770_v61 = vpop.permute.xlu0 %2769  ;;  %9387 = vrcp.f32 %v977_v51  ;;  %v1105_v63 = vadd.f32 1.0, %v9366_v54  ;;  %v7420_v62 = vunpack.c.l.bf16 %v10337_v36  ;;  %v7040_v30 = vmul.f32 -1.442695, %v197_v16  ;;  %v199_v36 = vld [vmem:[%s12629_s0 + $0x5c0] sm:$0xff] }
  0xd2   :  { %v9370_v2 = vpop.eup %9369  ;;  %v3347_v3 = vmul.f32 %v7672_v44, %v2770_v61  ;;  %2929 = vperm.xlu0 %8557, %v9368_v60   ;;  %5349 = vmatpush1.bf16.msra.mxu1 %v3441_v55  ;;  %9389 = vrcp.f32 %v1106_v57  ;;  %v6915_v35 = vmul.f32 -1.442695, %v72_v20  ;;  %v6914_v39 = vmul.f32 -1.442695, %v71_v25 }
  0xd3   :  { %v9372_v6 = vpop.eup %9371  ;;  %v2145_v7 = vpop.permute.xlu1 %2144  ;;  %5350 = vmatprep.subr.bf16.mxu1 %v9889_v0  ;;  %9391 = vrcp.f32 %v1105_v63  ;;  %v7424_v43 = vunpack.c.l.bf16 %v10373_v9  ;;  %v7043_v44 = vmul.f32 -1.442695, %v200_v31  ;;  %v7681_v47 = vunpack.c.h.bf16 %v10393_v29  ;;  %v10433_v31 = vld [vmem:[%s12630_s1 + $0x250] sm:$0xff]  }
  0xd4   :  { %v9374_v12 = vpop.eup %9373  ;;  %v3505_v13 = vpack.c.bf16 %v3348_v56, %v3347_v3  ;;  %v3222_v14 = vmul.f32 %v7421_v49, %v2145_v7  ;;  %2304 = vperm.xlu1 %8558, %v9370_v2   ;;  %9393 = vpow2.f32 %v6911_v52  ;;  %v7042_v48 = vmul.f32 -1.442695, %v199_v36  ;;  %v7854_v52 = vld [vmem:[%s12630_s1 + $0x48] sm:$0xff]  }
  0xd5   :  { %v9376_v17 = vpop.eup %9375  ;;  %v2140_v18 = vpop.permute.xlu0 %2139  ;;  %9395 = vpow2.f32 %v6910_v1  ;;  %v6917_v53 = vmul.f32 -1.442695, %v74_v40  ;;  %v7680_v58 = vunpack.c.l.bf16 %v10393_v29  ;;  %v7429_v61 = vunpack.c.h.bf16 %v7854_v52 }
  0xd6   :  { %v9378_v21 = vpop.eup %9377  ;;  %v3221_v22 = vmul.f32 %v7420_v62, %v2140_v18  ;;  %2299 = vperm.xlu0 %8557, %v9372_v6   ;;  %6089 = vmatpush1.bf16.msra.mxu0 %v3505_v13  ;;  %9397 = vpow2.f32 %v7039_v4  ;;  %v7918_v62 = vld [vmem:[%s12630_s1 + $0x248] sm:$0xff]  }
  0xd7   :  { %v9380_v26 = vpop.eup %9379  ;;  %v2785_v27 = vpop.permute.xlu1 %2784  ;;  %6090 = vmatprep.subr.bf16.mxu0 %v9889_v0  ;;  %9399 = vpow2.f32 %v7038_v10  ;;  %v7428_v10 = vunpack.c.l.bf16 %v7854_v52 }
  0xd8   :  { %v9382_v32 = vpop.eup %9381  ;;  %v3442_v33 = vpack.c.bf16 %v3222_v14, %v3221_v22  ;;  %v3350_v34 = vmul.f32 %v7677_v8, %v2785_v27  ;;  %2944 = vperm.xlu1 %8558, %v9374_v12   ;;  %9401 = vpow2.f32 %v6913_v15  ;;  %v7685_v14 = vunpack.c.h.bf16 %v7918_v62 }
  0xd9   :  { %v9384_v37 = vpop.eup %9383  ;;  %v2780_v38 = vpop.permute.xlu0 %2779  ;;  %9403 = vpow2.f32 %v6912_v19  ;;  %v10425_v19 = vld [vmem:[%s12630_s1 + $0x50] sm:$0xff]  }
  0xda   :  { %v9386_v41 = vpop.eup %9385  ;;  %v3349_v42 = vmul.f32 %v7676_v23, %v2780_v38  ;;  %2939 = vperm.xlu0 %8557, %v9376_v17   ;;  %5351 = vmatpush1.bf16.msra.mxu1 %v3442_v33  ;;  %9405 = vpow2.f32 %v7041_v24  ;;  %v73_v33 = vld [vmem:[%s12629_s0 + $0x1d0] sm:$0xff]  ;;  %v202_v38 = vld [vmem:[%s12629_s0 + $0x5d8] sm:$0xff] }
  0xdb   :  { %v10405_v45 = vpop.eup %9387  ;;  %v2155_v46 = vpop.permute.xlu1 %2154  ;;  %5352 = vmatprep.subr.bf16.mxu1 %v9889_v0  ;;  %9407 = vpow2.f32 %v7040_v30  ;;  %v7433_v30 = vunpack.c.h.bf16 %v10425_v19 }
  0xdc   :  { %v10409_v49 = vpop.eup %9389  ;;  %v3506_v50 = vpack.c.bf16 %v3350_v34, %v3349_v42  ;;  %v3224_v51 = vmul.f32 %v7425_v28, %v2155_v46  ;;  %2314 = vperm.xlu1 %8558, %v9378_v21   ;;  %9409 = vpow2.f32 %v6915_v35  ;;  %v7432_v42 = vunpack.c.l.bf16 %v10425_v19 }
  0xdd   :  { %v10414_v54 = vpop.eup %9391  ;;  %v2150_v55 = vpop.permute.xlu0 %2149  ;;  %9411 = vpow2.f32 %v6914_v39  ;;  %v201_v39 = vld [vmem:[%s12629_s0 + $0x5d0] sm:$0xff] }
  0xde   :  { %v9394_v56 = vpop.eup %9393  ;;  %v3223_v57 = vmul.f32 %v7424_v43, %v2150_v55  ;;  %2309 = vperm.xlu0 %8557, %v9380_v26   ;;  %6091 = vmatpush1.bf16.msra.mxu0 %v3506_v50  ;;  %9413 = vpow2.f32 %v7043_v44  ;;  %v7684_v26 = vunpack.c.l.bf16 %v7918_v62 }
  0xdf   :  { %v9396_v59 = vpop.eup %9395  ;;  %v2795_v60 = vpop.permute.xlu1 %2794  ;;  %6092 = vmatprep.subr.bf16.mxu0 %v9889_v0  ;;  %v980_v63 = vadd.f32 1.0, %v9394_v56  ;;  %9415 = vpow2.f32 %v7042_v48  ;;  %v76_v48 = vld [vmem:[%s12629_s0 + $0x1e8] sm:$0xff] }
  0xe0   :  { %v9398_v1 = vpop.eup %9397  ;;  %v3443_v2 = vpack.c.bf16 %v3224_v51, %v3223_v57  ;;  %v3352_v3 = vmul.f32 %v7681_v47, %v2795_v60  ;;  %2954 = vperm.xlu1 %8558, %v9382_v32   ;;  %v979_v4 = vadd.f32 1.0, %v9396_v59  ;;  %9417 = vpow2.f32 %v6917_v53  ;;  %v204_v60 = vld [vmem:[%s12629_s0 + $0x5e8] sm:$0xff] }
  0xe1   :  { %v9400_v5 = vpop.eup %9399  ;;  %v2790_v6 = vpop.permute.xlu0 %2789  ;;  %9419 = vrcp.f32 %v980_v63  ;;  %v1108_v7 = vadd.f32 1.0, %v9398_v1  ;;  %v6916_v47 = vmul.f32 -1.442695, %v73_v33  ;;  %v7689_v51 = vunpack.c.h.bf16 %v10433_v31 }
  0xe2   :  { %v9402_v8 = vpop.eup %9401  ;;  %v3351_v9 = vmul.f32 %v7680_v58, %v2790_v6  ;;  %2949 = vperm.xlu0 %8557, %v9384_v37   ;;  %5353 = vmatpush1.bf16.msra.mxu1 %v3443_v2  ;;  %9421 = vrcp.f32 %v979_v4  ;;  %v1107_v11 = vadd.f32 1.0, %v9400_v5  ;;  %v7045_v53 = vmul.f32 -1.442695, %v202_v38  ;;  %v10458_v58 = vld [vmem:[%s12630_s1 + $0x58] sm:$0xff]   ;;  %v203_v2 = vld [vmem:[%s12629_s0 + $0x5e0] sm:$0xff] }
  0xe3   :  { %v9404_v12 = vpop.eup %9403  ;;  %v2165_v13 = vpop.permute.xlu1 %2164  ;;  %5354 = vmatprep.subr.bf16.mxu1 %v9889_v0  ;;  %9423 = vrcp.f32 %v1108_v7  ;;  %v982_v15 = vadd.f32 1.0, %v9402_v8  ;;  %v7044_v59 = vmul.f32 -1.442695, %v201_v39  ;;  %v6919_v1 = vmul.f32 -1.442695, %v76_v48  ;;  %v78_v6 = vld [vmem:[%s12629_s0 + $0x1f8] sm:$0xff] }
  0xe4   :  { %v9406_v16 = vpop.eup %9405  ;;  %v3507_v17 = vpack.c.bf16 %v3352_v3, %v3351_v9  ;;  %v3226_v18 = vmul.f32 %v7429_v61, %v2165_v13  ;;  %2324 = vperm.xlu1 %8558, %v9386_v41   ;;  %9425 = vrcp.f32 %v1107_v11  ;;  %v981_v20 = vadd.f32 1.0, %v9404_v12  ;;  %v77_v12 = vld [vmem:[%s12629_s0 + $0x1f0] sm:$0xff]  ;;  %v7857_v38 = vld [vmem:[%s12630_s1 + $0x60] sm:$0xff]  }
  0xe5   :  { %v9408_v21 = vpop.eup %9407  ;;  %v2160_v22 = vpop.permute.xlu0 %2159  ;;  %9427 = vrcp.f32 %v982_v15  ;;  %v1110_v23 = vadd.f32 1.0, %v9406_v16  ;;  %v7688_v4 = vunpack.c.l.bf16 %v10433_v31  ;;  %v7437_v9 = vunpack.c.h.bf16 %v10458_v58  ;;  %v79_v31 = vld [vmem:[%s12629_s0 + $0x200] sm:$0xff] }
  0xe6   :  { %v9410_v24 = vpop.eup %9409  ;;  %v3225_v25 = vmul.f32 %v7428_v10, %v2160_v22  ;;  %2319 = vperm.xlu0 %8557, %v10405_v45   ;;  %6093 = vmatpush1.bf16.msra.mxu0 %v3507_v17  ;;  %9429 = vrcp.f32 %v981_v20  ;;  %v1109_v27 = vadd.f32 1.0, %v9408_v21  ;;  %v10475_v10 = vld [vmem:[%s12630_s1 + $0x258] sm:$0xff]   ;;  %v7047_v11 = vmul.f32 -1.442695, %v204_v60  ;;  %v205_v21 = vld [vmem:[%s12629_s0 + $0x5f0] sm:$0xff] }
  0xe7   :  { %v9412_v28 = vpop.eup %9411  ;;  %v2805_v29 = vpop.permute.xlu1 %2804  ;;  %6094 = vmatprep.subr.bf16.mxu0 %v9889_v0  ;;  %9431 = vrcp.f32 %v1110_v23  ;;  %v984_v32 = vadd.f32 1.0, %v9410_v24  ;;  %v7046_v16 = vmul.f32 -1.442695, %v203_v2  ;;  %v206_v17 = vld [vmem:[%s12629_s0 + $0x5f8] sm:$0xff]  ;;  %v6921_v20 = vmul.f32 -1.442695, %v78_v6 }
  0xe8   :  { %v9414_v34 = vpop.eup %9413  ;;  %v3444_v35 = vpack.c.bf16 %v3226_v18, %v3225_v25  ;;  %v3354_v36 = vmul.f32 %v7685_v14, %v2805_v29  ;;  %2964 = vperm.xlu1 %8558, %v10409_v49   ;;  %9433 = vrcp.f32 %v1109_v27  ;;  %v983_v37 = vadd.f32 1.0, %v9412_v28 }
  0xe9   :  { %v9416_v40 = vpop.eup %9415  ;;  %v2800_v41 = vpop.permute.xlu0 %2799  ;;  %9435 = vrcp.f32 %v984_v32  ;;  %v1112_v43 = vadd.f32 1.0, %v9414_v34  ;;  %v7436_v24 = vunpack.c.l.bf16 %v10458_v58  ;;  %v6920_v25 = vmul.f32 -1.442695, %v77_v12 }
  0xea   :  { %v9418_v44 = vpop.eup %9417  ;;  %v3353_v45 = vmul.f32 %v7684_v26, %v2800_v41  ;;  %2959 = vperm.xlu0 %8557, %v10414_v54   ;;  %5355 = vmatpush1.bf16.msra.mxu1 %v3444_v35  ;;  %9437 = vrcp.f32 %v983_v37  ;;  %v1111_v46 = vadd.f32 1.0, %v9416_v40  ;;  %v75_v54 = vld [vmem:[%s12629_s0 + $0x1e0] sm:$0xff]  ;;  %v80_v26 = vld [vmem:[%s12629_s0 + $0x208] sm:$0xff]  ;;  %v7693_v29 = vunpack.c.h.bf16 %v10475_v10 }
  0xeb   :  { %v9420_v49 = vpop.eup %9419  ;;  %v2175_v50 = vpop.permute.xlu1 %2174  ;;  %5356 = vmatprep.subr.bf16.mxu1 %v9889_v0  ;;  %9439 = vrcp.f32 %v1112_v43  ;;  %v986_v52 = vadd.f32 1.0, %v9418_v44  ;;  %v6918_v5 = vmul.f32 -1.442695, %v75_v54  ;;  %v7048_v35 = vmul.f32 -1.442695, %v205_v21 }
  0xec   :  { %v9422_v55 = vpop.eup %9421  ;;  %v3508_v56 = vpack.c.bf16 %v3354_v36, %v3353_v45  ;;  %v3228_v57 = vmul.f32 %v7433_v30, %v2175_v50  ;;  %2334 = vperm.xlu1 %8558, %v9420_v49   ;;  %9441 = vrcp.f32 %v1111_v46  ;;  %v7049_v30 = vmul.f32 -1.442695, %v206_v17  ;;  %v7921_v50 = vld [vmem:[%s12630_s1 + $0x260] sm:$0xff]  }
  0xed   :  { %v9424_v61 = vpop.eup %9423  ;;  %v2170_v63 = vpop.permute.xlu0 %2169  ;;  %9443 = vrcp.f32 %v986_v52  ;;  %v6923_v39 = vmul.f32 -1.442695, %v80_v26  ;;  %v6922_v43 = vmul.f32 -1.442695, %v79_v31  ;;  %v7441_v49 = vunpack.c.h.bf16 %v7857_v38 }
  0xee   :  { %v9426_v3 = vpop.eup %9425  ;;  %v3227_v62 = vmul.f32 %v7432_v42, %v2170_v63  ;;  %2329 = vperm.xlu0 %8557, %v9422_v55   ;;  %6095 = vmatpush1.bf16.msra.mxu0 %v3508_v56  ;;  %9445 = vpow2.f32 %v6916_v47  ;;  %v7692_v42 = vunpack.c.l.bf16 %v10475_v10  ;;  %v7440_v56 = vunpack.c.l.bf16 %v7857_v38 }
  0xef   :  { %v9428_v7 = vpop.eup %9427  ;;  %v2815_v8 = vpop.permute.xlu1 %2814  ;;  %6096 = vmatprep.subr.bf16.mxu0 %v9889_v0  ;;  %9447 = vpow2.f32 %v7045_v53  ;;  %v7697_v60 = vunpack.c.h.bf16 %v7921_v50 }
  0xf0   :  { %v9430_v13 = vpop.eup %9429  ;;  %v3445_v14 = vpack.c.bf16 %v3228_v57, %v3227_v62  ;;  %v3356_v15 = vmul.f32 %v7689_v51, %v2815_v8  ;;  %2974 = vperm.xlu1 %8558, %v9424_v61   ;;  %9449 = vpow2.f32 %v7044_v59 }
  0xf1   :  { %v9432_v18 = vpop.eup %9431  ;;  %v2810_v19 = vpop.permute.xlu0 %2809  ;;  %9451 = vpow2.f32 %v6919_v1 }
  0xf2   :  { %v9434_v22 = vpop.eup %9433  ;;  %v3355_v23 = vmul.f32 %v7688_v4, %v2810_v19  ;;  %2969 = vperm.xlu0 %8557, %v9426_v3   ;;  %5357 = vmatpush1.bf16.msra.mxu1 %v3445_v14  ;;  %9453 = vpow2.f32 %v6918_v5  ;;  %v10513_v3 = vld [vmem:[%s12630_s1 + $0x68] sm:$0xff]  }
  0xf3   :  { %v9436_v27 = vpop.eup %9435  ;;  %v2185_v28 = vpop.permute.xlu1 %2184  ;;  %5358 = vmatprep.subr.bf16.mxu1 %v9889_v0  ;;  %9455 = vpow2.f32 %v7047_v11  ;;  %v7444_v26 = vunpack.c.l.bf16 %v10513_v3 }
  0xf4   :  { %v9438_v32 = vpop.eup %9437  ;;  %v3509_v33 = vpack.c.bf16 %v3356_v15, %v3355_v23  ;;  %v3230_v34 = vmul.f32 %v7437_v9, %v2185_v28  ;;  %2344 = vperm.xlu1 %8558, %v9428_v7   ;;  %9457 = vpow2.f32 %v7046_v16  ;;  %v7696_v9 = vunpack.c.l.bf16 %v7921_v50  ;;  %v207_v28 = vld [vmem:[%s12629_s0 + $0x600] sm:$0xff]  ;;  %v209_v50 = vld [vmem:[%s12629_s0 + $0x610] sm:$0xff] }
  0xf5   :  { %v10495_v36 = vpop.eup %9439  ;;  %v2180_v37 = vpop.permute.xlu0 %2179  ;;  %9459 = vpow2.f32 %v6921_v20  ;;  %v208_v20 = vld [vmem:[%s12629_s0 + $0x608] sm:$0xff] }
  0xf6   :  { %v10500_v40 = vpop.eup %9441  ;;  %v3229_v41 = vmul.f32 %v7436_v24, %v2180_v37  ;;  %2339 = vperm.xlu0 %8557, %v9430_v13   ;;  %6097 = vmatpush1.bf16.msra.mxu0 %v3509_v33  ;;  %9461 = vpow2.f32 %v6920_v25  ;;  %v7445_v13 = vunpack.c.h.bf16 %v10513_v3  ;;  %v212_v3 = vld [vmem:[%s12629_s0 + $0x628] sm:$0xff] }
  0xf7   :  { %v10503_v44 = vpop.eup %9443  ;;  %v2825_v45 = vpop.permute.xlu1 %2824  ;;  %6098 = vmatprep.subr.bf16.mxu0 %v9889_v0  ;;  %9463 = vpow2.f32 %v7049_v30 }
  0xf8   :  { %v9446_v46 = vpop.eup %9445  ;;  %v3446_v47 = vpack.c.bf16 %v3230_v34, %v3229_v41  ;;  %v3358_v48 = vmul.f32 %v7693_v29, %v2825_v45  ;;  %2984 = vperm.xlu1 %8558, %v9432_v18   ;;  %9465 = vpow2.f32 %v7048_v35  ;;  %v10521_v18 = vld [vmem:[%s12630_s1 + $0x268] sm:$0xff]   ;;  %v7051_v34 = vmul.f32 -1.442695, %v208_v20  ;;  %v82_v35 = vld [vmem:[%s12629_s0 + $0x218] sm:$0xff] }
  0xf9   :  { %v9448_v51 = vpop.eup %9447  ;;  %v2820_v52 = vpop.permute.xlu0 %2819  ;;  %v985_v53 = vadd.f32 1.0, %v9446_v46  ;;  %9467 = vpow2.f32 %v6923_v39  ;;  %v7701_v31 = vunpack.c.h.bf16 %v10521_v18  ;;  %v210_v41 = vld [vmem:[%s12629_s0 + $0x618] sm:$0xff]  ;;  %v7050_v46 = vmul.f32 -1.442695, %v207_v28 }
  0xfa   :  { %v9450_v54 = vpop.eup %9449  ;;  %v3357_v55 = vmul.f32 %v7692_v42, %v2820_v52  ;;  %2979 = vperm.xlu0 %8557, %v9434_v22   ;;  %5359 = vmatpush1.bf16.msra.mxu1 %v3446_v47  ;;  %v1114_v57 = vadd.f32 1.0, %v9448_v51  ;;  %9469 = vpow2.f32 %v6922_v43 }
  0xfb   :  { %v9452_v58 = vpop.eup %9451  ;;  %v2195_v59 = vpop.permute.xlu1 %2194  ;;  %5360 = vmatprep.subr.bf16.mxu1 %v9889_v0  ;;  %9471 = vrcp.f32 %v985_v53  ;;  %v1113_v61 = vadd.f32 1.0, %v9450_v54  ;;  %v10557_v54 = vld [vmem:[%s12630_s1 + $0x270] sm:$0xff]  }
  0xfc   :  { %v9454_v63 = vpop.eup %9453  ;;  %v3510_v1 = vpack.c.bf16 %v3358_v48, %v3357_v55  ;;  %v3232_v2 = vmul.f32 %v7441_v49, %v2195_v59  ;;  %2354 = vperm.xlu1 %8558, %v9436_v27   ;;  %9473 = vrcp.f32 %v1114_v57  ;;  %v988_v62 = vadd.f32 1.0, %v9452_v58 }
  0xfd   :  { %v9456_v4 = vpop.eup %9455  ;;  %v2190_v5 = vpop.permute.xlu0 %2189  ;;  %9475 = vrcp.f32 %v1113_v61  ;;  %v987_v6 = vadd.f32 1.0, %v9454_v63  ;;  %v6925_v49 = vmul.f32 -1.442695, %v82_v35  ;;  %v83_v61 = vld [vmem:[%s12629_s0 + $0x220] sm:$0xff] }
  0xfe   :  { %v9458_v7 = vpop.eup %9457  ;;  %v3231_v8 = vmul.f32 %v7440_v56, %v2190_v5  ;;  %2349 = vperm.xlu0 %8557, %v9438_v32   ;;  %6099 = vmatpush1.bf16.msra.mxu0 %v3510_v1  ;;  %9477 = vrcp.f32 %v988_v62  ;;  %v1116_v10 = vadd.f32 1.0, %v9456_v4  ;;  %v10536_v32 = vld [vmem:[%s12630_s1 + $0x70] sm:$0xff]   ;;  %v84_v56 = vld [vmem:[%s12629_s0 + $0x228] sm:$0xff] }
  0xff   :  { %v9460_v11 = vpop.eup %9459  ;;  %v2835_v12 = vpop.permute.xlu1 %2834  ;;  %6100 = vmatprep.subr.bf16.mxu0 %v9889_v0  ;;  %9479 = vrcp.f32 %v987_v6  ;;  %v1115_v14 = vadd.f32 1.0, %v9458_v7  ;;  %v7449_v53 = vunpack.c.h.bf16 %v10536_v32  ;;  %v7448_v5 = vunpack.c.l.bf16 %v10536_v32  ;;  %v211_v7 = vld [vmem:[%s12629_s0 + $0x620] sm:$0xff] }
 0x100   :  { %v9462_v15 = vpop.eup %9461  ;;  %v3447_v16 = vpack.c.bf16 %v3232_v2, %v3231_v8  ;;  %v3360_v17 = vmul.f32 %v7697_v60, %v2835_v12  ;;  %2994 = vperm.xlu1 %8558, %v10495_v36   ;;  %9481 = vrcp.f32 %v1116_v10  ;;  %v990_v19 = vadd.f32 1.0, %v9460_v11  ;;  %v10577_v11 = vld [vmem:[%s12630_s1 + $0x78] sm:$0xff]  }
 0x101   :  { %v9464_v21 = vpop.eup %9463  ;;  %v2830_v22 = vpop.permute.xlu0 %2829  ;;  %9483 = vrcp.f32 %v1115_v14  ;;  %v989_v23 = vadd.f32 1.0, %v9462_v15  ;;  %v7053_v60 = vmul.f32 -1.442695, %v210_v41  ;;  %v7052_v2 = vmul.f32 -1.442695, %v209_v50 }
 0x102   :  { %v9466_v24 = vpop.eup %9465  ;;  %v3359_v25 = vmul.f32 %v7696_v9, %v2830_v22  ;;  %2989 = vperm.xlu0 %8557, %v10500_v40   ;;  %5361 = vmatpush1.bf16.msra.mxu1 %v3447_v16  ;;  %9485 = vrcp.f32 %v990_v19  ;;  %v1118_v27 = vadd.f32 1.0, %v9464_v21  ;;  %v81_v40 = vld [vmem:[%s12629_s0 + $0x210] sm:$0xff]  ;;  %v6927_v6 = vmul.f32 -1.442695, %v84_v56  ;;  %v214_v22 = vld [vmem:[%s12629_s0 + $0x638] sm:$0xff] }
 0x103   :  { %v9468_v29 = vpop.eup %9467  ;;  %v2205_v30 = vpop.permute.xlu1 %2204  ;;  %5362 = vmatprep.subr.bf16.mxu1 %v9889_v0  ;;  %9487 = vrcp.f32 %v989_v23  ;;  %v1117_v33 = vadd.f32 1.0, %v9466_v24  ;;  %v6924_v55 = vmul.f32 -1.442695, %v81_v40  ;;  %v7705_v10 = vunpack.c.h.bf16 %v10557_v54 }
 0x104   :  { %v9470_v36 = vpop.eup %9469  ;;  %v3511_v37 = vpack.c.bf16 %v3360_v17, %v3359_v25  ;;  %v3234_v38 = vmul.f32 %v7445_v13, %v2205_v30  ;;  %2364 = vperm.xlu1 %8558, %v10503_v44   ;;  %9489 = vrcp.f32 %v1118_v27  ;;  %v992_v39 = vadd.f32 1.0, %v9468_v29  ;;  %v86_v13 = vld [vmem:[%s12629_s0 + $0x238] sm:$0xff] }
 0x105   :  { %v9472_v42 = vpop.eup %9471  ;;  %v2200_v43 = vpop.permute.xlu0 %2199  ;;  %9491 = vrcp.f32 %v1117_v33  ;;  %v991_v45 = vadd.f32 1.0, %v9470_v36  ;;  %v7700_v44 = vunpack.c.l.bf16 %v10521_v18  ;;  %v6926_v12 = vmul.f32 -1.442695, %v83_v61  ;;  %v85_v18 = vld [vmem:[%s12629_s0 + $0x230] sm:$0xff] }
 0x106   :  { %v9474_v47 = vpop.eup %9473  ;;  %v3233_v48 = vmul.f32 %v7444_v26, %v2200_v43  ;;  %2359 = vperm.xlu0 %8557, %v9472_v42   ;;  %6101 = vmatpush1.bf16.msra.mxu0 %v3511_v37  ;;  %9493 = vrcp.f32 %v992_v39  ;;  %v7055_v17 = vmul.f32 -1.442695, %v212_v3  ;;  %v7054_v21 = vmul.f32 -1.442695, %v211_v7  ;;  %v10615_v3 = vld [vmem:[%s12630_s1 + $0x280] sm:$0xff]  }
 0x107   :  { %v9476_v51 = vpop.eup %9475  ;;  %v2845_v52 = vpop.permute.xlu1 %2844  ;;  %6102 = vmatprep.subr.bf16.mxu0 %v9889_v0  ;;  %9495 = vrcp.f32 %v991_v45  ;;  %v7704_v25 = vunpack.c.l.bf16 %v10557_v54  ;;  %v6929_v26 = vmul.f32 -1.442695, %v86_v13  ;;  %v7453_v29 = vunpack.c.h.bf16 %v10577_v11  ;;  %v8562_v13 = vld [vmem:[%s12631_s2 + $0x20] ss:$60 sps:$4 sm:$0xff]  }
 0x108   :  { %v9478_v57 = vpop.eup %9477  ;;  %v3448_v58 = vpack.c.bf16 %v3234_v38, %v3233_v48  ;;  %v3362_v59 = vmul.f32 %v7701_v31, %v2845_v52  ;;  %3004 = vperm.xlu1 %8558, %v9474_v47   ;;  %9497 = vpow2.f32 %v7051_v34  ;;  %v6928_v30 = vmul.f32 -1.442695, %v85_v18  ;;  %v7924_v34 = vld [vmem:[%s12630_s1 + $0x278] sm:$0xff]   ;;  %v213_v18 = vld [vmem:[%s12629_s0 + $0x630] sm:$0xff] }
 0x109   :  { %v9480_v63 = vpop.eup %9479  ;;  %v2840_v1 = vpop.permute.xlu0 %2839  ;;  %9499 = vpow2.f32 %v7050_v46  ;;  %v7057_v35 = vmul.f32 -1.442695, %v214_v22  ;;  %v7452_v40 = vunpack.c.l.bf16 %v10577_v11  ;;  %v7709_v43 = vunpack.c.h.bf16 %v7924_v34 }
 0x10a   :  { %v9482_v62 = vpop.eup %9481  ;;  %v3361_v4 = vmul.f32 %v7700_v44, %v2840_v1  ;;  %2999 = vperm.xlu0 %8557, %v9476_v51   ;;  %5363 = vmatpush1.bf16.msra.mxu1 %v3448_v58  ;;  %9501 = vpow2.f32 %v6925_v49  ;;  %v10605_v44 = vld [vmem:[%s12630_s1 + $0x80] sm:$0xff]  }
 0x10b   :  { %v9484_v8 = vpop.eup %9483  ;;  %v2215_v9 = vpop.permute.xlu1 %2214  ;;  %5364 = vmatprep.subr.bf16.mxu1 %v9889_v0  ;;  %9503 = vpow2.f32 %v6924_v55  ;;  %v7708_v55 = vunpack.c.l.bf16 %v7924_v34 }
 0x10c   :  { %v9486_v14 = vpop.eup %9485  ;;  %v3512_v15 = vpack.c.bf16 %v3362_v59, %v3361_v4  ;;  %v3236_v16 = vmul.f32 %v7449_v53, %v2215_v9  ;;  %2374 = vperm.xlu1 %8558, %v9478_v57   ;;  %9505 = vpow2.f32 %v7053_v60  ;;  %v7457_v59 = vunpack.c.h.bf16 %v10605_v44 }
 0x10d   :  { %v9488_v19 = vpop.eup %9487  ;;  %v2210_v20 = vpop.permute.xlu0 %2209  ;;  %9507 = vpow2.f32 %v7052_v2  ;;  %v8559_v2 = vld [vmem:[%s12631_s2] ss:$60 sps:$4 sm:$0xff]   ;;  %v7456_v9 = vunpack.c.l.bf16 %v10605_v44 }
 0x10e   :  { %v9490_v23 = vpop.eup %9489  ;;  %v3235_v24 = vmul.f32 %v7448_v5, %v2210_v20  ;;  %2369 = vperm.xlu0 %8557, %v9480_v63   ;;  %6103 = vmatpush1.bf16.msra.mxu0 %v3512_v15  ;;  %9509 = vpow2.f32 %v6927_v6  ;;  %v8565_v15 = vld [vmem:[%s12631_s2 + $0x7c] ss:$60 sps:$4 sm:$0xff]  }
 0x10f   :  { %v10589_v27 = vpop.eup %9491  ;;  %v2855_v28 = vpop.permute.xlu1 %2854  ;;  %6104 = vmatprep.subr.bf16.mxu0 %v9889_v0  ;;  %9511 = vpow2.f32 %v6926_v12 }
 0x110   :  { %v10593_v31 = vpop.eup %9493  ;;  %v3449_v32 = vpack.c.bf16 %v3236_v16, %v3235_v24  ;;  %v3364_v33 = vmul.f32 %v7705_v10, %v2855_v28  ;;  %3014 = vperm.xlu1 %8558, %v9482_v62   ;;  %9513 = vpow2.f32 %v7055_v17  ;;  %v10630_v16 = vld [vmem:[%s12630_s1 + $0x88] sm:$0xff]   ;;  %v87_v24 = vld [vmem:[%s12629_s0 + $0x240] sm:$0xff] }
 0x111   :  { %v10598_v36 = vpop.eup %9495  ;;  %v2850_v37 = vpop.permute.xlu0 %2849  ;;  %9515 = vpow2.f32 %v7054_v21 }
 0x112   :  { %v9498_v38 = vpop.eup %9497  ;;  %v3363_v39 = vmul.f32 %v7704_v25, %v2850_v37  ;;  %3009 = vperm.xlu0 %8557, %v9484_v8   ;;  %5365 = vmatpush1.bf16.msra.mxu1 %v3449_v32  ;;  %9517 = vpow2.f32 %v6929_v26  ;;  %v7056_v32 = vmul.f32 -1.442695, %v213_v18  ;;  %v7461_v37 = vunpack.c.h.bf16 %v10630_v16 }
 0x113   :  { %v9500_v41 = vpop.eup %9499  ;;  %v2225_v42 = vpop.permute.xlu1 %2224  ;;  %5366 = vmatprep.subr.bf16.mxu1 %v9889_v0  ;;  %v1120_v45 = vadd.f32 1.0, %v9498_v38  ;;  %9519 = vpow2.f32 %v6928_v30  ;;  %v8567_v38 = vld [vmem:[%s12631_s2 + $0x78] ss:$60 sps:$4 sm:$0xff]  }
 0x114   :  { %v9502_v46 = vpop.eup %9501  ;;  %v3513_v47 = vpack.c.bf16 %v3364_v33, %v3363_v39  ;;  %v3238_v48 = vmul.f32 %v7453_v29, %v2225_v42  ;;  %2384 = vperm.xlu1 %8558, %v9486_v14   ;;  %v1119_v49 = vadd.f32 1.0, %v9500_v41  ;;  %9521 = vpow2.f32 %v7057_v35  ;;  %v216_v33 = vld [vmem:[%s12629_s0 + $0x648] sm:$0xff]  ;;  %v215_v41 = vld [vmem:[%s12629_s0 + $0x640] sm:$0xff] }
 0x115   :  { %v9504_v50 = vpop.eup %9503  ;;  %v2220_v51 = vpop.permute.xlu0 %2219  ;;  %9523 = vrcp.f32 %v1120_v45  ;;  %v994_v52 = vadd.f32 1.0, %v9502_v46  ;;  %v7713_v14 = vunpack.c.h.bf16 %v10615_v3  ;;  %v10661_v46 = vld [vmem:[%s12630_s1 + $0x288] sm:$0xff]  }
 0x116   :  { %v9506_v53 = vpop.eup %9505  ;;  %v3237_v54 = vmul.f32 %v7452_v40, %v2220_v51  ;;  %2379 = vperm.xlu0 %8557, %v9488_v19   ;;  %6105 = vmatpush1.bf16.msra.mxu0 %v3513_v47  ;;  %9525 = vrcp.f32 %v1119_v49  ;;  %v993_v56 = vadd.f32 1.0, %v9504_v50  ;;  %v6930_v47 = vmul.f32 -1.442695, %v87_v24  ;;  %v89_v51 = vld [vmem:[%s12629_s0 + $0x250] sm:$0xff] }
 0x117   :  { %v9508_v57 = vpop.eup %9507  ;;  %v2865_v58 = vpop.permute.xlu1 %2864  ;;  %6106 = vmatprep.subr.bf16.mxu0 %v9889_v0  ;;  %9527 = vrcp.f32 %v994_v52  ;;  %v1122_v60 = vadd.f32 1.0, %v9506_v53  ;;  %v7059_v50 = vmul.f32 -1.442695, %v216_v33 }
 0x118   :  { %v9510_v61 = vpop.eup %9509  ;;  %v3450_v63 = vpack.c.bf16 %v3238_v48, %v3237_v54  ;;  %v3366_v1 = vmul.f32 %v7709_v43, %v2865_v58  ;;  %3024 = vperm.xlu1 %8558, %v9490_v23   ;;  %9529 = vrcp.f32 %v993_v56  ;;  %v1121_v62 = vadd.f32 1.0, %v9508_v57  ;;  %v88_v23 = vld [vmem:[%s12629_s0 + $0x248] sm:$0xff]  ;;  %v90_v48 = vld [vmem:[%s12629_s0 + $0x258] sm:$0xff] }
 0x119   :  { %v9512_v4 = vpop.eup %9511  ;;  %v2860_v5 = vpop.permute.xlu0 %2859  ;;  %9531 = vrcp.f32 %v1122_v60  ;;  %v996_v6 = vadd.f32 1.0, %v9510_v61  ;;  %v6931_v40 = vmul.f32 -1.442695, %v88_v23  ;;  %v7460_v54 = vunpack.c.l.bf16 %v10630_v16  ;;  %v218_v56 = vld [vmem:[%s12629_s0 + $0x658] sm:$0xff]  ;;  %v8571_v61 = vld [vmem:[%s12631_s2 + $0xf4] ss:$60 sps:$4 sm:$0xff]  }
 0x11a   :  { %v9514_v7 = vpop.eup %9513  ;;  %v3365_v8 = vmul.f32 %v7708_v55, %v2860_v5  ;;  %3019 = vperm.xlu0 %8557, %v10589_v27   ;;  %5367 = vmatpush1.bf16.msra.mxu1 %v3450_v63  ;;  %9533 = vrcp.f32 %v1121_v62  ;;  %v995_v10 = vadd.f32 1.0, %v9512_v4  ;;  %v7712_v27 = vunpack.c.l.bf16 %v10615_v3  ;;  %v8570_v60 = vld [vmem:[%s12631_s2 + $0x98] ss:$60 sps:$4 sm:$0xff]  }
 0x11b   :  { %v9516_v11 = vpop.eup %9515  ;;  %v2235_v12 = vpop.permute.xlu1 %2234  ;;  %5521 = vmatprep.subr.bf16.mxu1 %v9889_v0  ;;  %9535 = vrcp.f32 %v996_v6  ;;  %v1124_v17 = vadd.f32 1.0, %v9514_v7  ;;  %v7058_v55 = vmul.f32 -1.442695, %v215_v41  ;;  %v6933_v63 = vmul.f32 -1.442695, %v90_v48  ;;  %v10687_v4 = vld [vmem:[%s12630_s1 + $0x90] sm:$0xff]  }
 0x11c   :  { %v9518_v19 = vpop.eup %9517  ;;  %v3514_v20 = vpack.c.bf16 %v3366_v1, %v3365_v8  ;;  %v3240_v21 = vmul.f32 %v7457_v59, %v2235_v12  ;;  %2394 = vperm.xlu1 %8558, %v10593_v31   ;;  %9537 = vrcp.f32 %v995_v10  ;;  %v1123_v22 = vadd.f32 1.0, %v9516_v11  ;;  %v217_v1 = vld [vmem:[%s12629_s0 + $0x650] sm:$0xff]  ;;  %v92_v6 = vld [vmem:[%s12629_s0 + $0x268] sm:$0xff]  ;;  %v91_v10 = vld [vmem:[%s12629_s0 + $0x260] sm:$0xff] }
 0x11d   :  { %v9520_v25 = vpop.eup %9519  ;;  %5369 = vmatmul.mubr.bf16.vlgmr.msra.gmra.mrb[0].mxu1 %v8559_v2  ;;  %v2230_v26 = vpop.permute.xlu0 %2229  ;;  %9539 = vrcp.f32 %v1124_v17  ;;  %v998_v28 = vadd.f32 1.0, %v9518_v19  ;;  %v7717_v59 = vunpack.c.h.bf16 %v10661_v46  ;;  %v6932_v5 = vmul.f32 -1.442695, %v89_v51  ;;  %v8574_v19 = vld [vmem:[%s12631_s2 + $0x114] ss:$60 sps:$4 sm:$0xff]  }
 0x11e   :  { %v9522_v29 = vpop.eup %9521  ;;  %v3239_v30 = vmul.f32 %v7456_v9, %v2230_v26  ;;  %2389 = vperm.xlu0 %8557, %v10598_v36   ;;  %6107 = vmatpush1.bf16.msra.mxu0 %v3514_v20  ;;  %9541 = vrcp.f32 %v1123_v22  ;;  %v997_v31 = vadd.f32 1.0, %v9520_v25  ;;  %v8568_v36 = vld [vmem:[%s12631_s2 + $0x9c] ss:$60 sps:$4 sm:$0xff]   ;;  %v7061_v9 = vmul.f32 -1.442695, %v218_v56 }
 0x11f   :  { %v9524_v34 = vpop.eup %9523  ;;  %v2875_v35 = vpop.permute.xlu1 %2874  ;;  %5376 = vmatprep.mubr.bf16.mxu1 %v8565_v15  ;;  %6261 = vmatprep.subr.bf16.mxu0 %v9889_v0  ;;  %9543 = vrcp.f32 %v998_v28  ;;  %v1126_v39 = vadd.f32 1.0, %v9522_v29  ;;  %v220_v15 = vld [vmem:[%s12629_s0 + $0x668] sm:$0xff]  ;;  %v7465_v18 = vunpack.c.h.bf16 %v10687_v4  ;;  %v6935_v20 = vmul.f32 -1.442695, %v92_v6  ;;  %v7927_v29 = vld [vmem:[%s12630_s1 + $0x290] sm:$0xff]   ;;  %v94_v6 = vld [vmem:[%s12629_s0 + $0x278] sm:$0xff] }
 0x120   :  { %v9526_v42 = vpop.eup %9525  ;;  %v3451_v43 = vpack.c.bf16 %v3240_v21, %v3239_v30  ;;  %v3368_v45 = vmul.f32 %v7713_v14, %v2875_v35  ;;  %3034 = vperm.xlu1 %8558, %v9524_v34   ;;  %9545 = vrcp.f32 %v997_v31  ;;  %v7060_v14 = vmul.f32 -1.442695, %v217_v1  ;;  %v219_v21 = vld [vmem:[%s12629_s0 + $0x660] sm:$0xff]  ;;  %v8573_v25 = vld [vmem:[%s12631_s2 + $0xf0] ss:$60 sps:$4 sm:$0xff]  }
 0x121   :  { %v9528_v44 = vpop.eup %9527  ;;  %6109 = vmatmul.mubr.bf16.vlgmr.msra.gmra.mrb[0].mxu0 %v8562_v13  ;;  %v2870_v49 = vpop.permute.xlu0 %2869  ;;  %9547 = vrcp.f32 %v1126_v39  ;;  %v7716_v13 = vunpack.c.l.bf16 %v10661_v46  ;;  %v6934_v26 = vmul.f32 -1.442695, %v91_v10  ;;  %v7063_v30 = vmul.f32 -1.442695, %v220_v15  ;;  %v8582_v10 = vld [vmem:[%s12631_s2 + $0x188] ss:$60 sps:$4 sm:$0xff]  }
 0x122   :  { %v9530_v52 = vpop.eup %9529  ;;  %v3367_v53 = vmul.f32 %v7712_v27, %v2870_v49  ;;  %3029 = vperm.xlu0 %8557, %v9526_v42   ;;  %5522 = vmatpush1.bf16.msra.mxu1 %v3451_v43  ;;  %9549 = vpow2.f32 %v7056_v32  ;;  %v7464_v33 = vunpack.c.l.bf16 %v10687_v4  ;;  %v7062_v34 = vmul.f32 -1.442695, %v219_v21  ;;  %v8576_v42 = vld [vmem:[%s12631_s2 + $0x110] ss:$60 sps:$4 sm:$0xff]   ;;  %v10734_v43 = vld [vmem:[%s12630_s1 + $0x98] sm:$0xff]  }
 0x123   :  { %v9532_v57 = vpop.eup %9531  ;;  %v2245_v58 = vpop.permute.xlu1 %2244  ;;  %6116 = vmatprep.mubr.bf16.mxu0 %v8568_v36  ;;  %5523 = vmatprep.subr.bf16.mxu1 %v9889_v0  ;;  %9551 = vpow2.f32 %v6931_v40  ;;  %v7721_v41 = vunpack.c.h.bf16 %v7927_v29  ;;  %v7720_v49 = vunpack.c.l.bf16 %v7927_v29  ;;  %v7468_v4 = vunpack.c.l.bf16 %v10734_v43 }
 0x124   :  { %v9534_v2 = vpop.eup %9533  ;;  %v3515_v3 = vpack.c.bf16 %v3368_v45, %v3367_v53  ;;  %v3242_v62 = vmul.f32 %v7461_v37, %v2245_v58  ;;  %2404 = vperm.xlu1 %8558, %v9528_v44   ;;  %9553 = vpow2.f32 %v6930_v47  ;;  %v7469_v53 = vunpack.c.h.bf16 %v10734_v43 }
 0x125   :  { %v9536_v7 = vpop.eup %9535  ;;  %5377 = vmatmul.mubr.bf16.gmra.mrb[4].mxu1 %v8567_v38  ;;  %v2240_v8 = vpop.permute.xlu0 %2239  ;;  %9555 = vpow2.f32 %v7059_v50  ;;  %v8577_v38 = vld [vmem:[%s12631_s2 + $0x16c] ss:$60 sps:$4 sm:$0xff]  }
 0x126   :  { %v9538_v11 = vpop.eup %9537  ;;  %v3241_v12 = vmul.f32 %v7460_v54, %v2240_v8  ;;  %2399 = vperm.xlu0 %8557, %v9530_v52   ;;  %6262 = vmatpush1.bf16.msra.mxu0 %v3515_v3  ;;  %9557 = vpow2.f32 %v7058_v55  ;;  %v8580_v54 = vld [vmem:[%s12631_s2 + $0x18c] ss:$60 sps:$4 sm:$0xff]  }
 0x127   :  { %v10699_v16 = vpop.eup %9539  ;;  %v2885_v17 = vpop.permute.xlu1 %2884  ;;  %5384 = vmatprep.mubr.bf16.mxu1 %v8571_v61  ;;  %6263 = vmatprep.subr.bf16.mxu0 %v9889_v0  ;;  %9559 = vpow2.f32 %v6933_v63 }
 0x128   :  { %v10709_v22 = vpop.eup %9541  ;;  %v3452_v23 = vpack.c.bf16 %v3242_v62, %v3241_v12  ;;  %v3370_v24 = vmul.f32 %v7717_v59, %v2885_v17  ;;  %3044 = vperm.xlu1 %8558, %v9532_v57   ;;  %9561 = vpow2.f32 %v6932_v5  ;;  %v8579_v59 = vld [vmem:[%s12631_s2 + $0x168] ss:$60 sps:$4 sm:$0xff]  }
 0x129   :  { %v10714_v27 = vpop.eup %9543  ;;  %6117 = vmatmul.mubr.bf16.gmra.mrb[4].mxu0 %v8570_v60  ;;  %v2880_v28 = vpop.permute.xlu0 %2879  ;;  %9563 = vpow2.f32 %v7061_v9  ;;  %v10748_v60 = vld [vmem:[%s12630_s1 + $0x298] sm:$0xff]   ;;  %v10766_v12 = vld [vmem:[%s12630_s1 + $0xa0] sm:$0xff]  }
 0x12a   :  { %v10719_v31 = vpop.eup %9545  ;;  %v3369_v32 = vmul.f32 %v7716_v13, %v2880_v28  ;;  %3039 = vperm.xlu0 %8557, %v9534_v2   ;;  %5524 = vmatpush1.bf16.msra.mxu1 %v3452_v23  ;;  %9565 = vpow2.f32 %v7060_v14  ;;  %v7725_v9 = vunpack.c.h.bf16 %v10748_v60  ;;  %v93_v14 = vld [vmem:[%s12629_s0 + $0x270] sm:$0xff]  ;;  %v7724_v23 = vunpack.c.l.bf16 %v10748_v60 }
 0x12b   :  { %v10722_v35 = vpop.eup %9547  ;;  %v2255_v37 = vpop.permute.xlu1 %2254  ;;  %6124 = vmatprep.mubr.bf16.mxu0 %v8574_v19  ;;  %5525 = vmatprep.subr.bf16.mxu1 %v9889_v0  ;;  %9567 = vpow2.f32 %v6935_v20  ;;  %v222_v19 = vld [vmem:[%s12629_s0 + $0x678] sm:$0xff]  ;;  %v221_v20 = vld [vmem:[%s12629_s0 + $0x670] sm:$0xff] }
 0x12c   :  { %v9550_v36 = vpop.eup %9549  ;;  %v3516_v39 = vpack.c.bf16 %v3370_v24, %v3369_v32  ;;  %v3244_v40 = vmul.f32 %v7465_v18, %v2255_v37  ;;  %2414 = vperm.xlu1 %8558, %v9536_v7   ;;  %9569 = vpow2.f32 %v6934_v26  ;;  %v8586_v24 = vld [vmem:[%s12631_s2 + $0x204] ss:$60 sps:$4 sm:$0xff]   ;;  %v6937_v26 = vmul.f32 -1.442695, %v94_v6 }
 0x12d   :  { %v9552_v45 = vpop.eup %9551  ;;  %5385 = vmatmul.mubr.bf16.gmra.mrb[8].mxu1 %v8573_v25  ;;  %v2250_v46 = vpop.permute.xlu0 %2249  ;;  %v1125_v47 = vadd.f32 1.0, %v9550_v36  ;;  %9571 = vpow2.f32 %v7063_v30  ;;  %v6936_v30 = vmul.f32 -1.442695, %v93_v14  ;;  %v96_v36 = vld [vmem:[%s12629_s0 + $0x288] sm:$0xff] }
 0x12e   :  { %v9554_v48 = vpop.eup %9553  ;;  %v3243_v44 = vmul.f32 %v7464_v33, %v2250_v46  ;;  %2409 = vperm.xlu0 %8557, %v9538_v11   ;;  %6264 = vmatpush1.bf16.msra.mxu0 %v3516_v39  ;;  %v1000_v50 = vadd.f32 1.0, %v9552_v45  ;;  %9573 = vpow2.f32 %v7062_v34  ;;  %v8583_v11 = vld [vmem:[%s12631_s2 + $0x1e4] ss:$60 sps:$4 sm:$0xff]   ;;  %v7473_v34 = vunpack.c.h.bf16 %v10766_v12 }
 0x12f   :  { %v9556_v51 = vpop.eup %9555  ;;  %v2895_v52 = vpop.permute.xlu1 %2894  ;;  %5392 = vmatprep.mubr.bf16.mxu1 %v8577_v38  ;;  %6265 = vmatprep.subr.bf16.mxu0 %v9889_v0  ;;  %9575 = vrcp.f32 %v1125_v47  ;;  %v999_v55 = vadd.f32 1.0, %v9554_v48  ;;  %v7065_v38 = vmul.f32 -1.442695, %v222_v19  ;;  %v95_v45 = vld [vmem:[%s12629_s0 + $0x280] sm:$0xff] }
 0x130   :  { %v9558_v56 = vpop.eup %9557  ;;  %v3453_v57 = vpack.c.bf16 %v3244_v40, %v3243_v44  ;;  %v3372_v58 = vmul.f32 %v7721_v41, %v2895_v52  ;;  %3054 = vperm.xlu1 %8558, %v10699_v16   ;;  %9577 = vrcp.f32 %v1000_v50  ;;  %v1128_v61 = vadd.f32 1.0, %v9556_v51  ;;  %v8585_v41 = vld [vmem:[%s12631_s2 + $0x1e0] ss:$60 sps:$4 sm:$0xff]  }
 0x131   :  { %v9560_v63 = vpop.eup %9559  ;;  %6125 = vmatmul.mubr.bf16.gmra.mrb[8].mxu0 %v8576_v42  ;;  %v2890_v1 = vpop.permute.xlu0 %2889  ;;  %9579 = vrcp.f32 %v999_v55  ;;  %v1127_v2 = vadd.f32 1.0, %v9558_v56  ;;  %v10795_v42 = vld [vmem:[%s12630_s1 + $0x2a0] sm:$0xff]   ;;  %v7064_v44 = vmul.f32 -1.442695, %v221_v20  ;;  %v7472_v52 = vunpack.c.l.bf16 %v10766_v12  ;;  %v8591_v20 = vld [vmem:[%s12631_s2 + $0x258] ss:$60 sps:$4 sm:$0xff]  }
 0x132   :  { %v9562_v3 = vpop.eup %9561  ;;  %v3371_v62 = vmul.f32 %v7720_v49, %v2890_v1  ;;  %3049 = vperm.xlu0 %8557, %v10709_v22   ;;  %5526 = vmatpush1.bf16.msra.mxu1 %v3453_v57  ;;  %9581 = vrcp.f32 %v1128_v61  ;;  %v1002_v5 = vadd.f32 1.0, %v9560_v63  ;;  %v224_v49 = vld [vmem:[%s12629_s0 + $0x688] sm:$0xff]  ;;  %v7729_v57 = vunpack.c.h.bf16 %v10795_v42  ;;  %v8588_v63 = vld [vmem:[%s12631_s2 + $0x200] ss:$60 sps:$4 sm:$0xff]  }
 0x133   :  { %v9564_v7 = vpop.eup %9563  ;;  %v2265_v8 = vpop.permute.xlu1 %2264  ;;  %6132 = vmatprep.mubr.bf16.mxu0 %v8580_v54  ;;  %5527 = vmatprep.subr.bf16.mxu1 %v9889_v0  ;;  %9583 = vrcp.f32 %v1127_v2  ;;  %v1001_v13 = vadd.f32 1.0, %v9562_v3  ;;  %v223_v54 = vld [vmem:[%s12629_s0 + $0x680] sm:$0xff]  ;;  %v10818_v1 = vld [vmem:[%s12630_s1 + $0xa8] sm:$0xff]   ;;  %v7067_v2 = vmul.f32 -1.442695, %v224_v49  ;;  %v98_v3 = vld [vmem:[%s12629_s0 + $0x298] sm:$0xff] }
 0x134   :  { %v9566_v15 = vpop.eup %9565  ;;  %v3517_v16 = vpack.c.bf16 %v3372_v58, %v3371_v62  ;;  %v3246_v17 = vmul.f32 %v7469_v53, %v2265_v8  ;;  %2424 = vperm.xlu1 %8558, %v10714_v27   ;;  %9585 = vrcp.f32 %v1002_v5  ;;  %v1130_v18 = vadd.f32 1.0, %v9564_v7  ;;  %v8592_v5 = vld [vmem:[%s12631_s2 + $0x27c] ss:$60 sps:$4 sm:$0xff]   ;;  %v97_v7 = vld [vmem:[%s12629_s0 + $0x290] sm:$0xff] }
 0x135   :  { %v9568_v21 = vpop.eup %9567  ;;  %5393 = vmatmul.mubr.bf16.gmra.mrb[12].mxu1 %v8579_v59  ;;  %v2260_v22 = vpop.permute.xlu0 %2259  ;;  %9587 = vrcp.f32 %v1001_v13  ;;  %v1129_v25 = vadd.f32 1.0, %v9566_v15  ;;  %v6939_v53 = vmul.f32 -1.442695, %v96_v36  ;;  %v6938_v58 = vmul.f32 -1.442695, %v95_v45 }
 0x136   :  { %v9570_v27 = vpop.eup %9569  ;;  %v3245_v28 = vmul.f32 %v7468_v4, %v2260_v22  ;;  %2419 = vperm.xlu0 %8557, %v10719_v31   ;;  %6266 = vmatpush1.bf16.msra.mxu0 %v3517_v16  ;;  %9589 = vrcp.f32 %v1130_v18  ;;  %v1004_v29 = vadd.f32 1.0, %v9568_v21  ;;  %v7066_v6 = vmul.f32 -1.442695, %v223_v54  ;;  %v225_v16 = vld [vmem:[%s12629_s0 + $0x690] sm:$0xff]  ;;  %v10846_v21 = vld [vmem:[%s12630_s1 + $0x2a8] sm:$0xff]  }
 0x137   :  { %v9572_v32 = vpop.eup %9571  ;;  %v2905_v33 = vpop.permute.xlu1 %2904  ;;  %5400 = vmatprep.mubr.bf16.mxu1 %v8583_v11  ;;  %6267 = vmatprep.subr.bf16.mxu0 %v9889_v0  ;;  %9591 = vrcp.f32 %v1129_v25  ;;  %v1003_v37 = vadd.f32 1.0, %v9570_v27  ;;  %v226_v11 = vld [vmem:[%s12629_s0 + $0x698] sm:$0xff]  ;;  %v7477_v14 = vunpack.c.h.bf16 %v10818_v1  ;;  %v6941_v15 = vmul.f32 -1.442695, %v98_v3  ;;  %v8595_v25 = vld [vmem:[%s12631_s2 + $0x2d4] ss:$60 sps:$4 sm:$0xff]  }
 0x138   :  { %v9574_v39 = vpop.eup %9573  ;;  %v3454_v31 = vpack.c.bf16 %v3246_v17, %v3245_v28  ;;  %v3374_v40 = vmul.f32 %v7725_v9, %v2905_v33  ;;  %3064 = vperm.xlu1 %8558, %v10722_v35   ;;  %9593 = vrcp.f32 %v1004_v29  ;;  %v1132_v43 = vadd.f32 1.0, %v9572_v32  ;;  %v8589_v35 = vld [vmem:[%s12631_s2 + $0x25c] ss:$60 sps:$4 sm:$0xff]   ;;  %v100_v27 = vld [vmem:[%s12629_s0 + $0x2a8] sm:$0xff] }
 0x139   :  { %v9576_v46 = vpop.eup %9575  ;;  %6133 = vmatmul.mubr.bf16.gmra.mrb[12].mxu0 %v8582_v10  ;;  %v2900_v47 = vpop.permute.xlu0 %2899  ;;  %9595 = vrcp.f32 %v1003_v37  ;;  %v1131_v48 = vadd.f32 1.0, %v9574_v39  ;;  %v7728_v10 = vunpack.c.l.bf16 %v10795_v42  ;;  %v6940_v22 = vmul.f32 -1.442695, %v97_v7  ;;  %v10879_v42 = vld [vmem:[%s12630_s1 + $0x2b0] sm:$0xff]  }
 0x13a   :  { %v9578_v50 = vpop.eup %9577  ;;  %v3373_v51 = vmul.f32 %v7724_v23, %v2900_v47  ;;  %3059 = vperm.xlu0 %8557, %v9576_v46   ;;  %5528 = vmatpush1.bf16.msra.mxu1 %v3454_v31  ;;  %9597 = vrcp.f32 %v1132_v43  ;;  %v7068_v32 = vmul.f32 -1.442695, %v225_v16  ;;  %v7733_v37 = vunpack.c.h.bf16 %v10846_v21  ;;  %v8598_v47 = vld [vmem:[%s12631_s2 + $0x2f4] ss:$60 sps:$4 sm:$0xff]  }
 0x13b   :  { %v9580_v55 = vpop.eup %9579  ;;  %v2275_v56 = vpop.permute.xlu1 %2274  ;;  %6140 = vmatprep.mubr.bf16.mxu0 %v8586_v24  ;;  %5529 = vmatprep.subr.bf16.mxu1 %v9889_v0  ;;  %9599 = vrcp.f32 %v1131_v48  ;;  %v6943_v43 = vmul.f32 -1.442695, %v100_v27  ;;  %v7732_v49 = vunpack.c.l.bf16 %v10846_v21 }
 0x13c   :  { %v9582_v59 = vpop.eup %9581  ;;  %v3518_v60 = vpack.c.bf16 %v3374_v40, %v3373_v51  ;;  %v3248_v61 = vmul.f32 %v7473_v34, %v2275_v56  ;;  %2434 = vperm.xlu1 %8558, %v9578_v50   ;;  %9601 = vpow2.f32 %v6937_v26  ;;  %v7069_v26 = vmul.f32 -1.442695, %v226_v11  ;;  %v8594_v40 = vld [vmem:[%s12631_s2 + $0x278] ss:$60 sps:$4 sm:$0xff]   ;;  %v227_v56 = vld [vmem:[%s12629_s0 + $0x6a0] sm:$0xff] }
 0x13d   :  { %v9584_v62 = vpop.eup %9583  ;;  %5401 = vmatmul.mubr.bf16.gmra.mrb[16].mxu1 %v8585_v41  ;;  %v2270_v4 = vpop.permute.xlu0 %2269  ;;  %9603 = vpow2.f32 %v6936_v30  ;;  %v7476_v30 = vunpack.c.l.bf16 %v10818_v1  ;;  %v10874_v41 = vld [vmem:[%s12630_s1 + $0xb0] sm:$0xff]  }
 0x13e   :  { %v9586_v8 = vpop.eup %9585  ;;  %v3247_v9 = vmul.f32 %v7472_v52, %v2270_v4  ;;  %2429 = vperm.xlu0 %8557, %v9580_v55   ;;  %6268 = vmatpush1.bf16.msra.mxu0 %v3518_v60  ;;  %9605 = vpow2.f32 %v7065_v38  ;;  %v99_v38 = vld [vmem:[%s12629_s0 + $0x2a0] sm:$0xff]  ;;  %v7480_v54 = vunpack.c.l.bf16 %v10874_v41  ;;  %v8597_v60 = vld [vmem:[%s12631_s2 + $0x2d0] ss:$60 sps:$4 sm:$0xff]  }
 0x13f   :  { %v9588_v12 = vpop.eup %9587  ;;  %v2915_v13 = vpop.permute.xlu1 %2914  ;;  %5408 = vmatprep.mubr.bf16.mxu1 %v8589_v35  ;;  %6269 = vmatprep.subr.bf16.mxu0 %v9889_v0  ;;  %9607 = vpow2.f32 %v7064_v44  ;;  %v228_v35 = vld [vmem:[%s12629_s0 + $0x6a8] sm:$0xff]  ;;  %v10890_v50 = vmul.f32 -1.442695, %v99_v38  ;;  %v101_v1 = vld [vmem:[%s12629_s0 + $0x2b0] sm:$0xff] }
 0x140   :  { %v10838_v17 = vpop.eup %9589  ;;  %v3455_v18 = vpack.c.bf16 %v3248_v61, %v3247_v9  ;;  %v3376_v19 = vmul.f32 %v7729_v57, %v2915_v13  ;;  %3074 = vperm.xlu1 %8558, %v9582_v59   ;;  %9609 = vpow2.f32 %v6939_v53  ;;  %v7481_v53 = vunpack.c.h.bf16 %v10874_v41  ;;  %v8601_v4 = vld [vmem:[%s12631_s2 + $0x34c] ss:$60 sps:$4 sm:$0xff]  }
 0x141   :  { %v10848_v23 = vpop.eup %9591  ;;  %6141 = vmatmul.mubr.bf16.gmra.mrb[16].mxu0 %v8588_v63  ;;  %v2910_v24 = vpop.permute.xlu0 %2909  ;;  %9611 = vpow2.f32 %v6938_v58  ;;  %v102_v63 = vld [vmem:[%s12629_s0 + $0x2b8] sm:$0xff]  ;;  %v8600_v13 = vld [vmem:[%s12631_s2 + $0x2f0] ss:$60 sps:$4 sm:$0xff]   ;;  %v10923_v16 = vmul.f32 -1.442695, %v101_v1 }
 0x142   :  { %v10856_v28 = vpop.eup %9593  ;;  %v3375_v29 = vmul.f32 %v7728_v10, %v2910_v24  ;;  %3069 = vperm.xlu0 %8557, %v9584_v62   ;;  %5530 = vmatpush1.bf16.msra.mxu1 %v3455_v18  ;;  %9613 = vpow2.f32 %v7067_v2  ;;  %v7737_v62 = vunpack.c.h.bf16 %v10879_v42  ;;  %v10915_v10 = vmul.f32 -1.442695, %v227_v56  ;;  %v8603_v38 = vld [vmem:[%s12631_s2 + $0x348] ss:$60 sps:$4 sm:$0xff]  }
 0x143   :  { %v10859_v33 = vpop.eup %9595  ;;  %v2285_v34 = vpop.permute.xlu1 %2284  ;;  %6148 = vmatprep.mubr.bf16.mxu0 %v8592_v5  ;;  %5531 = vmatprep.subr.bf16.mxu1 %v9889_v0  ;;  %9615 = vpow2.f32 %v7066_v6  ;;  %v10912_v6 = vmul.f32 -1.442695, %v228_v35 }
 0x144   :  { %v10866_v36 = vpop.eup %9597  ;;  %v3519_v39 = vpack.c.bf16 %v3376_v19, %v3375_v29  ;;  %v3250_v31 = vmul.f32 %v7477_v14, %v2285_v34  ;;  %2444 = vperm.xlu1 %8558, %v9586_v8   ;;  %9617 = vpow2.f32 %v6941_v15  ;;  %v10921_v15 = vmul.f32 -1.442695, %v102_v63  ;;  %v10974_v63 = vld [vmem:[%s12630_s1 + $0xc0] sm:$0xff]  }
 0x145   :  { %v10881_v45 = vpop.eup %9599  ;;  %5409 = vmatmul.mubr.bf16.gmra.mrb[20].mxu1 %v8591_v20  ;;  %v2280_v46 = vpop.permute.xlu0 %2279  ;;  %9619 = vpow2.f32 %v6940_v22  ;;  %v10929_v20 = vld [vmem:[%s12630_s1 + $0xb8] sm:$0xff]   ;;  %v7736_v29 = vunpack.c.l.bf16 %v10879_v42 }
 0x146   :  { %v9602_v48 = vpop.eup %9601  ;;  %v3249_v44 = vmul.f32 %v7476_v30, %v2280_v46  ;;  %2439 = vperm.xlu0 %8557, %v9588_v12   ;;  %6270 = vmatpush1.bf16.msra.mxu0 %v3519_v39  ;;  %9621 = vpow2.f32 %v7069_v26  ;;  %v230_v22 = vld [vmem:[%s12629_s0 + $0x6b8] sm:$0xff]  ;;  %v229_v46 = vld [vmem:[%s12629_s0 + $0x6b0] sm:$0xff] }
 0x147   :  { %v9604_v51 = vpop.eup %9603  ;;  %v2925_v52 = vpop.permute.xlu1 %2924  ;;  %5416 = vmatprep.mubr.bf16.mxu1 %v8595_v25  ;;  %6271 = vmatprep.subr.bf16.mxu0 %v9889_v0  ;;  %v1006_v55 = vadd.f32 1.0, %v9602_v48  ;;  %9623 = vpow2.f32 %v7068_v32  ;;  %v8604_v25 = vld [vmem:[%s12631_s2 + $0x36c] ss:$60 sps:$4 sm:$0xff]   ;;  %v7072_v1 = vmul.f32 -1.442695, %v229_v46 }
 0x148   :  { %v9606_v57 = vpop.eup %9605  ;;  %v3456_v58 = vpack.c.bf16 %v3250_v31, %v3249_v44  ;;  %v3378_v59 = vmul.f32 %v7733_v37, %v2925_v52  ;;  %3084 = vperm.xlu1 %8558, %v10838_v17   ;;  %v1005_v61 = vadd.f32 1.0, %v9604_v51  ;;  %9625 = vpow2.f32 %v6943_v43  ;;  %v8607_v44 = vld [vmem:[%s12631_s2 + $0x3c4] ss:$60 sps:$4 sm:$0xff]  }
 0x149   :  { %v9608_v2 = vpop.eup %9607  ;;  %6149 = vmatmul.mubr.bf16.gmra.mrb[20].mxu0 %v8594_v40  ;;  %v2920_v3 = vpop.permute.xlu0 %2919  ;;  %9627 = vrcp.f32 %v1006_v55  ;;  %v1134_v5 = vadd.f32 1.0, %v9606_v57  ;;  %v7485_v37 = vunpack.c.h.bf16 %v10929_v20  ;;  %v10949_v31 = vmul.f32 -1.442695, %v230_v22  ;;  %v8606_v57 = vld [vmem:[%s12631_s2 + $0x368] ss:$60 sps:$4 sm:$0xff]  }
 0x14a   :  { %v9610_v7 = vpop.eup %9609  ;;  %v3377_v8 = vmul.f32 %v7732_v49, %v2920_v3  ;;  %3079 = vperm.xlu0 %8557, %v10848_v23   ;;  %5532 = vmatpush1.bf16.msra.mxu1 %v3456_v58  ;;  %9629 = vrcp.f32 %v1005_v61  ;;  %v1133_v9 = vadd.f32 1.0, %v9608_v2  ;;  %v7484_v52 = vunpack.c.l.bf16 %v10929_v20  ;;  %v232_v2 = vld [vmem:[%s12629_s0 + $0x6c8] sm:$0xff] }
 0x14b   :  { %v9612_v11 = vpop.eup %9611  ;;  %v2295_v12 = vpop.permute.xlu1 %2294  ;;  %6156 = vmatprep.mubr.bf16.mxu0 %v8598_v47  ;;  %5533 = vmatprep.subr.bf16.mxu1 %v9889_v0  ;;  %9631 = vrcp.f32 %v1134_v5  ;;  %v1008_v14 = vadd.f32 1.0, %v9610_v7  ;;  %v104_v47 = vld [vmem:[%s12629_s0 + $0x2c8] sm:$0xff]  ;;  %v7075_v22 = vmul.f32 -1.442695, %v232_v2 }
 0x14c   :  { %v9614_v17 = vpop.eup %9613  ;;  %v3520_v18 = vpack.c.bf16 %v3378_v59, %v3377_v8  ;;  %v3252_v19 = vmul.f32 %v7481_v53, %v2295_v12  ;;  %2454 = vperm.xlu1 %8558, %v10856_v28   ;;  %9633 = vrcp.f32 %v1133_v9  ;;  %v1007_v21 = vadd.f32 1.0, %v9612_v11  ;;  %v10986_v11 = vld [vmem:[%s12630_s1 + $0x2c0] sm:$0xff]  }
 0x14d   :  { %v9616_v23 = vpop.eup %9615  ;;  %5417 = vmatmul.mubr.bf16.gmra.mrb[24].mxu1 %v8597_v60  ;;  %v2290_v24 = vpop.permute.xlu0 %2289  ;;  %9635 = vrcp.f32 %v1008_v14  ;;  %v1136_v26 = vadd.f32 1.0, %v9614_v17  ;;  %v6947_v5 = vmul.f32 -1.442695, %v104_v47  ;;  %v7489_v17 = vunpack.c.h.bf16 %v10974_v63 }
 0x14e   :  { %v9618_v27 = vpop.eup %9617  ;;  %v3251_v28 = vmul.f32 %v7480_v54, %v2290_v24  ;;  %2449 = vperm.xlu0 %8557, %v10859_v33   ;;  %6272 = vmatpush1.bf16.msra.mxu0 %v3520_v18  ;;  %9637 = vrcp.f32 %v1007_v21  ;;  %v1135_v30 = vadd.f32 1.0, %v9616_v23  ;;  %v10947_v33 = vld [vmem:[%s12630_s1 + $0x2b8] sm:$0xff]   ;;  %v105_v24 = vld [vmem:[%s12629_s0 + $0x2d0] sm:$0xff]  ;;  %v7744_v46 = vunpack.c.l.bf16 %v10986_v11 }
 0x14f   :  { %v9620_v32 = vpop.eup %9619  ;;  %v2935_v34 = vpop.permute.xlu1 %2934  ;;  %5424 = vmatprep.mubr.bf16.mxu1 %v8601_v4  ;;  %6273 = vmatprep.subr.bf16.mxu0 %v9889_v0  ;;  %9639 = vrcp.f32 %v1136_v26  ;;  %v1010_v39 = vadd.f32 1.0, %v9618_v27  ;;  %v7741_v56 = vunpack.c.h.bf16 %v10947_v33  ;;  %v8610_v4 = vld [vmem:[%s12631_s2 + $0x3e4] ss:$60 sps:$4 sm:$0xff]   ;;  %v7740_v9 = vunpack.c.l.bf16 %v10947_v33  ;;  %v106_v23 = vld [vmem:[%s12629_s0 + $0x2d8] sm:$0xff] }
 0x150   :  { %v9622_v40 = vpop.eup %9621  ;;  %v3457_v41 = vpack.c.bf16 %v3252_v19, %v3251_v28  ;;  %v3380_v42 = vmul.f32 %v7737_v62, %v2935_v34  ;;  %3094 = vperm.xlu1 %8558, %v10866_v36   ;;  %9641 = vrcp.f32 %v1135_v30  ;;  %v1009_v43 = vadd.f32 1.0, %v9620_v32  ;;  %v8609_v18 = vld [vmem:[%s12631_s2 + $0x3c0] ss:$60 sps:$4 sm:$0xff]  }
 0x151   :  { %v9624_v35 = vpop.eup %9623  ;;  %6157 = vmatmul.mubr.bf16.gmra.mrb[24].mxu0 %v8600_v13  ;;  %v2930_v48 = vpop.permute.xlu0 %2929  ;;  %9643 = vrcp.f32 %v1010_v39  ;;  %v1138_v49 = vadd.f32 1.0, %v9622_v40  ;;  %v231_v19 = vld [vmem:[%s12629_s0 + $0x6c0] sm:$0xff]  ;;  %v8613_v26 = vld [vmem:[%s12631_s2 + $0x43c] ss:$60 sps:$4 sm:$0xff]   ;;  %v7488_v28 = vunpack.c.l.bf16 %v10974_v63  ;;  %v7745_v34 = vunpack.c.h.bf16 %v10986_v11  ;;  %v7870_v39 = vld [vmem:[%s12630_s1 + $0xc8] sm:$0xff]  }
 0x152   :  { %v9626_v36 = vpop.eup %9625  ;;  %v3379_v51 = vmul.f32 %v7736_v29, %v2930_v48  ;;  %3089 = vperm.xlu0 %8557, %v10881_v45   ;;  %5534 = vmatpush1.bf16.msra.mxu1 %v3457_v41  ;;  %9645 = vrcp.f32 %v1009_v43  ;;  %v1137_v53 = vadd.f32 1.0, %v9624_v35  ;;  %v103_v45 = vld [vmem:[%s12629_s0 + $0x2c0] sm:$0xff]  ;;  %v7074_v29 = vmul.f32 -1.442695, %v231_v19  ;;  %v8616_v48 = vld [vmem:[%s12631_s2 + $0x45c] ss:$60 sps:$4 sm:$0xff]  }
 0x153   :  { %v9628_v54 = vpop.eup %9627  ;;  %v2305_v55 = vpop.permute.xlu1 %2304  ;;  %6164 = vmatprep.mubr.bf16.mxu0 %v8604_v25  ;;  %5535 = vmatprep.subr.bf16.mxu1 %v9889_v0  ;;  %9647 = vrcp.f32 %v1138_v49  ;;  %v1012_v58 = vadd.f32 1.0, %v9626_v36  ;;  %v6946_v12 = vmul.f32 -1.442695, %v103_v45  ;;  %v6948_v40 = vmul.f32 -1.442695, %v105_v24 }
 0x154   :  { %v9630_v59 = vpop.eup %9629  ;;  %v3521_v60 = vpack.c.bf16 %v3380_v42, %v3379_v51  ;;  %v3254_v61 = vmul.f32 %v7485_v37, %v2305_v55  ;;  %2464 = vperm.xlu1 %8558, %v9628_v54   ;;  %9649 = vrcp.f32 %v1137_v53  ;;  %v6949_v37 = vmul.f32 -1.442695, %v106_v23  ;;  %v8615_v55 = vld [vmem:[%s12631_s2 + $0x438] ss:$60 sps:$4 sm:$0xff]  }
 0x155   :  { %v9632_v3 = vpop.eup %9631  ;;  %5425 = vmatmul.mubr.bf16.gmra.mrb[28].mxu1 %v8603_v38  ;;  %v2300_v62 = vpop.permute.xlu0 %2299  ;;  %9651 = vrcp.f32 %v1012_v58  ;;  %v7493_v51 = vunpack.c.h.bf16 %v7870_v39  ;;  %v7492_v45 = vunpack.c.l.bf16 %v7870_v39  ;;  %v8618_v11 = vld [vmem:[%s12631_s2 + $0x458] ss:$60 sps:$4 sm:$0xff]  }
 0x156   :  { %v9634_v7 = vpop.eup %9633  ;;  %v3253_v8 = vmul.f32 %v7484_v52, %v2300_v62  ;;  %2459 = vperm.xlu0 %8557, %v9630_v59   ;;  %6274 = vmatpush1.bf16.msra.mxu0 %v3521_v60  ;;  %9653 = vpow2.f32 %v10890_v50  ;;  %v11036_v52 = vld [vmem:[%s12630_s1 + $0x2c8] sm:$0xff]  }
 0x157   :  { %v9636_v13 = vpop.eup %9635  ;;  %v2945_v14 = vpop.permute.xlu1 %2944  ;;  %5432 = vmatprep.mubr.bf16.mxu1 %v8607_v44  ;;  %6275 = vmatprep.subr.bf16.mxu0 %v9889_v0  ;;  %9655 = vpow2.f32 %v10912_v6  ;;  %v7749_v63 = vunpack.c.h.bf16 %v11036_v52 }
 0x158   :  { %v9638_v20 = vpop.eup %9637  ;;  %v3458_v50 = vpack.c.bf16 %v3254_v61, %v3253_v8  ;;  %v3382_v21 = vmul.f32 %v7741_v56, %v2945_v14  ;;  %3104 = vperm.xlu1 %8558, %v9632_v3   ;;  %9657 = vpow2.f32 %v10915_v10 }
 0x159   :  { %v9640_v6 = vpop.eup %9639  ;;  %6165 = vmatmul.mubr.bf16.gmra.mrb[28].mxu0 %v8606_v57  ;;  %v2940_v25 = vpop.permute.xlu0 %2939  ;;  %9659 = vpow2.f32 %v10921_v15 }
 0x15a   :  { %v9642_v27 = vpop.eup %9641  ;;  %v3381_v10 = vmul.f32 %v7740_v9, %v2940_v25  ;;  %3099 = vperm.xlu0 %8557, %v9634_v7   ;;  %5536 = vmatpush1.bf16.msra.mxu1 %v3458_v50  ;;  %9661 = vpow2.f32 %v10923_v16  ;;  %v8612_v16 = vld [vmem:[%s12631_s2 + $0x3e0] ss:$60 sps:$4 sm:$0xff]   ;;  %v11065_v25 = vld [vmem:[%s12630_s1 + $0x2d0] sm:$0xff]  }
 0x15b   :  { %v9644_v30 = vpop.eup %9643  ;;  %v2315_v32 = vpop.permute.xlu1 %2314  ;;  %6172 = vmatprep.mubr.bf16.mxu0 %v8610_v4  ;;  %5537 = vmatprep.subr.bf16.mxu1 %v9889_v0  ;;  %9663 = vpow2.f32 %v10949_v31  ;;  %v7753_v39 = vunpack.c.h.bf16 %v11065_v25 }
 0x15c   :  { %v11014_v15 = vpop.eup %9645  ;;  %v3522_v38 = vpack.c.bf16 %v3382_v21, %v3381_v10  ;;  %v3256_v33 = vmul.f32 %v7489_v17, %v2315_v32  ;;  %2474 = vperm.xlu1 %8558, %v9636_v13   ;;  %9665 = vpow2.f32 %v7072_v1  ;;  %v8619_v1 = vld [vmem:[%s12631_s2 + $0x4b4] ss:$60 sps:$4 sm:$0xff]   ;;  %v7748_v17 = vunpack.c.l.bf16 %v11036_v52 }
 0x15d   :  { %v11022_v41 = vpop.eup %9647  ;;  %5433 = vmatmul.mubr.bf16.gmra.mrb[32].mxu1 %v8609_v18  ;;  %v2310_v31 = vpop.permute.xlu0 %2309  ;;  %9667 = vpow2.f32 %v6947_v5  ;;  %v11049_v5 = vld [vmem:[%s12630_s1 + $0xd0] sm:$0xff]  }
 0x15e   :  { %v11024_v42 = vpop.eup %9649  ;;  %v3255_v43 = vmul.f32 %v7488_v28, %v2310_v31  ;;  %2469 = vperm.xlu0 %8557, %v9638_v20   ;;  %6276 = vmatpush1.bf16.msra.mxu0 %v3522_v38  ;;  %9669 = vpow2.f32 %v6946_v12  ;;  %v7497_v50 = vunpack.c.h.bf16 %v11049_v5  ;;  %v8622_v21 = vld [vmem:[%s12631_s2 + $0x4d4] ss:$60 sps:$4 sm:$0xff]  }
 0x15f   :  { %v11027_v47 = vpop.eup %9651  ;;  %v2955_v35 = vpop.permute.xlu1 %2954  ;;  %5440 = vmatprep.mubr.bf16.mxu1 %v8613_v26  ;;  %6277 = vmatprep.subr.bf16.mxu0 %v9889_v0  ;;  %9671 = vpow2.f32 %v7075_v22  ;;  %v233_v38 = vld [vmem:[%s12629_s0 + $0x6d0] sm:$0xff] }
 0x160   :  { %v9654_v44 = vpop.eup %9653  ;;  %v3459_v49 = vpack.c.bf16 %v3256_v33, %v3255_v43  ;;  %v3384_v36 = vmul.f32 %v7745_v34, %v2955_v35  ;;  %3114 = vperm.xlu1 %8558, %v9640_v6   ;;  %9673 = vpow2.f32 %v7074_v29  ;;  %v8621_v29 = vld [vmem:[%s12631_s2 + $0x4b0] ss:$60 sps:$4 sm:$0xff]  }
 0x161   :  { %v9656_v53 = vpop.eup %9655  ;;  %6173 = vmatmul.mubr.bf16.gmra.mrb[32].mxu0 %v8612_v16  ;;  %v2950_v54 = vpop.permute.xlu0 %2949  ;;  %v1011_v56 = vadd.f32 1.0, %v9654_v44  ;;  %9675 = vpow2.f32 %v6949_v37  ;;  %v7496_v37 = vunpack.c.l.bf16 %v11049_v5  ;;  %v8624_v52 = vld [vmem:[%s12631_s2 + $0x4d0] ss:$60 sps:$4 sm:$0xff]   ;;  %v11116_v5 = vld [vmem:[%s12630_s1 + $0x2d8] sm:$0xff]  }
 0x162   :  { %v9658_v57 = vpop.eup %9657  ;;  %v3383_v58 = vmul.f32 %v7744_v46, %v2950_v54  ;;  %3109 = vperm.xlu0 %8557, %v9642_v27   ;;  %5538 = vmatpush1.bf16.msra.mxu1 %v3459_v49  ;;  %v1140_v59 = vadd.f32 1.0, %v9656_v53  ;;  %9677 = vpow2.f32 %v6948_v40  ;;  %v234_v27 = vld [vmem:[%s12629_s0 + $0x6d8] sm:$0xff]  ;;  %v8625_v40 = vld [vmem:[%s12631_s2 + $0x52c] ss:$60 sps:$4 sm:$0xff]   ;;  %v107_v49 = vld [vmem:[%s12629_s0 + $0x2e0] sm:$0xff] }
 0x163   :  { %v9660_v60 = vpop.eup %9659  ;;  %v2325_v61 = vpop.permute.xlu1 %2324  ;;  %6180 = vmatprep.mubr.bf16.mxu0 %v8616_v48  ;;  %5539 = vmatprep.subr.bf16.mxu1 %v9889_v0  ;;  %9679 = vrcp.f32 %v1011_v56  ;;  %v1139_v2 = vadd.f32 1.0, %v9658_v57  ;;  %v7077_v31 = vmul.f32 -1.442695, %v234_v27  ;;  %v11090_v48 = vld [vmem:[%s12630_s1 + $0xd8] sm:$0xff]   ;;  %v7076_v53 = vmul.f32 -1.442695, %v233_v38 }
 0x164   :  { %v9662_v3 = vpop.eup %9661  ;;  %v3523_v62 = vpack.c.bf16 %v3384_v36, %v3383_v58  ;;  %v3258_v4 = vmul.f32 %v7493_v51, %v2325_v61  ;;  %2484 = vperm.xlu1 %8558, %v9644_v30   ;;  %9681 = vrcp.f32 %v1140_v59  ;;  %v1014_v7 = vadd.f32 1.0, %v9660_v60  ;;  %v236_v54 = vld [vmem:[%s12629_s0 + $0x6e8] sm:$0xff]  ;;  %v114_v38 = vld [vmem:[%s12629_s0 + $0x318] sm:$0xff] }
 0x165   :  { %v9664_v8 = vpop.eup %9663  ;;  %5441 = vmatmul.mubr.bf16.gmra.mrb[36].mxu1 %v8615_v55  ;;  %v2320_v9 = vpop.permute.xlu0 %2319  ;;  %9683 = vrcp.f32 %v1139_v2  ;;  %v1013_v12 = vadd.f32 1.0, %v9662_v3  ;;  %v7752_v57 = vunpack.c.l.bf16 %v11065_v25  ;;  %v7501_v61 = vunpack.c.h.bf16 %v11090_v48  ;;  %v110_v2 = vld [vmem:[%s12629_s0 + $0x2f8] sm:$0xff]  ;;  %v112_v25 = vld [vmem:[%s12629_s0 + $0x308] sm:$0xff] }
 0x166   :  { %v9666_v13 = vpop.eup %9665  ;;  %v3257_v14 = vmul.f32 %v7492_v45, %v2320_v9  ;;  %2479 = vperm.xlu0 %8557, %v11014_v15   ;;  %6278 = vmatpush1.bf16.msra.mxu0 %v3523_v62  ;;  %9685 = vrcp.f32 %v1014_v7  ;;  %v1142_v18 = vadd.f32 1.0, %v9664_v8  ;;  %v235_v45 = vld [vmem:[%s12629_s0 + $0x6e0] sm:$0xff]  ;;  %v7079_v7 = vmul.f32 -1.442695, %v236_v54  ;;  %v109_v8 = vld [vmem:[%s12629_s0 + $0x2f0] sm:$0xff] }
 0x167   :  { %v9668_v19 = vpop.eup %9667  ;;  %v2965_v20 = vpop.permute.xlu1 %2964  ;;  %5448 = vmatprep.mubr.bf16.mxu1 %v8619_v1  ;;  %6279 = vmatprep.subr.bf16.mxu0 %v9889_v0  ;;  %9687 = vrcp.f32 %v1013_v12  ;;  %v1141_v22 = vadd.f32 1.0, %v9666_v13  ;;  %v6950_v1 = vmul.f32 -1.442695, %v107_v49  ;;  %v8627_v12 = vld [vmem:[%s12631_s2 + $0x528] ss:$60 sps:$4 sm:$0xff]  }
 0x168   :  { %v9670_v23 = vpop.eup %9669  ;;  %v3460_v24 = vpack.c.bf16 %v3258_v4, %v3257_v14  ;;  %v3386_v6 = vmul.f32 %v7749_v63, %v2965_v20  ;;  %3124 = vperm.xlu1 %8558, %v11022_v41   ;;  %9689 = vrcp.f32 %v1142_v18  ;;  %v1016_v26 = vadd.f32 1.0, %v9668_v19  ;;  %v8628_v63 = vld [vmem:[%s12631_s2 + $0x54c] ss:$60 sps:$4 sm:$0xff]   ;;  %v238_v14 = vld [vmem:[%s12629_s0 + $0x6f8] sm:$0xff]  ;;  %v11170_v49 = vld [vmem:[%s12630_s1 + $0x2e0] sm:$0xff]  }
 0x169   :  { %v9672_v10 = vpop.eup %9671  ;;  %6181 = vmatmul.mubr.bf16.gmra.mrb[36].mxu0 %v8618_v11  ;;  %v2960_v28 = vpop.permute.xlu0 %2959  ;;  %9691 = vrcp.f32 %v1141_v22  ;;  %v1015_v30 = vadd.f32 1.0, %v9670_v23  ;;  %v7078_v13 = vmul.f32 -1.442695, %v235_v45  ;;  %v7500_v19 = vunpack.c.l.bf16 %v11090_v48  ;;  %v8637_v45 = vld [vmem:[%s12631_s2 + $0x61c] ss:$60 sps:$4 sm:$0xff]  }
 0x16a   :  { %v9674_v32 = vpop.eup %9673  ;;  %v3385_v34 = vmul.f32 %v7748_v17, %v2960_v28  ;;  %3119 = vperm.xlu0 %8557, %v11024_v42   ;;  %5540 = vmatpush1.bf16.msra.mxu1 %v3460_v24  ;;  %9693 = vrcp.f32 %v1016_v26  ;;  %v1144_v15 = vadd.f32 1.0, %v9672_v10  ;;  %v108_v42 = vld [vmem:[%s12629_s0 + $0x2e8] sm:$0xff]  ;;  %v6953_v20 = vmul.f32 -1.442695, %v110_v2  ;;  %v8631_v24 = vld [vmem:[%s12631_s2 + $0x5a4] ss:$60 sps:$4 sm:$0xff]  }
 0x16b   :  { %v9676_v33 = vpop.eup %9675  ;;  %v2335_v16 = vpop.permute.xlu1 %2334  ;;  %6188 = vmatprep.mubr.bf16.mxu0 %v8622_v21  ;;  %5541 = vmatprep.subr.bf16.mxu1 %v9889_v0  ;;  %9695 = vrcp.f32 %v1015_v30  ;;  %v1143_v41 = vadd.f32 1.0, %v9674_v32  ;;  %v6951_v58 = vmul.f32 -1.442695, %v108_v42  ;;  %v7757_v23 = vunpack.c.h.bf16 %v11116_v5  ;;  %v11142_v28 = vld [vmem:[%s12630_s1 + $0xe0] sm:$0xff]  }
 0x16c   :  { %v9678_v43 = vpop.eup %9677  ;;  %v3524_v46 = vpack.c.bf16 %v3386_v6, %v3385_v34  ;;  %v3260_v35 = vmul.f32 %v7497_v50, %v2335_v16  ;;  %2494 = vperm.xlu1 %8558, %v11027_v47   ;;  %9697 = vrcp.f32 %v1144_v15  ;;  %v1018_v44 = vadd.f32 1.0, %v9676_v33  ;;  %v237_v50 = vld [vmem:[%s12629_s0 + $0x6f0] sm:$0xff]  ;;  %v111_v30 = vld [vmem:[%s12629_s0 + $0x300] sm:$0xff] }
 0x16d   :  { %v9680_v36 = vpop.eup %9679  ;;  %5449 = vmatmul.mubr.bf16.gmra.mrb[40].mxu1 %v8621_v29  ;;  %v2330_v51 = vpop.permute.xlu0 %2329  ;;  %9699 = vrcp.f32 %v1143_v41  ;;  %v1017_v47 = vadd.f32 1.0, %v9678_v43  ;;  %v6952_v6 = vmul.f32 -1.442695, %v109_v8  ;;  %v7081_v29 = vmul.f32 -1.442695, %v238_v14 }
 0x16e   :  { %v9682_v55 = vpop.eup %9681  ;;  %v3259_v56 = vmul.f32 %v7496_v37, %v2330_v51  ;;  %2489 = vperm.xlu0 %8557, %v9680_v36   ;;  %6280 = vmatpush1.bf16.msra.mxu0 %v3524_v46  ;;  %9701 = vrcp.f32 %v1018_v44  ;;  %v8630_v37 = vld [vmem:[%s12631_s2 + $0x548] ss:$60 sps:$4 sm:$0xff]   ;;  %v7080_v15 = vmul.f32 -1.442695, %v237_v50  ;;  %v7505_v42 = vunpack.c.h.bf16 %v11142_v28 }
 0x16f   :  { %v9684_v59 = vpop.eup %9683  ;;  %v2975_v60 = vpop.permute.xlu1 %2974  ;;  %5456 = vmatprep.mubr.bf16.mxu1 %v8625_v40  ;;  %6281 = vmatprep.subr.bf16.mxu0 %v9889_v0  ;;  %9703 = vrcp.f32 %v1017_v47  ;;  %v6955_v40 = vmul.f32 -1.442695, %v112_v25  ;;  %v8634_v43 = vld [vmem:[%s12631_s2 + $0x5c4] ss:$60 sps:$4 sm:$0xff]   ;;  %v6954_v46 = vmul.f32 -1.442695, %v111_v30 }
 0x170   :  { %v9686_v3 = vpop.eup %9685  ;;  %v3461_v62 = vpack.c.bf16 %v3260_v35, %v3259_v56  ;;  %v3388_v4 = vmul.f32 %v7753_v39, %v2975_v60  ;;  %3134 = vperm.xlu1 %8558, %v9682_v55   ;;  %9705 = vpow2.f32 %v7077_v31  ;;  %v7756_v39 = vunpack.c.l.bf16 %v11116_v5  ;;  %v8633_v47 = vld [vmem:[%s12631_s2 + $0x5a0] ss:$60 sps:$4 sm:$0xff]  }
 0x171   :  { %v9688_v9 = vpop.eup %9687  ;;  %6189 = vmatmul.mubr.bf16.gmra.mrb[40].mxu0 %v8624_v52  ;;  %v2970_v11 = vpop.permute.xlu0 %2969  ;;  %9707 = vpow2.f32 %v7076_v53  ;;  %v6957_v36 = vmul.f32 -1.442695, %v114_v38  ;;  %v7504_v55 = vunpack.c.l.bf16 %v11142_v28 }
 0x172   :  { %v9690_v17 = vpop.eup %9689  ;;  %v3387_v18 = vmul.f32 %v7752_v57, %v2970_v11  ;;  %3129 = vperm.xlu0 %8557, %v9684_v59   ;;  %5542 = vmatpush1.bf16.msra.mxu1 %v3461_v62  ;;  %9709 = vpow2.f32 %v6951_v58  ;;  %v7761_v58 = vunpack.c.h.bf16 %v11170_v49 }
 0x173   :  { %v9692_v21 = vpop.eup %9691  ;;  %v2345_v22 = vpop.permute.xlu1 %2344  ;;  %6196 = vmatprep.mubr.bf16.mxu0 %v8628_v63  ;;  %5543 = vmatprep.subr.bf16.mxu1 %v9889_v0  ;;  %9711 = vpow2.f32 %v6950_v1  ;;  %v11186_v1 = vld [vmem:[%s12630_s1 + $0xe8] sm:$0xff]  }
 0x174   :  { %v9694_v26 = vpop.eup %9693  ;;  %v3525_v27 = vpack.c.bf16 %v3388_v4, %v3387_v18  ;;  %v3262_v10 = vmul.f32 %v7501_v61, %v2345_v22  ;;  %2504 = vperm.xlu1 %8558, %v9686_v3   ;;  %9713 = vpow2.f32 %v7079_v7  ;;  %v8636_v4 = vld [vmem:[%s12631_s2 + $0x5c0] ss:$60 sps:$4 sm:$0xff]   ;;  %v7509_v14 = vunpack.c.h.bf16 %v11186_v1 }
 0x175   :  { %v11147_v32 = vpop.eup %9695  ;;  %5457 = vmatmul.mubr.bf16.gmra.mrb[44].mxu1 %v8627_v12  ;;  %v2340_v34 = vpop.permute.xlu0 %2339  ;;  %9715 = vpow2.f32 %v7078_v13 }
 0x176   :  { %v11155_v33 = vpop.eup %9697  ;;  %v3261_v16 = vmul.f32 %v7500_v19, %v2340_v34  ;;  %2499 = vperm.xlu0 %8557, %v9688_v9   ;;  %6282 = vmatpush1.bf16.msra.mxu0 %v3525_v27  ;;  %9717 = vpow2.f32 %v6953_v20  ;;  %v7760_v9 = vunpack.c.l.bf16 %v11170_v49  ;;  %v8643_v34 = vld [vmem:[%s12631_s2 + $0x694] ss:$60 sps:$4 sm:$0xff]  }
 0x177   :  { %v11158_v41 = vpop.eup %9699  ;;  %v2985_v31 = vpop.permute.xlu1 %2984  ;;  %5464 = vmatprep.mubr.bf16.mxu1 %v8631_v24  ;;  %6283 = vmatprep.subr.bf16.mxu0 %v9889_v0  ;;  %9719 = vpow2.f32 %v6952_v6  ;;  %v8639_v6 = vld [vmem:[%s12631_s2 + $0x618] ss:$60 sps:$4 sm:$0xff]  }
 0x178   :  { %v11165_v35 = vpop.eup %9701  ;;  %v3462_v48 = vpack.c.bf16 %v3262_v10, %v3261_v16  ;;  %v3390_v44 = vmul.f32 %v7757_v23, %v2985_v31  ;;  %3144 = vperm.xlu1 %8558, %v9690_v17   ;;  %9721 = vpow2.f32 %v7081_v29  ;;  %v8640_v17 = vld [vmem:[%s12631_s2 + $0x63c] ss:$60 sps:$4 sm:$0xff]   ;;  %v7508_v10 = vunpack.c.l.bf16 %v11186_v1  ;;  %v120_v1 = vld [vmem:[%s12629_s0 + $0x348] sm:$0xff] }
 0x179   :  { %v11172_v51 = vpop.eup %9703  ;;  %6197 = vmatmul.mubr.bf16.gmra.mrb[44].mxu0 %v8630_v37  ;;  %v2980_v52 = vpop.permute.xlu0 %2979  ;;  %9723 = vpow2.f32 %v7080_v15  ;;  %v113_v15 = vld [vmem:[%s12629_s0 + $0x310] sm:$0xff] }
 0x17a   :  { %v9706_v53 = vpop.eup %9705  ;;  %v3389_v54 = vmul.f32 %v7756_v39, %v2980_v52  ;;  %3139 = vperm.xlu0 %8557, %v9692_v21   ;;  %5544 = vmatpush1.bf16.msra.mxu1 %v3462_v48  ;;  %9725 = vpow2.f32 %v6955_v40  ;;  %v11202_v21 = vld [vmem:[%s12630_s1 + $0x2e8] sm:$0xff]   ;;  %v11221_v39 = vld [vmem:[%s12630_s1 + $0xf0] sm:$0xff]   ;;  %v115_v48 = vld [vmem:[%s12629_s0 + $0x320] sm:$0xff]  ;;  %v6956_v52 = vmul.f32 -1.442695, %v113_v15 }
 0x17b   :  { %v9708_v56 = vpop.eup %9707  ;;  %v2355_v57 = vpop.permute.xlu1 %2354  ;;  %6204 = vmatprep.mubr.bf16.mxu0 %v8634_v43  ;;  %5545 = vmatprep.subr.bf16.mxu1 %v9889_v0  ;;  %v1146_v59 = vadd.f32 1.0, %v9706_v53  ;;  %9727 = vpow2.f32 %v6954_v46  ;;  %v8642_v43 = vld [vmem:[%s12631_s2 + $0x638] ss:$60 sps:$4 sm:$0xff]   ;;  %v7764_v46 = vunpack.c.l.bf16 %v11202_v21 }
 0x17c   :  { %v9710_v60 = vpop.eup %9709  ;;  %v3526_v61 = vpack.c.bf16 %v3390_v44, %v3389_v54  ;;  %v3264_v63 = vmul.f32 %v7505_v42, %v2355_v57  ;;  %2514 = vperm.xlu1 %8558, %v9694_v26   ;;  %v1145_v2 = vadd.f32 1.0, %v9708_v56  ;;  %9729 = vpow2.f32 %v6957_v36  ;;  %v8646_v56 = vld [vmem:[%s12631_s2 + $0x6b4] ss:$60 sps:$4 sm:$0xff]  }
 0x17d   :  { %v9712_v3 = vpop.eup %9711  ;;  %5465 = vmatmul.mubr.bf16.gmra.mrb[48].mxu1 %v8633_v47  ;;  %v2350_v62 = vpop.permute.xlu0 %2349  ;;  %9731 = vrcp.f32 %v1146_v59  ;;  %v1020_v5 = vadd.f32 1.0, %v9710_v60  ;;  %v118_v47 = vld [vmem:[%s12629_s0 + $0x338] sm:$0xff] }
 0x17e   :  { %v9714_v7 = vpop.eup %9713  ;;  %v3263_v8 = vmul.f32 %v7504_v55, %v2350_v62  ;;  %2509 = vperm.xlu0 %8557, %v11147_v32   ;;  %6284 = vmatpush1.bf16.msra.mxu0 %v3526_v61  ;;  %9733 = vrcp.f32 %v1145_v2  ;;  %v1019_v11 = vadd.f32 1.0, %v9712_v3  ;;  %v7765_v32 = vunpack.c.h.bf16 %v11202_v21  ;;  %v11248_v61 = vld [vmem:[%s12630_s1 + $0x2f0] sm:$0xff]  }
 0x17f   :  { %v9716_v12 = vpop.eup %9715  ;;  %v2995_v13 = vpop.permute.xlu1 %2994  ;;  %5472 = vmatprep.mubr.bf16.mxu1 %v8637_v45  ;;  %6285 = vmatprep.subr.bf16.mxu0 %v9889_v0  ;;  %9735 = vrcp.f32 %v1020_v5  ;;  %v1148_v18 = vadd.f32 1.0, %v9714_v7  ;;  %v7513_v55 = vunpack.c.h.bf16 %v11221_v39  ;;  %v8645_v62 = vld [vmem:[%s12631_s2 + $0x690] ss:$60 sps:$4 sm:$0xff]   ;;  %v119_v5 = vld [vmem:[%s12629_s0 + $0x340] sm:$0xff] }
 0x180   :  { %v9718_v19 = vpop.eup %9717  ;;  %v3463_v20 = vpack.c.bf16 %v3264_v63, %v3263_v8  ;;  %v3392_v50 = vmul.f32 %v7761_v58, %v2995_v13  ;;  %3154 = vperm.xlu1 %8558, %v11155_v33   ;;  %9737 = vrcp.f32 %v1019_v11  ;;  %v1147_v22 = vadd.f32 1.0, %v9716_v12  ;;  %v117_v58 = vld [vmem:[%s12629_s0 + $0x330] sm:$0xff]  ;;  %v122_v12 = vld [vmem:[%s12629_s0 + $0x358] sm:$0xff] }
 0x181   :  { %v9720_v23 = vpop.eup %9719  ;;  %6205 = vmatmul.mubr.bf16.gmra.mrb[48].mxu0 %v8636_v4  ;;  %v2990_v24 = vpop.permute.xlu0 %2989  ;;  %9739 = vrcp.f32 %v1148_v18  ;;  %v1022_v25 = vadd.f32 1.0, %v9718_v19  ;;  %v6958_v63 = vmul.f32 -1.442695, %v115_v48  ;;  %v6961_v4 = vmul.f32 -1.442695, %v118_v47 }
 0x182   :  { %v9722_v26 = vpop.eup %9721  ;;  %v3391_v27 = vmul.f32 %v7760_v9, %v2990_v24  ;;  %3149 = vperm.xlu0 %8557, %v11158_v41   ;;  %5546 = vmatpush1.bf16.msra.mxu1 %v3463_v20  ;;  %9741 = vrcp.f32 %v1147_v22  ;;  %v1021_v28 = vadd.f32 1.0, %v9720_v23  ;;  %v116_v41 = vld [vmem:[%s12629_s0 + $0x328] sm:$0xff]  ;;  %v7512_v9 = vunpack.c.l.bf16 %v11221_v39  ;;  %v121_v20 = vld [vmem:[%s12629_s0 + $0x350] sm:$0xff]  ;;  %v11274_v23 = vld [vmem:[%s12630_s1 + $0xf8] sm:$0xff]  }
 0x183   :  { %v9724_v29 = vpop.eup %9723  ;;  %v2365_v30 = vpop.permute.xlu1 %2364  ;;  %6212 = vmatprep.mubr.bf16.mxu0 %v8640_v17  ;;  %5547 = vmatprep.subr.bf16.mxu1 %v9889_v0  ;;  %9743 = vrcp.f32 %v1022_v25  ;;  %v1150_v37 = vadd.f32 1.0, %v9722_v26  ;;  %v6959_v57 = vmul.f32 -1.442695, %v116_v41  ;;  %v6960_v11 = vmul.f32 -1.442695, %v117_v58 }
 0x184   :  { %v9726_v38 = vpop.eup %9725  ;;  %v3527_v33 = vpack.c.bf16 %v3392_v50, %v3391_v27  ;;  %v3266_v16 = vmul.f32 %v7509_v14, %v2365_v30  ;;  %2524 = vperm.xlu1 %8558, %v11165_v35   ;;  %9745 = vrcp.f32 %v1021_v28  ;;  %v1149_v40 = vadd.f32 1.0, %v9724_v29  ;;  %v8649_v18 = vld [vmem:[%s12631_s2 + $0x70c] ss:$60 sps:$4 sm:$0xff]   ;;  %v123_v28 = vld [vmem:[%s12629_s0 + $0x360] sm:$0xff] }
 0x185   :  { %v9728_v31 = vpop.eup %9727  ;;  %5473 = vmatmul.mubr.bf16.gmra.mrb[52].mxu1 %v8639_v6  ;;  %v2360_v42 = vpop.permute.xlu0 %2359  ;;  %9747 = vrcp.f32 %v1150_v37  ;;  %v1024_v35 = vadd.f32 1.0, %v9726_v38  ;;  %v7769_v17 = vunpack.c.h.bf16 %v11248_v61  ;;  %v6963_v19 = vmul.f32 -1.442695, %v120_v1  ;;  %v124_v6 = vld [vmem:[%s12629_s0 + $0x368] sm:$0xff]  ;;  %v126_v37 = vld [vmem:[%s12629_s0 + $0x378] sm:$0xff] }
 0x186   :  { %v9730_v44 = vpop.eup %9729  ;;  %v3265_v49 = vmul.f32 %v7508_v10, %v2360_v42  ;;  %2519 = vperm.xlu0 %8557, %v11172_v51   ;;  %6286 = vmatpush1.bf16.msra.mxu0 %v3527_v33  ;;  %9749 = vrcp.f32 %v1149_v40  ;;  %v1023_v36 = vadd.f32 1.0, %v9728_v31  ;;  %v6962_v24 = vmul.f32 -1.442695, %v119_v5  ;;  %v8648_v27 = vld [vmem:[%s12631_s2 + $0x6b0] ss:$60 sps:$4 sm:$0xff]  }
 0x187   :  { %v9732_v53 = vpop.eup %9731  ;;  %v3005_v54 = vpop.permute.xlu1 %3004  ;;  %5480 = vmatprep.mubr.bf16.mxu1 %v8643_v34  ;;  %6287 = vmatprep.subr.bf16.mxu0 %v9889_v0  ;;  %9751 = vrcp.f32 %v1024_v35  ;;  %v1026_v51 = vadd.f32 1.0, %v9730_v44  ;;  %v6965_v10 = vmul.f32 -1.442695, %v122_v12  ;;  %v6964_v34 = vmul.f32 -1.442695, %v121_v20  ;;  %v125_v40 = vld [vmem:[%s12629_s0 + $0x370] sm:$0xff] }
 0x188   :  { %v9734_v45 = vpop.eup %9733  ;;  %v3464_v59 = vpack.c.bf16 %v3266_v16, %v3265_v49  ;;  %v3394_v60 = vmul.f32 %v7765_v32, %v3005_v54  ;;  %3164 = vperm.xlu1 %8558, %v9732_v53   ;;  %9753 = vrcp.f32 %v1023_v36  ;;  %v7768_v32 = vunpack.c.l.bf16 %v11248_v61  ;;  %v8652_v16 = vld [vmem:[%s12631_s2 + $0x72c] ss:$60 sps:$4 sm:$0xff]   ;;  %v7940_v44 = vld [vmem:[%s12630_s1 + $0x2f8] sm:$0xff]  }
 0x189   :  { %v9736_v2 = vpop.eup %9735  ;;  %6213 = vmatmul.mubr.bf16.gmra.mrb[52].mxu0 %v8642_v43  ;;  %v3000_v3 = vpop.permute.xlu0 %2999  ;;  %9755 = vrcp.f32 %v1026_v51  ;;  %v7517_v33 = vunpack.c.h.bf16 %v11274_v23  ;;  %v6967_v39 = vmul.f32 -1.442695, %v124_v6  ;;  %v6966_v43 = vmul.f32 -1.442695, %v123_v28  ;;  %v8651_v48 = vld [vmem:[%s12631_s2 + $0x708] ss:$60 sps:$4 sm:$0xff]  }
 0x18a   :  { %v9738_v7 = vpop.eup %9737  ;;  %v3393_v8 = vmul.f32 %v7764_v46, %v3000_v3  ;;  %3159 = vperm.xlu0 %8557, %v9734_v45   ;;  %5548 = vmatpush1.bf16.msra.mxu1 %v3464_v59  ;;  %9757 = vpow2.f32 %v6956_v52  ;;  %v6969_v49 = vmul.f32 -1.442695, %v126_v37  ;;  %v7516_v47 = vunpack.c.l.bf16 %v11274_v23  ;;  %v8654_v61 = vld [vmem:[%s12631_s2 + $0x728] ss:$60 sps:$4 sm:$0xff]   ;;  %v8664_v37 = vld [vmem:[%s12631_s2 + $0x81c] ss:$60 sps:$4 sm:$0xff]  }
 0x18b   :  { %v9740_v13 = vpop.eup %9739  ;;  %v2375_v14 = vpop.permute.xlu1 %2374  ;;  %6220 = vmatprep.mubr.bf16.mxu0 %v8646_v56  ;;  %5549 = vmatprep.subr.bf16.mxu1 %v9889_v0  ;;  %9759 = vpow2.f32 %v6959_v57  ;;  %v6968_v53 = vmul.f32 -1.442695, %v125_v40  ;;  %v8655_v56 = vld [vmem:[%s12631_s2 + $0x784] ss:$60 sps:$4 sm:$0xff]   ;;  %v7773_v45 = vunpack.c.h.bf16 %v7940_v44  ;;  %v7772_v3 = vunpack.c.l.bf16 %v7940_v44  ;;  %v130_v40 = vld [vmem:[%s12629_s0 + $0x398] sm:$0xff] }
 0x18c   :  { %v9742_v50 = vpop.eup %9741  ;;  %v3528_v21 = vpack.c.bf16 %v3394_v60, %v3393_v8  ;;  %v3268_v22 = vmul.f32 %v7513_v55, %v2375_v14  ;;  %2534 = vperm.xlu1 %8558, %v9736_v2   ;;  %9761 = vpow2.f32 %v6958_v63 }
 0x18d   :  { %v9744_v25 = vpop.eup %9743  ;;  %5481 = vmatmul.mubr.bf16.gmra.mrb[56].mxu1 %v8645_v62  ;;  %v2370_v26 = vpop.permute.xlu0 %2369  ;;  %9763 = vpow2.f32 %v6961_v4 }
 0x18e   :  { %v9746_v29 = vpop.eup %9745  ;;  %v3267_v30 = vmul.f32 %v7512_v9, %v2370_v26  ;;  %2529 = vperm.xlu0 %8557, %v9738_v7   ;;  %6288 = vmatpush1.bf16.msra.mxu0 %v3528_v21  ;;  %9765 = vpow2.f32 %v6960_v11  ;;  %v8658_v7 = vld [vmem:[%s12631_s2 + $0x7a4] ss:$60 sps:$4 sm:$0xff]  }
 0x18f   :  { %v11289_v15 = vpop.eup %9747  ;;  %v3015_v38 = vpop.permute.xlu1 %3014  ;;  %5488 = vmatprep.mubr.bf16.mxu1 %v8649_v18  ;;  %6289 = vmatprep.subr.bf16.mxu0 %v9889_v0  ;;  %9767 = vpow2.f32 %v6963_v19  ;;  %v8657_v18 = vld [vmem:[%s12631_s2 + $0x780] ss:$60 sps:$4 sm:$0xff]  }
 0x190   :  { %v11299_v41 = vpop.eup %9749  ;;  %v3465_v31 = vpack.c.bf16 %v3268_v22, %v3267_v30  ;;  %v3396_v42 = vmul.f32 %v7769_v17, %v3015_v38  ;;  %3174 = vperm.xlu1 %8558, %v9740_v13   ;;  %9769 = vpow2.f32 %v6962_v24  ;;  %v8661_v24 = vld [vmem:[%s12631_s2 + $0x7fc] ss:$60 sps:$4 sm:$0xff]   ;;  %v127_v38 = vld [vmem:[%s12629_s0 + $0x380] sm:$0xff] }
 0x191   :  { %v11301_v46 = vpop.eup %9751  ;;  %6221 = vmatmul.mubr.bf16.gmra.mrb[56].mxu0 %v8648_v27  ;;  %v3010_v35 = vpop.permute.xlu0 %3009  ;;  %9771 = vpow2.f32 %v6965_v10 }
 0x192   :  { %v11309_v36 = vpop.eup %9753  ;;  %v3395_v52 = vmul.f32 %v7768_v32, %v3010_v35  ;;  %3169 = vperm.xlu0 %8557, %v9742_v50   ;;  %5550 = vmatpush1.bf16.msra.mxu1 %v3465_v31  ;;  %9773 = vpow2.f32 %v6964_v34  ;;  %v128_v32 = vld [vmem:[%s12629_s0 + $0x388] sm:$0xff] }
 0x193   :  { %v11312_v54 = vpop.eup %9755  ;;  %v2385_v55 = vpop.permute.xlu1 %2384  ;;  %6228 = vmatprep.mubr.bf16.mxu0 %v8652_v16  ;;  %5551 = vmatprep.subr.bf16.mxu1 %v9889_v0  ;;  %9775 = vpow2.f32 %v6967_v39 }
 0x194   :  { %v9758_v51 = vpop.eup %9757  ;;  %v3529_v57 = vpack.c.bf16 %v3396_v42, %v3395_v52  ;;  %v3270_v58 = vmul.f32 %v7517_v33, %v2385_v55  ;;  %2544 = vperm.xlu1 %8558, %v9744_v25   ;;  %9777 = vpow2.f32 %v6966_v43  ;;  %v6971_v42 = vmul.f32 -1.442695, %v128_v32  ;;  %v129_v43 = vld [vmem:[%s12629_s0 + $0x390] sm:$0xff] }
 0x195   :  { %v9760_v59 = vpop.eup %9759  ;;  %5489 = vmatmul.mubr.bf16.gmra.mrb[60].mxu1 %v8651_v48  ;;  %v2380_v60 = vpop.permute.xlu0 %2379  ;;  %v1025_v63 = vadd.f32 1.0, %v9758_v51  ;;  %9779 = vpow2.f32 %v6969_v49  ;;  %v8663_v48 = vld [vmem:[%s12631_s2 + $0x7f8] ss:$60 sps:$4 sm:$0xff]   ;;  %v6970_v49 = vmul.f32 -1.442695, %v127_v38 }
 0x196   :  { %v9762_v1 = vpop.eup %9761  ;;  %v3269_v2 = vmul.f32 %v7516_v47, %v2380_v60  ;;  %2539 = vperm.xlu0 %8557, %v9746_v29   ;;  %6290 = vmatpush1.bf16.msra.mxu0 %v3529_v57  ;;  %v1028_v62 = vadd.f32 1.0, %v9760_v59  ;;  %9781 = vpow2.f32 %v6968_v53  ;;  %v8660_v29 = vld [vmem:[%s12631_s2 + $0x7a0] ss:$60 sps:$4 sm:$0xff]   ;;  %v8667_v47 = vld [vmem:[%s12631_s2 + $0x874] ss:$60 sps:$4 sm:$0xff]  }
 0x197   :  { %v9764_v4 = vpop.eup %9763  ;;  %v3025_v5 = vpop.permute.xlu1 %3024  ;;  %5496 = vmatprep.mubr.bf16.mxu1 %v8655_v56  ;;  %6291 = vmatprep.subr.bf16.mxu0 %v9889_v0  ;;  %9783 = vrcp.f32 %v1025_v63  ;;  %v1027_v8 = vadd.f32 1.0, %v9762_v1  ;;  %v6973_v53 = vmul.f32 -1.442695, %v130_v40  ;;  %v6972_v51 = vmul.f32 -1.442695, %v129_v43  ;;  %v134_v57 = vld [vmem:[%s12629_s0 + $0x3b8] sm:$0xff] }
 0x198   :  { %v9766_v9 = vpop.eup %9765  ;;  %v3466_v11 = vpack.c.bf16 %v3270_v58, %v3269_v2  ;;  %v3398_v12 = vmul.f32 %v7773_v45, %v3025_v5  ;;  %3184 = vperm.xlu1 %8558, %v11289_v15   ;;  %9785 = vrcp.f32 %v1028_v62  ;;  %v1030_v13 = vadd.f32 1.0, %v9764_v4  ;;  %v133_v59 = vld [vmem:[%s12629_s0 + $0x3b0] sm:$0xff]  ;;  %v136_v2 = vld [vmem:[%s12629_s0 + $0x3c8] sm:$0xff]  ;;  %v135_v5 = vld [vmem:[%s12629_s0 + $0x3c0] sm:$0xff] }
 0x199   :  { %v9768_v14 = vpop.eup %9767  ;;  %6229 = vmatmul.mubr.bf16.gmra.mrb[60].mxu0 %v8654_v61  ;;  %v3020_v17 = vpop.permute.xlu0 %3019  ;;  %9787 = vrcp.f32 %v1027_v8  ;;  %v1029_v19 = vadd.f32 1.0, %v9766_v9  ;;  %v8666_v63 = vld [vmem:[%s12631_s2 + $0x818] ss:$60 sps:$4 sm:$0xff]   ;;  %v6977_v4 = vmul.f32 -1.442695, %v134_v57  ;;  %v7877_v8 = vld [vmem:[%s12630_s1 + $0x100] sm:$0xff]  }
 0x19a   :  { %v9770_v20 = vpop.eup %9769  ;;  %v3397_v50 = vmul.f32 %v7772_v3, %v3020_v17  ;;  %3179 = vperm.xlu0 %8557, %v11299_v41   ;;  %5552 = vmatpush1.bf16.msra.mxu1 %v3466_v11  ;;  %9789 = vrcp.f32 %v1030_v13  ;;  %v1032_v21 = vadd.f32 1.0, %v9768_v14  ;;  %v8670_v62 = vld [vmem:[%s12631_s2 + $0x894] ss:$60 sps:$4 sm:$0xff]   ;;  %v6976_v11 = vmul.f32 -1.442695, %v133_v59 }
 0x19b   :  { %v9772_v22 = vpop.eup %9771  ;;  %v11330_v23 = vpop.permute.xlu1 %2394  ;;  %6236 = vmatprep.mubr.bf16.mxu0 %v8658_v7  ;;  %9791 = vrcp.f32 %v1029_v19  ;;  %v1031_v6 = vadd.f32 1.0, %v9770_v20  ;;  %5706 = vmatprep.subr.bf16.mxu1 %v9889_v0  ;;  %v6979_v14 = vmul.f32 -1.442695, %v136_v2  ;;  %v8669_v20 = vld [vmem:[%s12631_s2 + $0x870] ss:$60 sps:$4 sm:$0xff]  }
 0x19c   :  { %v9774_v25 = vpop.eup %9773  ;;  %v3530_v26 = vpack.c.bf16 %v3398_v12, %v3397_v50  ;;  %2554 = vperm.xlu1 %8558, %v11301_v46   ;;  %9793 = vrcp.f32 %v1032_v21  ;;  %v1034_v27 = vadd.f32 1.0, %v9772_v22  ;;  %v138_v12 = vld [vmem:[%s12629_s0 + $0x3d8] sm:$0xff]  ;;  %v6978_v50 = vmul.f32 -1.442695, %v135_v5  ;;  %v11455_v40 = vld [vmem:[%s12630_s1 + $0x310] sm:$0xff]  }
 0x19d   :  { %v9776_v10 = vpop.eup %9775  ;;  %5497 = vmatmul.mubr.bf16.gmra.mrb[64].mxu1 %v8657_v18  ;;  %v11337_v28 = vpop.permute.xlu0 %2389  ;;  %9795 = vrcp.f32 %v1031_v6  ;;  %v1033_v30 = vadd.f32 1.0, %v9774_v25  ;;  %v11411_v18 = vld [vmem:[%s12630_s1 + $0x300] sm:$0xff]   ;;  %v7521_v22 = vunpack.c.h.bf16 %v7877_v8  ;;  %v11423_v6 = vld [vmem:[%s12630_s1 + $0x108] sm:$0xff]   ;;  %v7784_v57 = vunpack.c.l.bf16 %v11455_v40 }
 0x19e   :  { %v9778_v34 = vpop.eup %9777  ;;  %2549 = vperm.xlu0 %8557, %v11309_v36   ;;  %6292 = vmatpush1.bf16.msra.mxu0 %v3530_v26  ;;  %9797 = vrcp.f32 %v1034_v27  ;;  %v1036_v15 = vadd.f32 1.0, %v9776_v10  ;;  %v132_v36 = vld [vmem:[%s12629_s0 + $0x3a8] sm:$0xff]  ;;  %v6981_v26 = vmul.f32 -1.442695, %v138_v12  ;;  %v7777_v32 = vunpack.c.h.bf16 %v11411_v18 }
 0x19f   :  { %v9780_v33 = vpop.eup %9779  ;;  %v11352_v16 = vpop.permute.xlu1 %3034  ;;  %5504 = vmatprep.mubr.bf16.mxu1 %v8661_v24  ;;  %9799 = vrcp.f32 %v1033_v30  ;;  %v1035_v39 = vadd.f32 1.0, %v9778_v34  ;;  %6446 = vmatprep.subr.bf16.mxu0 %v9889_v0  ;;  %v6975_v45 = vmul.f32 -1.442695, %v132_v36  ;;  %v7520_v24 = vunpack.c.l.bf16 %v7877_v8  ;;  %v8675_v25 = vld [vmem:[%s12631_s2 + $0xc] ss:$60 sps:$4 sm:$0xff]   ;;  %v11443_v34 = vld [vmem:[%s12630_s1 + $0x110] sm:$0xff]  }
 0x1a0   :  { %v9782_v41 = vpop.eup %9781  ;;  %2564 = vperm.xlu1 %8558, %v11312_v54   ;;  %9801 = vrcp.f32 %v1036_v15  ;;  %v1038_v31 = vadd.f32 1.0, %v9780_v33  ;;  %v131_v54 = vld [vmem:[%s12629_s0 + $0x3a0] sm:$0xff]  ;;  %v11433_v10 = vld [vmem:[%s12630_s1 + $0x308] sm:$0xff]   ;;  %v7776_v15 = vunpack.c.l.bf16 %v11411_v18  ;;  %v7525_v38 = vunpack.c.h.bf16 %v11423_v6 }
 0x1a1   :  { %v9784_v46 = vpop.eup %9783  ;;  %6237 = vmatmul.mubr.bf16.gmra.mrb[64].mxu0 %v8660_v29  ;;  %v11362_v35 = vpop.permute.xlu0 %3029  ;;  %9803 = vrcp.f32 %v1035_v39  ;;  %v1037_v44 = vadd.f32 1.0, %v9782_v41  ;;  %v6974_v1 = vmul.f32 -1.442695, %v131_v54  ;;  %v7524_v33 = vunpack.c.l.bf16 %v11423_v6  ;;  %v8672_v41 = vld [vmem:[%s12631_s2 + $0x890] ss:$60 sps:$4 sm:$0xff]  }
 0x1a2   :  { %v9786_v52 = vpop.eup %9785  ;;  %2559 = vperm.xlu0 %8557, %v9784_v46   ;;  %6244 = vmatprep.mubr.bf16.mxu0 %v8664_v37  ;;  %9805 = vrcp.f32 %v1038_v31  ;;  %v137_v31 = vld [vmem:[%s12629_s0 + $0x3d0] sm:$0xff]  ;;  %v3272_v43 = vmul.f32 %v7521_v22, %v11330_v23  ;;  %v3271_v46 = vmul.f32 %v7520_v24, %v11337_v28  ;;  %v140_v23 = vld [vmem:[%s12629_s0 + $0x3e8] sm:$0xff]  ;;  %v7780_v28 = vunpack.c.l.bf16 %v11433_v10 }
 0x1a3   :  { %v9788_v55 = vpop.eup %9787  ;;  %v11376_v56 = vpop.permute.xlu1 %2404  ;;  %9807 = vrcp.f32 %v1037_v44  ;;  %v11469_v44 = vld [vmem:[%s12630_s1 + $0x118] sm:$0xff]   ;;  %v3400_v12 = vmul.f32 %v7777_v32, %v11352_v16  ;;  %v8676_v6 = vld [vmem:[%s12631_s2 + $0x28] ss:$60 sps:$4 sm:$0xff]  }
 0x1a4   :  { %v9790_v58 = vpop.eup %9789  ;;  %2574 = vperm.xlu1 %8558, %v9786_v52   ;;  %9809 = vpow2.f32 %v6971_v42  ;;  %v7529_v52 = vunpack.c.h.bf16 %v11443_v34  ;;  %v7532_v5 = vunpack.c.l.bf16 %v11469_v44  ;;  %v11522_v32 = vld [vmem:[%s12630_s1 + $0x120] sm:$0xff]  }
 0x1a5   :  { %v9792_v60 = vpop.eup %9791  ;;  %5505 = vmatmul.mubr.bf16.gmra.mrb[68].mxu1 %v8663_v48  ;;  %v11384_v61 = vpop.permute.xlu0 %2399  ;;  %9811 = vpow2.f32 %v6970_v49  ;;  %v7781_v48 = vunpack.c.h.bf16 %v11433_v10  ;;  %v8678_v49 = vld [vmem:[%s12631_s2 + $0x2c] ss:$60 sps:$4 sm:$0xff]  }
 0x1a6   :  { %v9794_v3 = vpop.eup %9793  ;;  %2569 = vperm.xlu0 %8557, %v9788_v55   ;;  %5512 = vmatprep.mubr.bf16.mxu1 %v8667_v47  ;;  %9813 = vpow2.f32 %v6973_v53  ;;  %v7528_v47 = vunpack.c.l.bf16 %v11443_v34  ;;  %v3273_v22 = vmul.f32 %v7524_v33, %v11384_v61 }
 0x1a7   :  { %v9796_v7 = vpop.eup %9795  ;;  %v11401_v9 = vpop.permute.xlu1 %3044  ;;  %9815 = vpow2.f32 %v6972_v51  ;;  %v7785_v51 = vunpack.c.h.bf16 %v11455_v40 }
 0x1a8   :  { %v9798_v13 = vpop.eup %9797  ;;  %2584 = vperm.xlu1 %8558, %v9790_v58   ;;  %9817 = vpow2.f32 %v6975_v45  ;;  %v6980_v45 = vmul.f32 -1.442695, %v137_v31  ;;  %v11513_v61 = vmul.f32 %v7781_v48, %v11401_v9  ;;  %v239_v31 = vld [vmem:[%s12629_s0 + $0x700] sm:$0xff] }
 0x1a9   :  { %v11406_v17 = vpop.eup %9799  ;;  %6245 = vmatmul.mubr.bf16.gmra.mrb[68].mxu0 %v8666_v63  ;;  %v11413_v19 = vpop.permute.xlu0 %3039  ;;  %9819 = vpow2.f32 %v6974_v1  ;;  %v8673_v63 = vld [vmem:[%s12631_s2 + $0x8] ss:$60 sps:$4 sm:$0xff]   ;;  %v7533_v1 = vunpack.c.h.bf16 %v11469_v44  ;;  %v8685_v44 = vld [vmem:[%s12631_s2 + $0xfc] ss:$60 sps:$4 sm:$0xff]  }
 0x1aa   :  { %v11418_v21 = vpop.eup %9801  ;;  %2579 = vperm.xlu0 %8557, %v9792_v60   ;;  %6252 = vmatprep.mubr.bf16.mxu0 %v8670_v62  ;;  %9821 = vpow2.f32 %v6977_v4  ;;  %v3467_v4 = vpack.c.bf16 %v3272_v43, %v3271_v46 }
 0x1ab   :  { %v11428_v27 = vpop.eup %9803  ;;  %v11435_v29 = vpop.permute.xlu1 %2414  ;;  %9823 = vpow2.f32 %v6976_v11 }
 0x1ac   :  { %v11437_v30 = vpop.eup %9805  ;;  %2594 = vperm.xlu1 %8558, %v9794_v3   ;;  %9825 = vpow2.f32 %v6979_v14  ;;  %v6983_v3 = vmul.f32 -1.442695, %v140_v23  ;;  %v3276_v9 = vmul.f32 %v7529_v52, %v11435_v29  ;;  %v8681_v29 = vld [vmem:[%s12631_s2 + $0x80] ss:$60 sps:$4 sm:$0xff]  }
 0x1ad   :  { %v11445_v37 = vpop.eup %9807  ;;  %5513 = vmatmul.mubr.bf16.gmra.mrb[72].mxu1 %v8669_v20  ;;  %v11450_v39 = vpop.permute.xlu0 %2409  ;;  %9827 = vpow2.f32 %v6978_v50  ;;  %v3274_v50 = vmul.f32 %v7525_v38, %v11376_v56  ;;  %v8682_v23 = vld [vmem:[%s12631_s2 + $0xa4] ss:$60 sps:$4 sm:$0xff]  }
 0x1ae   :  { %v9810_v42 = vpop.eup %9809  ;;  %2589 = vperm.xlu0 %8557, %v9796_v7   ;;  %5553 = vmatprep.mubr.bf16.mxu1 %v8675_v25  ;;  %9829 = vpow2.f32 %v6981_v26  ;;  %v11495_v7 = vld [vmem:[%s12630_s1 + $0x318] sm:$0xff]   ;;  %v11548_v52 = vld [vmem:[%s12630_s1 + $0x320] sm:$0xff]  }
 0x1af   :  { %v9812_v36 = vpop.eup %9811  ;;  %v11480_v53 = vpop.permute.xlu1 %3054  ;;  %v1040_v54 = vadd.f32 1.0, %v9810_v42  ;;  %v7789_v25 = vunpack.c.h.bf16 %v11495_v7  ;;  %v7788_v26 = vunpack.c.l.bf16 %v11495_v7  ;;  %v3468_v46 = vpack.c.bf16 %v3274_v50, %v3273_v22  ;;  %v8687_v7 = vld [vmem:[%s12631_s2 + $0xf8] ss:$60 sps:$4 sm:$0xff]  }
 0x1b0   :  { %v9814_v55 = vpop.eup %9813  ;;  %2604 = vperm.xlu1 %8558, %v9798_v13   ;;  %v1039_v58 = vadd.f32 1.0, %v9812_v36  ;;  %v3399_v13 = vmul.f32 %v7776_v15, %v11362_v35  ;;  %v139_v15 = vld [vmem:[%s12629_s0 + $0x3e0] sm:$0xff]  ;;  %v7793_v40 = vunpack.c.h.bf16 %v11548_v52 }
 0x1b1   :  { %v9816_v59 = vpop.eup %9815  ;;  %6253 = vmatmul.mubr.bf16.gmra.mrb[72].mxu0 %v8672_v41  ;;  %v11484_v60 = vpop.permute.xlu0 %3049  ;;  %9831 = vrcp.f32 %v1040_v54  ;;  %v1042_v2 = vadd.f32 1.0, %v9814_v55  ;;  %v240_v41 = vld [vmem:[%s12629_s0 + $0x708] sm:$0xff]  ;;  %v7082_v54 = vmul.f32 -1.442695, %v239_v31  ;;  %v142_v55 = vld [vmem:[%s12629_s0 + $0x3f8] sm:$0xff] }
 0x1b2   :  { %v9818_v62 = vpop.eup %9817  ;;  %2599 = vperm.xlu0 %8557, %v11406_v17   ;;  %6293 = vmatprep.mubr.bf16.mxu0 %v8678_v49  ;;  %9833 = vrcp.f32 %v1039_v58  ;;  %v1041_v8 = vadd.f32 1.0, %v9816_v59  ;;  %v8679_v17 = vld [vmem:[%s12631_s2 + $0x84] ss:$60 sps:$4 sm:$0xff]   ;;  %v3531_v43 = vpack.c.bf16 %v3400_v12, %v3399_v13  ;;  %v7537_v49 = vunpack.c.h.bf16 %v11522_v32 }
 0x1b3   :  { %v9820_v11 = vpop.eup %9819  ;;  %v11499_v14 = vpop.permute.xlu1 %2424  ;;  %9835 = vrcp.f32 %v1042_v2  ;;  %v1044_v18 = vadd.f32 1.0, %v9818_v62  ;;  %v242_v62 = vld [vmem:[%s12629_s0 + $0x718] sm:$0xff] }
 0x1b4   :  { %v9822_v20 = vpop.eup %9821  ;;  %2614 = vperm.xlu1 %8558, %v11418_v21   ;;  %v1043_v24 = vadd.f32 1.0, %v9820_v11  ;;  %9837 = vpow2.f32 %v6980_v45  ;;  %v11516_v21 = vmul.f32 %v7780_v28, %v11413_v19  ;;  %v3275_v19 = vmul.f32 %v7528_v47, %v11450_v39 }
 0x1b5   :  { %v9824_v16 = vpop.eup %9823  ;;  %5554 = vmatmul.mubr.bf16.vlgmr.msra.gmra.mrb[0].mxu1 %v8673_v63  ;;  %v2420_v35 = vpop.permute.xlu0 %2419  ;;  %v1046_v10 = vadd.f32 1.0, %v9822_v20  ;;  %9839 = vpow2.f32 %v6983_v3  ;;  %v6982_v28 = vmul.f32 -1.442695, %v139_v15  ;;  %v7083_v47 = vmul.f32 -1.442695, %v240_v41  ;;  %v141_v3 = vld [vmem:[%s12629_s0 + $0x3f0] sm:$0xff] }
 0x1b6   :  { %v9826_v56 = vpop.eup %9825  ;;  %5707 = vmatpush1.bf16.msra.mxu1 %v3467_v4  ;;  %2609 = vperm.xlu0 %8557, %v11428_v27   ;;  %9841 = vrcp.f32 %v1041_v8  ;;  %v1045_v34 = vadd.f32 1.0, %v9824_v16  ;;  %v3532_v45 = vpack.c.bf16 %v11513_v61, %v11516_v21  ;;  %v3469_v59 = vpack.c.bf16 %v3276_v9, %v3275_v19  ;;  %v8688_v61 = vld [vmem:[%s12631_s2 + $0x11c] ss:$60 sps:$4 sm:$0xff]   ;;  %v7946_v21 = vld [vmem:[%s12630_s1 + $0x328] sm:$0xff]  }
 0x1b7   :  { %v9828_v38 = vpop.eup %9827  ;;  %5708 = vmatprep.subr.bf16.mxu1 %v9889_v0  ;;  %v3065_v33 = vpop.permute.xlu1 %3064  ;;  %5561 = vmatprep.mubr.bf16.mxu1 %v8679_v17  ;;  %9843 = vrcp.f32 %v1044_v18  ;;  %v1048_v27 = vadd.f32 1.0, %v9826_v56  ;;  %v3404_v63 = vmul.f32 %v7785_v51, %v11480_v53  ;;  %v3403_v8 = vmul.f32 %v7784_v57, %v11484_v60  ;;  %v8684_v51 = vld [vmem:[%s12631_s2 + $0xa0] ss:$60 sps:$4 sm:$0xff]   ;;  %v11586_v60 = vld [vmem:[%s12630_s1 + $0x128] sm:$0xff]   ;;  %v241_v18 = vld [vmem:[%s12629_s0 + $0x710] sm:$0xff] }
 0x1b8   :  { %v9830_v42 = vpop.eup %9829  ;;  %2624 = vperm.xlu1 %8558, %v11437_v30   ;;  %9845 = vrcp.f32 %v1043_v24  ;;  %v1047_v39 = vadd.f32 1.0, %v9828_v38  ;;  %v7536_v30 = vunpack.c.l.bf16 %v11522_v32  ;;  %v3277_v53 = vmul.f32 %v7532_v5, %v2420_v35 }
 0x1b9   :  { %6294 = vmatmul.mubr.bf16.vlgmr.msra.gmra.mrb[0].mxu0 %v8676_v6  ;;  %v3060_v48 = vpop.permute.xlu0 %3059  ;;  %9847 = vrcp.f32 %v1046_v10  ;;  %v1050_v36 = vadd.f32 1.0, %v9830_v42  ;;  %v7792_v57 = vunpack.c.l.bf16 %v11548_v52  ;;  %v3406_v13 = vmul.f32 %v7789_v25, %v3065_v33 }
 0x1ba   :  { %5709 = vmatpush1.bf16.msra.mxu1 %v3468_v46  ;;  %6447 = vmatpush1.bf16.msra.mxu0 %v3531_v43  ;;  %9849 = vrcp.f32 %v1045_v34  ;;  %v7085_v17 = vmul.f32 -1.442695, %v242_v62  ;;  %v3405_v50 = vmul.f32 %v7788_v26, %v3060_v48  ;;  %v3533_v6 = vpack.c.bf16 %v3404_v63, %v3403_v8  ;;  %v8693_v8 = vld [vmem:[%s12631_s2 + $0x170] ss:$60 sps:$4 sm:$0xff]  }
 0x1bb   :  { %v9832_v58 = vpop.eup %9831  ;;  %2619 = vperm.xlu0 %8557, %v11445_v37   ;;  %5710 = vmatprep.subr.bf16.mxu1 %v9889_v0  ;;  %v2435_v2 = vpop.permute.xlu1 %2434  ;;  %9851 = vrcp.f32 %v1048_v27  ;;  %v3278_v37 = vmul.f32 %v7533_v1, %v11499_v14  ;;  %v6985_v1 = vmul.f32 -1.442695, %v142_v55  ;;  %v6984_v14 = vmul.f32 -1.442695, %v141_v3  ;;  %v7947_v3 = vld [vmem:[%s12630_s1 + $0x330] sm:$0xff]  }
 0x1bc   :  { %v9834_v4 = vpop.eup %9833  ;;  %6448 = vmatprep.subr.bf16.mxu0 %v9889_v0  ;;  %2634 = vperm.xlu1 %8558, %v9832_v58   ;;  %9853 = vrcp.f32 %v1047_v39  ;;  %v3280_v22 = vmul.f32 %v7537_v49, %v2435_v2  ;;  %v7541_v10 = vunpack.c.h.bf16 %v11586_v60  ;;  %v7084_v32 = vmul.f32 -1.442695, %v241_v18  ;;  %v8690_v49 = vld [vmem:[%s12631_s2 + $0x118] ss:$60 sps:$4 sm:$0xff]  }
 0x1bd   :  { %v9836_v11 = vpop.eup %9835  ;;  %5562 = vmatmul.mubr.bf16.gmra.mrb[4].mxu1 %v8681_v29  ;;  %v2430_v12 = vpop.permute.xlu0 %2429  ;;  %6301 = vmatprep.mubr.bf16.mxu0 %v8682_v23  ;;  %9855 = vrcp.f32 %v1050_v36  ;;  %v3470_v25 = vpack.c.bf16 %v3278_v37, %v3277_v53  ;;  %v7540_v15 = vunpack.c.l.bf16 %v11586_v60  ;;  %v3534_v19 = vpack.c.bf16 %v3406_v13, %v3405_v50  ;;  %v8691_v23 = vld [vmem:[%s12631_s2 + $0x174] ss:$60 sps:$4 sm:$0xff]  }
 0x1be   :  { %v9838_v5 = vpop.eup %9837  ;;  %5711 = vmatpush1.bf16.msra.mxu1 %v3469_v59  ;;  %6449 = vmatpush1.bf16.msra.mxu0 %v3532_v45  ;;  %9857 = vpow2.f32 %v6982_v28  ;;  %v3279_v24 = vmul.f32 %v7536_v30, %v2430_v12  ;;  %v7797_v29 = vunpack.c.h.bf16 %v7946_v21  ;;  %v7883_v36 = vld [vmem:[%s12630_s1 + $0x130] sm:$0xff]   ;;  %v7796_v52 = vunpack.c.l.bf16 %v7946_v21  ;;  %v8697_v12 = vld [vmem:[%s12631_s2 + $0x1ec] ss:$60 sps:$4 sm:$0xff]  }
 0x1bf   :  { %v9840_v20 = vpop.eup %9839  ;;  %2629 = vperm.xlu0 %8557, %v9834_v4   ;;  %5712 = vmatprep.subr.bf16.mxu1 %v9889_v0  ;;  %v3075_v16 = vpop.permute.xlu1 %3074  ;;  %9859 = vpow2.f32 %v7083_v47  ;;  %v1049_v38 = vadd.f32 1.0, %v9838_v5  ;;  %v7545_v63 = vunpack.c.h.bf16 %v7883_v36  ;;  %v8694_v2 = vld [vmem:[%s12631_s2 + $0x194] ss:$60 sps:$4 sm:$0xff]   ;;  %v7801_v60 = vunpack.c.h.bf16 %v7947_v3 }
 0x1c0   :  { %v9842_v35 = vpop.eup %9841  ;;  %6450 = vmatprep.subr.bf16.mxu0 %v9889_v0  ;;  %2644 = vperm.xlu1 %8558, %v9836_v11   ;;  %9861 = vpow2.f32 %v7082_v54  ;;  %v3471_v33 = vpack.c.bf16 %v3280_v22, %v3279_v24  ;;  %v1052_v41 = vadd.f32 1.0, %v9840_v20  ;;  %v3408_v42 = vmul.f32 %v7793_v40, %v3075_v16  ;;  %v8696_v50 = vld [vmem:[%s12631_s2 + $0x190] ss:$60 sps:$4 sm:$0xff]   ;;  %v7884_v22 = vld [vmem:[%s12630_s1 + $0x138] sm:$0xff]  }
 0x1c1   :  { %v9844_v26 = vpop.eup %9843  ;;  %6302 = vmatmul.mubr.bf16.gmra.mrb[4].mxu0 %v8684_v51  ;;  %v3070_v56 = vpop.permute.xlu0 %3069  ;;  %5569 = vmatprep.mubr.bf16.mxu1 %v8685_v44  ;;  %9863 = vpow2.f32 %v6985_v1  ;;  %v7544_v11 = vunpack.c.l.bf16 %v7883_v36  ;;  %v7800_v16 = vunpack.c.l.bf16 %v7947_v3  ;;  %v7549_v21 = vunpack.c.h.bf16 %v7884_v22 }
 0x1c2   :  { %v9846_v34 = vpop.eup %9845  ;;  %5713 = vmatpush1.bf16.msra.mxu1 %v3470_v25  ;;  %6451 = vmatpush1.bf16.msra.mxu0 %v3533_v6  ;;  %9865 = vpow2.f32 %v6984_v14  ;;  %v3407_v43 = vmul.f32 %v7792_v57, %v3070_v56 }
 0x1c3   :  { %v9848_v9 = vpop.eup %9847  ;;  %2639 = vperm.xlu0 %8557, %v9842_v35   ;;  %5714 = vmatprep.subr.bf16.mxu1 %v9889_v0  ;;  %v2445_v27 = vpop.permute.xlu1 %2444  ;;  %9867 = vpow2.f32 %v7085_v17  ;;  %v8700_v35 = vld [vmem:[%s12631_s2 + $0x20c] ss:$60 sps:$4 sm:$0xff]  }
 0x1c4   :  { %v9850_v31 = vpop.eup %9849  ;;  %6452 = vmatprep.subr.bf16.mxu0 %v9889_v0  ;;  %v3282_v46 = vmul.f32 %v7541_v10, %v2445_v27  ;;  %2654 = vperm.xlu1 %8558, %v9844_v26   ;;  %9869 = vpow2.f32 %v7084_v32  ;;  %v3535_v58 = vpack.c.bf16 %v3408_v42, %v3407_v43 }
 0x1c5   :  { %v9852_v39 = vpop.eup %9851  ;;  %5570 = vmatmul.mubr.bf16.gmra.mrb[8].mxu1 %v8687_v7  ;;  %v2440_v48 = vpop.permute.xlu0 %2439  ;;  %6309 = vmatprep.mubr.bf16.mxu0 %v8688_v61  ;;  %9871 = vrcp.f32 %v1049_v38  ;;  %v7948_v38 = vld [vmem:[%s12630_s1 + $0x338] sm:$0xff]  }
 0x1c6   :  { %v9854_v28 = vpop.eup %9853  ;;  %5715 = vmatpush1.bf16.msra.mxu1 %v3471_v33  ;;  %6453 = vmatpush1.bf16.msra.mxu0 %v3534_v19  ;;  %v3281_v30 = vmul.f32 %v7540_v15, %v2440_v48  ;;  %9873 = vrcp.f32 %v1052_v41  ;;  %v8699_v15 = vld [vmem:[%s12631_s2 + $0x1e8] ss:$60 sps:$4 sm:$0xff]   ;;  %v7548_v19 = vunpack.c.l.bf16 %v7884_v22  ;;  %v7805_v43 = vunpack.c.h.bf16 %v7948_v38 }
 0x1c7   :  { %v11619_v47 = vpop.eup %9855  ;;  %2649 = vperm.xlu0 %8557, %v9846_v34   ;;  %6454 = vmatprep.subr.bf16.mxu0 %v9889_v0  ;;  %v3085_v54 = vpop.permute.xlu1 %3084  ;;  %v8703_v33 = vld [vmem:[%s12631_s2 + $0x264] ss:$60 sps:$4 sm:$0xff]   ;;  %v7804_v36 = vunpack.c.l.bf16 %v7948_v38  ;;  %v7950_v22 = vld [vmem:[%s12630_s1 + $0x348] sm:$0xff]  }
 0x1c8   :  { %v9858_v55 = vpop.eup %9857  ;;  %v3472_v45 = vpack.c.bf16 %v3282_v46, %v3281_v30  ;;  %v3410_v59 = vmul.f32 %v7797_v29, %v3085_v54  ;;  %5716 = vmatprep.subr.bf16.mxu1 %v9889_v0  ;;  %2664 = vperm.xlu1 %8558, %v9848_v9   ;;  %v7885_v48 = vld [vmem:[%s12630_s1 + $0x140] sm:$0xff]  }
 0x1c9   :  { %v9860_v62 = vpop.eup %9859  ;;  %6310 = vmatmul.mubr.bf16.gmra.mrb[8].mxu0 %v8690_v49  ;;  %v3080_v4 = vpop.permute.xlu0 %3079  ;;  %5577 = vmatprep.mubr.bf16.mxu1 %v8691_v23  ;;  %v1051_v37 = vadd.f32 1.0, %v9858_v55  ;;  %v7553_v55 = vunpack.c.h.bf16 %v7885_v48  ;;  %v7552_v3 = vunpack.c.l.bf16 %v7885_v48 }
 0x1ca   :  { %v9862_v53 = vpop.eup %9861  ;;  %6455 = vmatpush1.bf16.msra.mxu0 %v3535_v58  ;;  %v3409_v51 = vmul.f32 %v7796_v52, %v3080_v4  ;;  %5717 = vmatpush1.bf16.msra.mxu1 %v3472_v45  ;;  %v1152_v40 = vadd.f32 1.0, %v9860_v62  ;;  %v8709_v62 = vld [vmem:[%s12631_s2 + $0x2dc] ss:$60 sps:$4 sm:$0xff]  }
 0x1cb   :  { %v9864_v57 = vpop.eup %9863  ;;  %2659 = vperm.xlu0 %8557, %v9850_v31   ;;  %v2455_v44 = vpop.permute.xlu1 %2454  ;;  %6456 = vmatprep.subr.bf16.mxu0 %v9889_v0  ;;  %9875 = vrcp.f32 %v1051_v37  ;;  %v1151_v1 = vadd.f32 1.0, %v9862_v53 }
 0x1cc   :  { %v9866_v5 = vpop.eup %9865  ;;  %v3536_v13 = vpack.c.bf16 %v3410_v59, %v3409_v51  ;;  %v3284_v14 = vmul.f32 %v7545_v63, %v2455_v44  ;;  %2674 = vperm.xlu1 %8558, %v9852_v39   ;;  %6317 = vmatprep.mubr.bf16.mxu0 %v8694_v2  ;;  %9877 = vrcp.f32 %v1152_v40  ;;  %v1054_v17 = vadd.f32 1.0, %v9864_v57  ;;  %v8702_v39 = vld [vmem:[%s12631_s2 + $0x208] ss:$60 sps:$4 sm:$0xff]   ;;  %v8705_v59 = vld [vmem:[%s12631_s2 + $0x260] ss:$60 sps:$4 sm:$0xff]  }
 0x1cd   :  { %v9868_v18 = vpop.eup %9867  ;;  %5578 = vmatmul.mubr.bf16.gmra.mrb[12].mxu1 %v8693_v8  ;;  %v2450_v20 = vpop.permute.xlu0 %2449  ;;  %5718 = vmatprep.subr.bf16.mxu1 %v9889_v0  ;;  %9879 = vrcp.f32 %v1151_v1  ;;  %v1053_v6 = vadd.f32 1.0, %v9866_v5  ;;  %v7949_v63 = vld [vmem:[%s12630_s1 + $0x340] sm:$0xff]   ;;  %v7886_v57 = vld [vmem:[%s12630_s1 + $0x148] sm:$0xff]   ;;  %v8712_v1 = vld [vmem:[%s12631_s2 + $0x2fc] ss:$60 sps:$4 sm:$0xff]  }
 0x1ce   :  { %v3283_v24 = vmul.f32 %v7544_v11, %v2450_v20  ;;  %6457 = vmatpush1.bf16.msra.mxu0 %v3536_v13  ;;  %5585 = vmatprep.mubr.bf16.mxu1 %v8697_v12  ;;  %v9870_v25 = vpop.eup %9869  ;;  %9881 = vrcp.f32 %v1054_v17  ;;  %v1154_v7 = vadd.f32 1.0, %v9868_v18  ;;  %v7809_v51 = vunpack.c.h.bf16 %v7949_v63  ;;  %v8708_v40 = vld [vmem:[%s12631_s2 + $0x280] ss:$60 sps:$4 sm:$0xff]  }
 0x1cf   :  { %2669 = vperm.xlu0 %8557, %v9854_v28   ;;  %v3095_v10 = vpop.permute.xlu1 %3094  ;;  %6458 = vmatprep.subr.bf16.mxu0 %v9889_v0  ;;  %v9872_v26 = vpop.eup %9871  ;;  %9883 = vrcp.f32 %v1053_v6  ;;  %v1153_v27 = vadd.f32 1.0, %v9870_v25  ;;  %v8706_v28 = vld [vmem:[%s12631_s2 + $0x284] ss:$60 sps:$4 sm:$0xff]   ;;  %v7557_v18 = vunpack.c.h.bf16 %v7886_v57 }
 0x1d0   :  { %v3473_v56 = vpack.c.bf16 %v3284_v14, %v3283_v24  ;;  %v3412_v61 = vmul.f32 %v7801_v60, %v3095_v10  ;;  %2684 = vperm.xlu1 %8558, %v11619_v47   ;;  %v9874_v32 = vpop.eup %9873  ;;  %9885 = vrcp.f32 %v1154_v7  ;;  %v7808_v60 = vunpack.c.l.bf16 %v7949_v63  ;;  %v7952_v63 = vld [vmem:[%s12630_s1 + $0x358] sm:$0xff]  }
 0x1d1   :  { %6318 = vmatmul.mubr.bf16.gmra.mrb[12].mxu0 %v8696_v50  ;;  %v3090_v34 = vpop.permute.xlu0 %3089  ;;  %9887 = vrcp.f32 %v1153_v27  ;;  %v8711_v50 = vld [vmem:[%s12631_s2 + $0x2d8] ss:$60 sps:$4 sm:$0xff]   ;;  %v7813_v7 = vunpack.c.h.bf16 %v7950_v22  ;;  %v8717_v27 = vld [vmem:[%s12631_s2 + $0x350] ss:$60 sps:$4 sm:$0xff]  }
 0x1d2   :  { %v3411_v9 = vmul.f32 %v7800_v16, %v3090_v34  ;;  %5719 = vmatpush1.bf16.msra.mxu1 %v3473_v56  ;;  %6325 = vmatprep.mubr.bf16.mxu0 %v8700_v35  ;;  %v7556_v16 = vunpack.c.l.bf16 %v7886_v57  ;;  %v8715_v35 = vld [vmem:[%s12631_s2 + $0x354] ss:$60 sps:$4 sm:$0xff]   ;;  %v7820_v57 = vunpack.c.l.bf16 %v7952_v63 }
 0x1d3   :  { %2679 = vperm.xlu0 %8557, %v9872_v26   ;;  %v2465_v41 = vpop.permute.xlu1 %2464  ;;  %5720 = vmatprep.subr.bf16.mxu1 %v9889_v0  ;;  %v8714_v56 = vld [vmem:[%s12631_s2 + $0x2f8] ss:$60 sps:$4 sm:$0xff]  }
 0x1d4   :  { %v3537_v31 = vpack.c.bf16 %v3412_v61, %v3411_v9  ;;  %v3286_v42 = vmul.f32 %v7549_v21, %v2465_v41  ;;  %2694 = vperm.xlu1 %8558, %v9874_v32   ;;  %v7887_v61 = vld [vmem:[%s12630_s1 + $0x150] sm:$0xff]   ;;  %v7812_v32 = vunpack.c.l.bf16 %v7950_v22  ;;  %v8733_v22 = vld [vmem:[%s12631_s2 + $0x4bc] ss:$60 sps:$4 sm:$0xff]  }
 0x1d5   :  { %v9876_v46 = vpop.eup %9875  ;;  %5586 = vmatmul.mubr.bf16.gmra.mrb[16].mxu1 %v8699_v15  ;;  %v2460_v29 = vpop.permute.xlu0 %2459  ;;  %v8718_v34 = vld [vmem:[%s12631_s2 + $0x374] ss:$60 sps:$4 sm:$0xff]  }
 0x1d6   :  { %v9878_v49 = vpop.eup %9877  ;;  %v3285_v23 = vmul.f32 %v7548_v19, %v2460_v29  ;;  %6459 = vmatpush1.bf16.msra.mxu0 %v3537_v31  ;;  %5593 = vmatprep.mubr.bf16.mxu1 %v8703_v33  ;;  %v7561_v19 = vunpack.c.h.bf16 %v7887_v61  ;;  %v7951_v41 = vld [vmem:[%s12630_s1 + $0x350] sm:$0xff]  }
 0x1d7   :  { %2689 = vperm.xlu0 %8557, %v9876_v46   ;;  %v3105_v30 = vpop.permute.xlu1 %3104  ;;  %6460 = vmatprep.subr.bf16.mxu0 %v9889_v0  ;;  %v9880_v52 = vpop.eup %9879  ;;  %v7817_v48 = vunpack.c.h.bf16 %v7951_v41 }
 0x1d8   :  { %v3474_v47 = vpack.c.bf16 %v3286_v42, %v3285_v23  ;;  %v3414_v54 = vmul.f32 %v7805_v43, %v3105_v30  ;;  %3194 = vperm.xlu1 %8558, %v9878_v49   ;;  %v9882_v58 = vpop.eup %9881  ;;  %v7560_v42 = vunpack.c.l.bf16 %v7887_v61  ;;  %v8721_v43 = vld [vmem:[%s12631_s2 + $0x3cc] ss:$60 sps:$4 sm:$0xff]   ;;  %v7816_v30 = vunpack.c.l.bf16 %v7951_v41  ;;  %v8736_v61 = vld [vmem:[%s12631_s2 + $0x4dc] ss:$60 sps:$4 sm:$0xff]   ;;  %v8739_v41 = vld [vmem:[%s12631_s2 + $0x534] ss:$60 sps:$4 sm:$0xff]  }
 0x1d9   :  { %6326 = vmatmul.mubr.bf16.gmra.mrb[16].mxu0 %v8702_v39  ;;  %v3100_v45 = vpop.permute.xlu0 %3099  ;;  %v9884_v8 = vpop.eup %9883  ;;  %v8720_v23 = vld [vmem:[%s12631_s2 + $0x370] ss:$60 sps:$4 sm:$0xff]  }
 0x1da   :  { %v3413_v2 = vmul.f32 %v7804_v36, %v3100_v45  ;;  %5721 = vmatpush1.bf16.msra.mxu1 %v3474_v47  ;;  %6333 = vmatprep.mubr.bf16.mxu0 %v8706_v28  ;;  %v9886_v11 = vpop.eup %9885  ;;  %v7888_v36 = vld [vmem:[%s12630_s1 + $0x158] sm:$0xff]  }
 0x1db   :  { %3189 = vperm.xlu0 %8557, %v9880_v52   ;;  %v2475_v4 = vpop.permute.xlu1 %2474  ;;  %5722 = vmatprep.subr.bf16.mxu1 %v9889_v0  ;;  %v9888_v13 = vpop.eup %9887  ;;  %v8724_v52 = vld [vmem:[%s12631_s2 + $0x3ec] ss:$60 sps:$4 sm:$0xff]  }
 0x1dc   :  { %v3538_v37 = vpack.c.bf16 %v3414_v54, %v3413_v2  ;;  %v3288_v53 = vmul.f32 %v7553_v55, %v2475_v4  ;;  %2704 = vperm.xlu1 %8558, %v9882_v58   ;;  %v7565_v58 = vunpack.c.h.bf16 %v7888_v36 }
 0x1dd   :  { %5594 = vmatmul.mubr.bf16.gmra.mrb[20].mxu1 %v8705_v59  ;;  %v2470_v12 = vpop.permute.xlu0 %2469  ;;  %v8723_v59 = vld [vmem:[%s12631_s2 + $0x3c8] ss:$60 sps:$4 sm:$0xff]  }
 0x1de   :  { %v3287_v44 = vmul.f32 %v7552_v3, %v2470_v12  ;;  %6461 = vmatpush1.bf16.msra.mxu0 %v3538_v37  ;;  %5601 = vmatprep.mubr.bf16.mxu1 %v8709_v62  ;;  %v7564_v3 = vunpack.c.l.bf16 %v7888_v36  ;;  %v8727_v62 = vld [vmem:[%s12631_s2 + $0x444] ss:$60 sps:$4 sm:$0xff]   ;;  %v8742_v36 = vld [vmem:[%s12631_s2 + $0x554] ss:$60 sps:$4 sm:$0xff]  }
 0x1df   :  { %2699 = vperm.xlu0 %8557, %v9884_v8   ;;  %v3115_v5 = vpop.permute.xlu1 %3114  ;;  %6462 = vmatprep.subr.bf16.mxu0 %v9889_v0  ;;  %v7889_v12 = vld [vmem:[%s12630_s1 + $0x160] sm:$0xff]  }
 0x1e0   :  { %v3475_v14 = vpack.c.bf16 %v3288_v53, %v3287_v44  ;;  %v3416_v17 = vmul.f32 %v7809_v51, %v3115_v5  ;;  %3204 = vperm.xlu1 %8558, %v9886_v11   ;;  %v7821_v53 = vunpack.c.h.bf16 %v7952_v63  ;;  %v8726_v11 = vld [vmem:[%s12631_s2 + $0x3e8] ss:$60 sps:$4 sm:$0xff]  }
 0x1e1   :  { %6334 = vmatmul.mubr.bf16.gmra.mrb[20].mxu0 %v8708_v40  ;;  %v3110_v20 = vpop.permute.xlu0 %3109  ;;  %v8730_v44 = vld [vmem:[%s12631_s2 + $0x464] ss:$60 sps:$4 sm:$0xff]   ;;  %v8745_v63 = vld [vmem:[%s12631_s2 + $0x5ac] ss:$60 sps:$4 sm:$0xff]  }
 0x1e2   :  { %v3415_v24 = vmul.f32 %v7808_v60, %v3110_v20  ;;  %5723 = vmatpush1.bf16.msra.mxu1 %v3475_v14  ;;  %6341 = vmatprep.mubr.bf16.mxu0 %v8712_v1 }
 0x1e3   :  { %3199 = vperm.xlu0 %8557, %v9888_v13   ;;  %v2485_v6 = vpop.permute.xlu1 %2484  ;;  %5724 = vmatprep.subr.bf16.mxu1 %v9889_v0  ;;  %v7569_v13 = vunpack.c.h.bf16 %v7889_v12 }
 0x1e4   :  { %v3539_v25 = vpack.c.bf16 %v3416_v17, %v3415_v24  ;;  %v3290_v10 = vmul.f32 %v7557_v18, %v2485_v6  ;;  %v8729_v17 = vld [vmem:[%s12631_s2 + $0x440] ss:$60 sps:$4 sm:$0xff]  }
 0x1e5   :  { %5602 = vmatmul.mubr.bf16.gmra.mrb[24].mxu1 %v8711_v50  ;;  %v2480_v26 = vpop.permute.xlu0 %2479  ;;  %v7953_v18 = vld [vmem:[%s12630_s1 + $0x360] sm:$0xff]   ;;  %v7568_v50 = vunpack.c.l.bf16 %v7889_v12  ;;  %v8748_v12 = vld [vmem:[%s12631_s2 + $0x5cc] ss:$60 sps:$4 sm:$0xff]  }
 0x1e6   :  { %v3289_v21 = vmul.f32 %v7556_v16, %v2480_v26  ;;  %6463 = vmatpush1.bf16.msra.mxu0 %v3539_v25  ;;  %5609 = vmatprep.mubr.bf16.mxu1 %v8715_v35  ;;  %v7825_v6 = vunpack.c.h.bf16 %v7953_v18 }
 0x1e7   :  { %v3125_v15 = vpop.permute.xlu1 %3124  ;;  %6464 = vmatprep.subr.bf16.mxu0 %v9889_v0 }
 0x1e8   :  { %v3476_v38 = vpack.c.bf16 %v3290_v10, %v3289_v21  ;;  %v3418_v9 = vmul.f32 %v7813_v7, %v3125_v15  ;;  %v8732_v10 = vld [vmem:[%s12631_s2 + $0x460] ss:$60 sps:$4 sm:$0xff]   ;;  %v7890_v7 = vld [vmem:[%s12630_s1 + $0x168] sm:$0xff]  }
 0x1e9   :  { %6342 = vmatmul.mubr.bf16.gmra.mrb[24].mxu0 %v8714_v56  ;;  %v3120_v33 = vpop.permute.xlu0 %3119  ;;  %v7824_v56 = vunpack.c.l.bf16 %v7953_v18  ;;  %v7573_v15 = vunpack.c.h.bf16 %v7890_v7  ;;  %v8751_v18 = vld [vmem:[%s12631_s2 + $0x624] ss:$60 sps:$4 sm:$0xff]  }
 0x1ea   :  { %v3417_v31 = vmul.f32 %v7812_v32, %v3120_v33  ;;  %5725 = vmatpush1.bf16.msra.mxu1 %v3476_v38  ;;  %6349 = vmatprep.mubr.bf16.mxu0 %v8718_v34 }
 0x1eb   :  { %v2495_v46 = vpop.permute.xlu1 %2494  ;;  %5726 = vmatprep.subr.bf16.mxu1 %v9889_v0 }
 0x1ec   :  { %v3540_v29 = vpack.c.bf16 %v3418_v9, %v3417_v31  ;;  %v3292_v39 = vmul.f32 %v7561_v19, %v2495_v46  ;;  %v8735_v9 = vld [vmem:[%s12631_s2 + $0x4b8] ss:$60 sps:$4 sm:$0xff]   ;;  %v7954_v19 = vld [vmem:[%s12630_s1 + $0x368] sm:$0xff]  }
 0x1ed   :  { %5610 = vmatmul.mubr.bf16.gmra.mrb[28].mxu1 %v8717_v27  ;;  %v2490_v49 = vpop.permute.xlu0 %2489  ;;  %v7572_v27 = vunpack.c.l.bf16 %v7890_v7  ;;  %v7829_v46 = vunpack.c.h.bf16 %v7954_v19 }
 0x1ee   :  { %v3291_v28 = vmul.f32 %v7560_v42, %v2490_v49  ;;  %6465 = vmatpush1.bf16.msra.mxu0 %v3540_v29  ;;  %5617 = vmatprep.mubr.bf16.mxu1 %v8721_v43 }
 0x1ef   :  { %v3135_v47 = vpop.permute.xlu1 %3134  ;;  %6466 = vmatprep.subr.bf16.mxu0 %v9889_v0 }
 0x1f0   :  { %v3477_v54 = vpack.c.bf16 %v3292_v39, %v3291_v28  ;;  %v3420_v55 = vmul.f32 %v7817_v48, %v3135_v47  ;;  %v8738_v39 = vld [vmem:[%s12631_s2 + $0x4d8] ss:$60 sps:$4 sm:$0xff]  }
 0x1f1   :  { %6350 = vmatmul.mubr.bf16.gmra.mrb[28].mxu0 %v8720_v23  ;;  %v3130_v45 = vpop.permute.xlu0 %3129  ;;  %v7891_v48 = vld [vmem:[%s12630_s1 + $0x170] sm:$0xff]   ;;  %v7828_v23 = vunpack.c.l.bf16 %v7954_v19  ;;  %v8756_v19 = vld [vmem:[%s12631_s2 + $0x640] ss:$60 sps:$4 sm:$0xff]  }
 0x1f2   :  { %v3419_v2 = vmul.f32 %v7816_v30, %v3130_v45  ;;  %5727 = vmatpush1.bf16.msra.mxu1 %v3477_v54  ;;  %6357 = vmatprep.mubr.bf16.mxu0 %v8724_v52  ;;  %v7577_v47 = vunpack.c.h.bf16 %v7891_v48 }
 0x1f3   :  { %v2505_v4 = vpop.permute.xlu1 %2504  ;;  %5728 = vmatprep.subr.bf16.mxu1 %v9889_v0 }
 0x1f4   :  { %v3541_v8 = vpack.c.bf16 %v3420_v55, %v3419_v2  ;;  %v3294_v37 = vmul.f32 %v7565_v58, %v2505_v4  ;;  %v8741_v55 = vld [vmem:[%s12631_s2 + $0x530] ss:$60 sps:$4 sm:$0xff]  }
 0x1f5   :  { %5618 = vmatmul.mubr.bf16.gmra.mrb[32].mxu1 %v8723_v59  ;;  %v2500_v51 = vpop.permute.xlu0 %2499  ;;  %v7955_v58 = vld [vmem:[%s12630_s1 + $0x370] sm:$0xff]   ;;  %v7576_v59 = vunpack.c.l.bf16 %v7891_v48 }
 0x1f6   :  { %v3293_v40 = vmul.f32 %v7564_v3, %v2500_v51  ;;  %6467 = vmatpush1.bf16.msra.mxu0 %v3541_v8  ;;  %5625 = vmatprep.mubr.bf16.mxu1 %v8727_v62  ;;  %v7833_v4 = vunpack.c.h.bf16 %v7955_v58  ;;  %v8766_v48 = vld [vmem:[%s12631_s2 + $0x734] ss:$60 sps:$4 sm:$0xff]  }
 0x1f7   :  { %v3145_v60 = vpop.permute.xlu1 %3144  ;;  %6468 = vmatprep.subr.bf16.mxu0 %v9889_v0 }
 0x1f8   :  { %v3478_v1 = vpack.c.bf16 %v3294_v37, %v3293_v40  ;;  %v3422_v5 = vmul.f32 %v7821_v53, %v3145_v60  ;;  %v8744_v37 = vld [vmem:[%s12631_s2 + $0x550] ss:$60 sps:$4 sm:$0xff]   ;;  %v7892_v53 = vld [vmem:[%s12630_s1 + $0x178] sm:$0xff]  }
 0x1f9   :  { %6358 = vmatmul.mubr.bf16.gmra.mrb[32].mxu0 %v8726_v11  ;;  %v3140_v14 = vpop.permute.xlu0 %3139  ;;  %v7832_v11 = vunpack.c.l.bf16 %v7955_v58  ;;  %v7581_v60 = vunpack.c.h.bf16 %v7892_v53 }
 0x1fa   :  { %v3421_v20 = vmul.f32 %v7820_v57, %v3140_v14  ;;  %5729 = vmatpush1.bf16.msra.mxu1 %v3478_v1  ;;  %6365 = vmatprep.mubr.bf16.mxu0 %v8730_v44 }
 0x1fb   :  { %v2515_v24 = vpop.permute.xlu1 %2514  ;;  %5730 = vmatprep.subr.bf16.mxu1 %v9889_v0 }
 0x1fc   :  { %v3542_v16 = vpack.c.bf16 %v3422_v5, %v3421_v20  ;;  %v3296_v35 = vmul.f32 %v7569_v13, %v2515_v24  ;;  %v8747_v5 = vld [vmem:[%s12631_s2 + $0x5a8] ss:$60 sps:$4 sm:$0xff]   ;;  %v7956_v13 = vld [vmem:[%s12630_s1 + $0x378] sm:$0xff]  }
 0x1fd   :  { %5626 = vmatmul.mubr.bf16.gmra.mrb[36].mxu1 %v8729_v17  ;;  %v2510_v25 = vpop.permute.xlu0 %2509  ;;  %v7580_v17 = vunpack.c.l.bf16 %v7892_v53  ;;  %v7837_v24 = vunpack.c.h.bf16 %v7956_v13  ;;  %v8781_v53 = vld [vmem:[%s12631_s2 + $0x87c] ss:$60 sps:$4 sm:$0xff]  }
 0x1fe   :  { %v3295_v26 = vmul.f32 %v7568_v50, %v2510_v25  ;;  %6469 = vmatpush1.bf16.msra.mxu0 %v3542_v16  ;;  %5633 = vmatprep.mubr.bf16.mxu1 %v8733_v22  ;;  %v7836_v25 = vunpack.c.l.bf16 %v7956_v13 }
 0x1ff   :  { %v3155_v21 = vpop.permute.xlu1 %3154  ;;  %6470 = vmatprep.subr.bf16.mxu0 %v9889_v0 }
 0x200   :  { %v3479_v32 = vpack.c.bf16 %v3296_v35, %v3295_v26  ;;  %v3424_v34 = vmul.f32 %v7825_v6, %v3155_v21  ;;  %v8750_v35 = vld [vmem:[%s12631_s2 + $0x5c8] ss:$60 sps:$4 sm:$0xff]   ;;  %v8753_v21 = vld [vmem:[%s12631_s2 + $0x620] ss:$60 sps:$4 sm:$0xff]  }
 0x201   :  { %6366 = vmatmul.mubr.bf16.gmra.mrb[36].mxu0 %v8732_v10  ;;  %v3150_v38 = vpop.permute.xlu0 %3149  ;;  %v8754_v10 = vld [vmem:[%s12631_s2 + $0x644] ss:$60 sps:$4 sm:$0xff]  }
 0x202   :  { %v3423_v33 = vmul.f32 %v7824_v56, %v3150_v38  ;;  %5731 = vmatpush1.bf16.msra.mxu1 %v3479_v32  ;;  %6373 = vmatprep.mubr.bf16.mxu0 %v8736_v61 }
 0x203   :  { %v2525_v31 = vpop.permute.xlu1 %2524  ;;  %5732 = vmatprep.subr.bf16.mxu1 %v9889_v0 }
 0x204   :  { %v3543_v42 = vpack.c.bf16 %v3424_v34, %v3423_v33  ;;  %v3298_v43 = vmul.f32 %v7573_v15, %v2525_v31  ;;  %v8757_v34 = vld [vmem:[%s12631_s2 + $0x69c] ss:$60 sps:$4 sm:$0xff]  }
 0x205   :  { %5634 = vmatmul.mubr.bf16.gmra.mrb[40].mxu1 %v8735_v9  ;;  %v2520_v29 = vpop.permute.xlu0 %2519  ;;  %v8760_v33 = vld [vmem:[%s12631_s2 + $0x6bc] ss:$60 sps:$4 sm:$0xff]  }
 0x206   :  { %v3297_v49 = vmul.f32 %v7572_v27, %v2520_v29  ;;  %6471 = vmatpush1.bf16.msra.mxu0 %v3543_v42  ;;  %5641 = vmatprep.mubr.bf16.mxu1 %v8739_v41  ;;  %v9890_v41 = vmov 0.0   ;;  %v8759_v42 = vld [vmem:[%s12631_s2 + $0x698] ss:$60 sps:$4 sm:$0xff]  }
 0x207   :  { %v3165_v28 = vpop.permute.xlu1 %3164  ;;  %6472 = vmatprep.subr.bf16.mxu0 %v9889_v0 }
 0x208   :  { %v3480_v30 = vpack.c.bf16 %v3298_v43, %v3297_v49  ;;  %v3426_v52 = vmul.f32 %v7829_v46, %v3165_v28  ;;  %v8763_v43 = vld [vmem:[%s12631_s2 + $0x714] ss:$60 sps:$4 sm:$0xff]   ;;  %v8769_v28 = vld [vmem:[%s12631_s2 + $0x78c] ss:$60 sps:$4 sm:$0xff]  }
 0x209   :  { %6374 = vmatmul.mubr.bf16.gmra.mrb[40].mxu0 %v8738_v39  ;;  %v3160_v54 = vpop.permute.xlu0 %3159  ;;  %v8762_v39 = vld [vmem:[%s12631_s2 + $0x6b8] ss:$60 sps:$4 sm:$0xff]  }
 0x20a   :  { %v3425_v45 = vmul.f32 %v7828_v23, %v3160_v54  ;;  %5733 = vmatpush1.bf16.msra.mxu1 %v3480_v30  ;;  %6381 = vmatprep.mubr.bf16.mxu0 %v8742_v36  ;;  %v8765_v36 = vld [vmem:[%s12631_s2 + $0x710] ss:$60 sps:$4 sm:$0xff]  }
 0x20b   :  { %v2535_v2 = vpop.permute.xlu1 %2534  ;;  %5734 = vmatprep.subr.bf16.mxu1 %v9889_v0  ;;  %v8772_v54 = vld [vmem:[%s12631_s2 + $0x7ac] ss:$60 sps:$4 sm:$0xff]  }
 0x20c   :  { %v3544_v3 = vpack.c.bf16 %v3426_v52, %v3425_v45  ;;  %v3300_v62 = vmul.f32 %v7577_v47, %v2535_v2  ;;  %v8768_v47 = vld [vmem:[%s12631_s2 + $0x730] ss:$60 sps:$4 sm:$0xff]   ;;  %v8771_v45 = vld [vmem:[%s12631_s2 + $0x788] ss:$60 sps:$4 sm:$0xff]  }
 0x20d   :  { %5642 = vmatmul.mubr.bf16.gmra.mrb[44].mxu1 %v8741_v55  ;;  %v2530_v8 = vpop.permute.xlu0 %2529 }
 0x20e   :  { %v3299_v51 = vmul.f32 %v7576_v59, %v2530_v8  ;;  %6473 = vmatpush1.bf16.msra.mxu0 %v3544_v3  ;;  %5649 = vmatprep.mubr.bf16.mxu1 %v8745_v63  ;;  %v8775_v59 = vld [vmem:[%s12631_s2 + $0x804] ss:$60 sps:$4 sm:$0xff]  }
 0x20f   :  { %v3175_v40 = vpop.permute.xlu1 %3174  ;;  %6474 = vmatprep.subr.bf16.mxu0 %v9889_v0  ;;  %v8774_v3 = vld [vmem:[%s12631_s2 + $0x7a8] ss:$60 sps:$4 sm:$0xff]   ;;  %v8777_v8 = vld [vmem:[%s12631_s2 + $0x800] ss:$60 sps:$4 sm:$0xff]  }
 0x210   :  { %v3481_v57 = vpack.c.bf16 %v3300_v62, %v3299_v51  ;;  %v3428_v44 = vmul.f32 %v7833_v4, %v3175_v40  ;;  %v8778_v62 = vld [vmem:[%s12631_s2 + $0x824] ss:$60 sps:$4 sm:$0xff]   ;;  %v8784_v40 = vld [vmem:[%s12631_s2 + $0x89c] ss:$60 sps:$4 sm:$0xff]  }
 0x211   :  { %6382 = vmatmul.mubr.bf16.gmra.mrb[44].mxu0 %v8744_v37  ;;  %v3170_v1 = vpop.permute.xlu0 %3169 }
 0x212   :  { %v3427_v14 = vmul.f32 %v7832_v11, %v3170_v1  ;;  %5735 = vmatpush1.bf16.msra.mxu1 %v3481_v57  ;;  %6389 = vmatprep.mubr.bf16.mxu0 %v8748_v12  ;;  %v8780_v11 = vld [vmem:[%s12631_s2 + $0x820] ss:$60 sps:$4 sm:$0xff]  }
 0x213   :  { %v2545_v20 = vpop.permute.xlu1 %2544  ;;  %5736 = vmatprep.subr.bf16.mxu1 %v9889_v0 }
 0x214   :  { %v3545_v50 = vpack.c.bf16 %v3428_v44, %v3427_v14  ;;  %v3302_v22 = vmul.f32 %v7581_v60, %v2545_v20  ;;  %v7893_v44 = vld [vmem:[%s12630_s1 + $0x180] sm:$0xff]   ;;  %v8783_v60 = vld [vmem:[%s12631_s2 + $0x878] ss:$60 sps:$4 sm:$0xff]  }
 0x215   :  { %5650 = vmatmul.mubr.bf16.gmra.mrb[48].mxu1 %v8747_v5  ;;  %v2540_v16 = vpop.permute.xlu0 %2539  ;;  %v8789_v5 = vld [vmem:[%s12631_s2 + $0x14] ss:$60 sps:$4 sm:$0xff]   ;;  %v7585_v14 = vunpack.c.h.bf16 %v7893_v44 }
 0x216   :  { %v3301_v6 = vmul.f32 %v7580_v17, %v2540_v16  ;;  %6475 = vmatpush1.bf16.msra.mxu0 %v3545_v50  ;;  %5657 = vmatprep.mubr.bf16.mxu1 %v8751_v18  ;;  %v7584_v17 = vunpack.c.l.bf16 %v7893_v44  ;;  %v7894_v18 = vld [vmem:[%s12630_s1 + $0x188] sm:$0xff]   ;;  %v8786_v20 = vld [vmem:[%s12631_s2 + $0x898] ss:$60 sps:$4 sm:$0xff]  }
 0x217   :  { %v3185_v7 = vpop.permute.xlu1 %3184  ;;  %6476 = vmatprep.subr.bf16.mxu0 %v9889_v0  ;;  %v8798_v44 = vld [vmem:[%s12631_s2 + $0xa8] ss:$60 sps:$4 sm:$0xff]  }
 0x218   :  { %v3482_v26 = vpack.c.bf16 %v3302_v22, %v3301_v6  ;;  %v3430_v56 = vmul.f32 %v7837_v24, %v3185_v7  ;;  %v8792_v22 = vld [vmem:[%s12631_s2 + $0x34] ss:$60 sps:$4 sm:$0xff]   ;;  %v7589_v6 = vunpack.c.h.bf16 %v7894_v18 }
 0x219   :  { %6390 = vmatmul.mubr.bf16.gmra.mrb[48].mxu0 %v8750_v35  ;;  %v3180_v61 = vpop.permute.xlu0 %3179  ;;  %v8787_v7 = vld [vmem:[%s12631_s2 + $0x10] ss:$60 sps:$4 sm:$0xff]  }
 0x21a   :  { %v3429_v32 = vmul.f32 %v7836_v25, %v3180_v61  ;;  %5737 = vmatpush1.bf16.msra.mxu1 %v3482_v26  ;;  %6397 = vmatprep.mubr.bf16.mxu0 %v8754_v10  ;;  %v7588_v25 = vunpack.c.l.bf16 %v7894_v18  ;;  %v7895_v10 = vld [vmem:[%s12630_s1 + $0x190] sm:$0xff]  }
 0x21b   :  { %v11831_v15 = vpop.permute.xlu1 %2554  ;;  %5891 = vmatprep.subr.bf16.mxu1 %v9889_v0  ;;  %v7593_v61 = vunpack.c.h.bf16 %v7895_v10 }
 0x21c   :  { %v3546_v38 = vpack.c.bf16 %v3430_v56, %v3429_v32  ;;  %v3304_v16 = vmul.f32 %v7585_v14, %v11831_v15  ;;  %v8793_v56 = vld [vmem:[%s12631_s2 + $0x8c] ss:$60 sps:$4 sm:$0xff]  }
 0x21d   :  { %5658 = vmatmul.mubr.bf16.gmra.mrb[52].mxu1 %v8753_v21  ;;  %v11834_v9 = vpop.permute.xlu0 %2549 }
 0x21e   :  { %6477 = vmatpush1.bf16.msra.mxu0 %v3546_v38  ;;  %5665 = vmatprep.mubr.bf16.mxu1 %v8757_v34  ;;  %v3303_v35 = vmul.f32 %v7584_v17, %v11834_v9  ;;  %v7592_v38 = vunpack.c.l.bf16 %v7895_v10  ;;  %v7896_v9 = vld [vmem:[%s12630_s1 + $0x198] sm:$0xff]  }
 0x21f   :  { %v11842_v27 = vpop.permute.xlu1 %2564  ;;  %7980 = vmatprep.subr.bf16.mxu0 %v9890_v41 }
 0x220   :  { %v3483_v32 = vpack.c.bf16 %v3304_v16, %v3303_v35  ;;  %v3306_v34 = vmul.f32 %v7589_v6, %v11842_v27  ;;  %v8796_v27 = vld [vmem:[%s12631_s2 + $0xac] ss:$60 sps:$4 sm:$0xff]   ;;  %v7899_v16 = vld [vmem:[%s12630_s1 + $0x1b0] sm:$0xff]   ;;  %v8801_v6 = vld [vmem:[%s12631_s2 + $0x100] ss:$60 sps:$4 sm:$0xff]  }
 0x221   :  { %6398 = vmatmul.mubr.bf16.gmra.mrb[52].mxu0 %v8756_v19  ;;  %v11845_v31 = vpop.permute.xlu0 %2559  ;;  %v8790_v19 = vld [vmem:[%s12631_s2 + $0x30] ss:$60 sps:$4 sm:$0xff]   ;;  %v7609_v10 = vunpack.c.h.bf16 %v7899_v16 }
 0x222   :  { %6405 = vmatprep.mubr.bf16.mxu0 %v8760_v33  ;;  %v3305_v15 = vmul.f32 %v7588_v25, %v11845_v31 }
 0x223   :  { %v11853_v46 = vpop.permute.xlu1 %2574 }
 0x225   :  { %5666 = vmatmul.mubr.bf16.gmra.mrb[56].mxu1 %v8759_v42  ;;  %v11855_v29 = vpop.permute.xlu0 %2569  ;;  %v7597_v42 = vunpack.c.h.bf16 %v7896_v9 }
 0x226   :  { %5673 = vmatprep.mubr.bf16.mxu1 %v8763_v43  ;;  %v3484_v43 = vpack.c.bf16 %v3306_v34, %v3305_v15  ;;  %v7608_v15 = vunpack.c.l.bf16 %v7899_v16  ;;  %v8817_v16 = vld [vmem:[%s12631_s2 + $0x26c] ss:$60 sps:$4 sm:$0xff]  }
 0x227   :  { %v11863_v49 = vpop.permute.xlu1 %2584 }
 0x229   :  { %6406 = vmatmul.mubr.bf16.gmra.mrb[56].mxu0 %v8762_v39  ;;  %v11865_v23 = vpop.permute.xlu0 %2579  ;;  %v3308_v39 = vmul.f32 %v7593_v61, %v11853_v46  ;;  %v7957_v46 = vld [vmem:[%s12630_s1 + $0x380] sm:$0xff]  }
 0x22a   :  { %6413 = vmatprep.mubr.bf16.mxu0 %v8766_v48  ;;  %v3307_v48 = vmul.f32 %v7592_v38, %v11855_v29  ;;  %v8799_v29 = vld [vmem:[%s12631_s2 + $0x104] ss:$60 sps:$4 sm:$0xff]   ;;  %v7840_v14 = vunpack.c.l.bf16 %v7957_v46  ;;  %v7900_v38 = vld [vmem:[%s12630_s1 + $0x1b8] sm:$0xff]  }
 0x22b   :  { %v11873_v30 = vpop.permute.xlu1 %2594 }
 0x22d   :  { %5674 = vmatmul.mubr.bf16.gmra.mrb[60].mxu1 %v8765_v36  ;;  %v11875_v52 = vpop.permute.xlu0 %2589  ;;  %v7596_v36 = vunpack.c.l.bf16 %v7896_v9 }
 0x22e   :  { %5681 = vmatprep.mubr.bf16.mxu1 %v8769_v28  ;;  %v7897_v28 = vld [vmem:[%s12630_s1 + $0x1a0] sm:$0xff]  }
 0x22f   :  { %v11883_v55 = vpop.permute.xlu1 %2604 }
 0x231   :  { %6414 = vmatmul.mubr.bf16.gmra.mrb[60].mxu0 %v8768_v47  ;;  %v11885_v58 = vpop.permute.xlu0 %2599  ;;  %v8795_v47 = vld [vmem:[%s12631_s2 + $0x88] ss:$60 sps:$4 sm:$0xff]  }
 0x232   :  { %6421 = vmatprep.mubr.bf16.mxu0 %v8772_v54 }
 0x233   :  { %v11893_v63 = vpop.permute.xlu1 %2614 }
 0x235   :  { %5682 = vmatmul.mubr.bf16.gmra.mrb[64].mxu1 %v8771_v45  ;;  %v11895_v2 = vpop.permute.xlu0 %2609  ;;  %v7601_v45 = vunpack.c.h.bf16 %v7897_v28 }
 0x236   :  { %5689 = vmatprep.mubr.bf16.mxu1 %v8775_v59 }
 0x237   :  { %v11903_v4 = vpop.permute.xlu1 %2624  ;;  %v3312_v18 = vmul.f32 %v7601_v45, %v11873_v30  ;;  %v7958_v30 = vld [vmem:[%s12630_s1 + $0x388] sm:$0xff]   ;;  %v8807_v45 = vld [vmem:[%s12631_s2 + $0x178] ss:$60 sps:$4 sm:$0xff]  }
 0x239   :  { %6422 = vmatmul.mubr.bf16.gmra.mrb[64].mxu0 %v8774_v3  ;;  %v3485_v3 = vpack.c.bf16 %v3308_v39, %v3307_v48  ;;  %v7844_v39 = vunpack.c.l.bf16 %v7958_v30 }
 0x23a   :  { %v11908_v37 = vpop.permute.xlu0 %2619  ;;  %6429 = vmatprep.mubr.bf16.mxu0 %v8778_v62  ;;  %v3310_v62 = vmul.f32 %v7597_v42, %v11863_v49  ;;  %v8802_v49 = vld [vmem:[%s12631_s2 + $0x124] ss:$60 sps:$4 sm:$0xff]  }
 0x23b   :  { %v11913_v51 = vpop.permute.xlu1 %2634 }
 0x23d   :  { %5690 = vmatmul.mubr.bf16.gmra.mrb[68].mxu1 %v8777_v8  ;;  %v3309_v8 = vmul.f32 %v7596_v36, %v11865_v23  ;;  %v3316_v36 = vmul.f32 %v7609_v10, %v11893_v63  ;;  %v8811_v63 = vld [vmem:[%s12631_s2 + $0x1f4] ss:$60 sps:$4 sm:$0xff]   ;;  %v8820_v10 = vld [vmem:[%s12631_s2 + $0x28c] ss:$60 sps:$4 sm:$0xff]  }
 0x23e   :  { %v11918_v12 = vpop.permute.xlu0 %2629  ;;  %5697 = vmatprep.mubr.bf16.mxu1 %v8781_v53  ;;  %v7600_v53 = vunpack.c.l.bf16 %v7897_v28  ;;  %v3315_v28 = vmul.f32 %v7608_v15, %v11895_v2  ;;  %v8819_v15 = vld [vmem:[%s12631_s2 + $0x268] ss:$60 sps:$4 sm:$0xff]  }
 0x23f   :  { %v11923_v57 = vpop.permute.xlu1 %2644  ;;  %v3486_v17 = vpack.c.bf16 %v3310_v62, %v3309_v8 }
 0x240   :  { %v3489_v8 = vpack.c.bf16 %v3316_v36, %v3315_v28  ;;  %v7907_v28 = vld [vmem:[%s12630_s1 + $0x1f0] sm:$0xff]  }
 0x241   :  { %6430 = vmatmul.mubr.bf16.gmra.mrb[68].mxu0 %v8780_v11  ;;  %v7898_v11 = vld [vmem:[%s12630_s1 + $0x1a8] sm:$0xff]  }
 0x242   :  { %v11931_v1 = vpop.permute.xlu0 %2639  ;;  %6437 = vmatprep.mubr.bf16.mxu0 %v8784_v40  ;;  %v7841_v40 = vunpack.c.h.bf16 %v7957_v46  ;;  %v7605_v23 = vunpack.c.h.bf16 %v7898_v11  ;;  %v7901_v46 = vld [vmem:[%s12630_s1 + $0x1c0] sm:$0xff]  }
 0x243   :  { %v11936_v13 = vpop.permute.xlu1 %2654  ;;  %v7617_v2 = vunpack.c.h.bf16 %v7901_v46 }
 0x245   :  { %5698 = vmatmul.mubr.bf16.gmra.mrb[72].mxu1 %v8783_v60 }
 0x246   :  { %v11944_v50 = vpop.permute.xlu0 %2649  ;;  %5738 = vmatprep.mubr.bf16.mxu1 %v8789_v5 }
 0x247   :  { %v11949_v24 = vpop.permute.xlu1 %2664 }
 0x249   :  { %6438 = vmatmul.mubr.bf16.gmra.mrb[72].mxu0 %v8786_v20  ;;  %v3311_v20 = vmul.f32 %v7600_v53, %v11875_v52  ;;  %v8805_v52 = vld [vmem:[%s12631_s2 + $0x17c] ss:$60 sps:$4 sm:$0xff]  }
 0x24a   :  { %v11959_v26 = vpop.permute.xlu0 %2659  ;;  %6478 = vmatprep.mubr.bf16.mxu0 %v8792_v22  ;;  %v7604_v22 = vunpack.c.l.bf16 %v7898_v11 }
 0x24b   :  { %v11964_v21 = vpop.permute.xlu1 %2674  ;;  %v3487_v61 = vpack.c.bf16 %v3312_v18, %v3311_v20  ;;  %v7903_v20 = vld [vmem:[%s12630_s1 + $0x1d0] sm:$0xff]  }
 0x24c   :  { %v3313_v34 = vmul.f32 %v7604_v22, %v11885_v58  ;;  %v7613_v58 = vunpack.c.h.bf16 %v7900_v38  ;;  %v8813_v22 = vld [vmem:[%s12631_s2 + $0x1f0] ss:$60 sps:$4 sm:$0xff]  }
 0x24d   :  { %5739 = vmatmul.mubr.bf16.vlgmr.msra.gmra.mrb[0].mxu1 %v8787_v7 }
 0x24e   :  { %5892 = vmatpush1.bf16.msra.mxu1 %v3483_v32  ;;  %v11974_v33 = vpop.permute.xlu0 %2669  ;;  %5746 = vmatprep.mubr.bf16.mxu1 %v8793_v56  ;;  %v3314_v32 = vmul.f32 %v7605_v23, %v11883_v55  ;;  %v8808_v55 = vld [vmem:[%s12631_s2 + $0x19c] ss:$60 sps:$4 sm:$0xff]   ;;  %v3318_v53 = vmul.f32 %v7613_v58, %v11903_v4  ;;  %v8822_v58 = vld [vmem:[%s12631_s2 + $0x288] ss:$60 sps:$4 sm:$0xff]  }
 0x24f   :  { %5893 = vmatprep.subr.bf16.mxu1 %v9889_v0  ;;  %v11980_v31 = vpop.permute.xlu1 %2684  ;;  %v8810_v23 = vld [vmem:[%s12631_s2 + $0x198] ss:$60 sps:$4 sm:$0xff]  }
 0x250   :  { %v3488_v48 = vpack.c.bf16 %v3314_v32, %v3313_v34  ;;  %v7905_v34 = vld [vmem:[%s12630_s1 + $0x1e0] sm:$0xff]  }
 0x251   :  { %6479 = vmatmul.mubr.bf16.vlgmr.msra.gmra.mrb[0].mxu0 %v8790_v19  ;;  %v7845_v19 = vunpack.c.h.bf16 %v7958_v30  ;;  %v7904_v30 = vld [vmem:[%s12630_s1 + $0x1d8] sm:$0xff]  }
 0x252   :  { %5894 = vmatpush1.bf16.msra.mxu1 %v3484_v43  ;;  %v11990_v54 = vpop.permute.xlu0 %2679  ;;  %6486 = vmatprep.mubr.bf16.mxu0 %v8796_v27  ;;  %v8804_v27 = vld [vmem:[%s12631_s2 + $0x120] ss:$60 sps:$4 sm:$0xff]   ;;  %v7628_v32 = vunpack.c.l.bf16 %v7904_v30 }
 0x253   :  { %5895 = vmatprep.subr.bf16.mxu1 %v9889_v0  ;;  %v11999_v59 = vpop.permute.xlu1 %2694 }
 0x255   :  { %5747 = vmatmul.mubr.bf16.gmra.mrb[4].mxu1 %v8795_v47  ;;  %v7612_v47 = vunpack.c.l.bf16 %v7900_v38  ;;  %v8823_v38 = vld [vmem:[%s12631_s2 + $0x2e4] ss:$60 sps:$4 sm:$0xff]  }
 0x256   :  { %5896 = vmatpush1.bf16.msra.mxu1 %v3485_v3  ;;  %v12009_v60 = vpop.permute.xlu0 %2689  ;;  %5754 = vmatprep.mubr.bf16.mxu1 %v8799_v29 }
 0x257   :  { %5897 = vmatprep.subr.bf16.mxu1 %v9889_v0  ;;  %v3195_v5 = vpop.permute.xlu1 %3194  ;;  %v3317_v11 = vmul.f32 %v7612_v47, %v11908_v37  ;;  %v8825_v47 = vld [vmem:[%s12631_s2 + $0x2e0] ss:$60 sps:$4 sm:$0xff]  }
 0x258   :  { %v3432_v35 = vmul.f32 %v7841_v40, %v3195_v5  ;;  %v7616_v40 = vunpack.c.l.bf16 %v7901_v46  ;;  %v8814_v5 = vld [vmem:[%s12631_s2 + $0x214] ss:$60 sps:$4 sm:$0xff]   ;;  %v8829_v46 = vld [vmem:[%s12631_s2 + $0x35c] ss:$60 sps:$4 sm:$0xff]  }
 0x259   :  { %6487 = vmatmul.mubr.bf16.gmra.mrb[4].mxu0 %v8798_v44  ;;  %v7902_v44 = vld [vmem:[%s12630_s1 + $0x1c8] sm:$0xff]   ;;  %v3490_v37 = vpack.c.bf16 %v3318_v53, %v3317_v11 }
 0x25a   :  { %5898 = vmatpush1.bf16.msra.mxu1 %v3486_v17  ;;  %v3190_v25 = vpop.permute.xlu0 %3189  ;;  %6494 = vmatprep.mubr.bf16.mxu0 %v8802_v49  ;;  %v7621_v4 = vunpack.c.h.bf16 %v7902_v44  ;;  %v3319_v17 = vmul.f32 %v7616_v40, %v11918_v12  ;;  %v7620_v18 = vunpack.c.l.bf16 %v7902_v44  ;;  %v8831_v40 = vld [vmem:[%s12631_s2 + $0x358] ss:$60 sps:$4 sm:$0xff]  }
 0x25b   :  { %v3431_v7 = vmul.f32 %v7840_v14, %v3190_v25  ;;  %5899 = vmatprep.subr.bf16.mxu1 %v9889_v0  ;;  %v12030_v56 = vpop.permute.xlu1 %2704  ;;  %v3320_v14 = vmul.f32 %v7617_v2, %v11913_v51  ;;  %v7624_v25 = vunpack.c.l.bf16 %v7903_v20  ;;  %v8828_v2 = vld [vmem:[%s12631_s2 + $0x300] ss:$60 sps:$4 sm:$0xff]   ;;  %v8835_v44 = vld [vmem:[%s12631_s2 + $0x3d4] ss:$60 sps:$4 sm:$0xff]  }
 0x25c   :  { %v3322_v12 = vmul.f32 %v7621_v4, %v11923_v57 }
 0x25d   :  { %v3547_v9 = vpack.c.bf16 %v3432_v35, %v3431_v7  ;;  %5755 = vmatmul.mubr.bf16.gmra.mrb[8].mxu1 %v8801_v6  ;;  %v7625_v35 = vunpack.c.h.bf16 %v7903_v20  ;;  %v3491_v51 = vpack.c.bf16 %v3320_v14, %v3319_v17  ;;  %v3321_v6 = vmul.f32 %v7620_v18, %v11931_v1  ;;  %v8843_v14 = vld [vmem:[%s12631_s2 + $0x448] ss:$60 sps:$4 sm:$0xff]  }
 0x25e   :  { %5900 = vmatpush1.bf16.msra.mxu1 %v3487_v61  ;;  %v12040_v42 = vpop.permute.xlu0 %2699  ;;  %5762 = vmatprep.mubr.bf16.mxu1 %v8805_v52  ;;  %v8816_v52 = vld [vmem:[%s12631_s2 + $0x210] ss:$60 sps:$4 sm:$0xff]   ;;  %v7629_v7 = vunpack.c.h.bf16 %v7904_v30  ;;  %v3323_v61 = vmul.f32 %v7624_v25, %v11944_v50  ;;  %v8847_v17 = vld [vmem:[%s12631_s2 + $0x4c4] ss:$60 sps:$4 sm:$0xff]   ;;  %v8858_v25 = vld [vmem:[%s12631_s2 + $0x558] ss:$60 sps:$4 sm:$0xff]  }
 0x25f   :  { %7981 = vmatpush3.bf16.msra.mxu0 %v3547_v9  ;;  %5901 = vmatprep.subr.bf16.mxu1 %v9889_v0  ;;  %v3205_v43 = vpop.permute.xlu1 %3204  ;;  %v3492_v57 = vpack.c.bf16 %v3322_v12, %v3321_v6  ;;  %v3324_v1 = vmul.f32 %v7625_v35, %v11936_v13  ;;  %v7633_v9 = vunpack.c.h.bf16 %v7905_v34  ;;  %v8846_v18 = vld [vmem:[%s12631_s2 + $0x468] ss:$60 sps:$4 sm:$0xff]   ;;  %v8852_v35 = vld [vmem:[%s12631_s2 + $0x4e0] ss:$60 sps:$4 sm:$0xff]   ;;  %v8855_v12 = vld [vmem:[%s12631_s2 + $0x538] ss:$60 sps:$4 sm:$0xff]  }
 0x260   :  { %7982 = vmatprep.subr.bf16.mxu0 %v9890_v41  ;;  %v3434_v29 = vmul.f32 %v7845_v19, %v3205_v43  ;;  %v3326_v50 = vmul.f32 %v7629_v7, %v11949_v24  ;;  %v3325_v19 = vmul.f32 %v7628_v32, %v11959_v26  ;;  %v8826_v43 = vld [vmem:[%s12631_s2 + $0x304] ss:$60 sps:$4 sm:$0xff]   ;;  %v8859_v6 = vld [vmem:[%s12631_s2 + $0x5b4] ss:$60 sps:$4 sm:$0xff]  }
 0x261   :  { %6495 = vmatmul.mubr.bf16.gmra.mrb[8].mxu0 %v8804_v27  ;;  %v3493_v13 = vpack.c.bf16 %v3324_v1, %v3323_v61  ;;  %v7632_v27 = vunpack.c.l.bf16 %v7905_v34  ;;  %v3328_v26 = vmul.f32 %v7633_v9, %v11964_v21  ;;  %v8850_v20 = vld [vmem:[%s12631_s2 + $0x4e4] ss:$60 sps:$4 sm:$0xff]   ;;  %v8862_v30 = vld [vmem:[%s12631_s2 + $0x5d4] ss:$60 sps:$4 sm:$0xff]  }
 0x262   :  { %5902 = vmatpush1.bf16.msra.mxu1 %v3488_v48  ;;  %v3200_v3 = vpop.permute.xlu0 %3199  ;;  %6502 = vmatprep.mubr.bf16.mxu0 %v8808_v55  ;;  %v7906_v55 = vld [vmem:[%s12630_s1 + $0x1e8] sm:$0xff]   ;;  %v3494_v24 = vpack.c.bf16 %v3326_v50, %v3325_v19  ;;  %v8871_v61 = vld [vmem:[%s12631_s2 + $0x6a4] ss:$60 sps:$4 sm:$0xff]   ;;  %v8879_v50 = vld [vmem:[%s12631_s2 + $0x718] ss:$60 sps:$4 sm:$0xff]  }
 0x263   :  { %v3433_v62 = vmul.f32 %v7844_v39, %v3200_v3  ;;  %5903 = vmatprep.subr.bf16.mxu1 %v9889_v0  ;;  %v7637_v39 = vunpack.c.h.bf16 %v7906_v55  ;;  %v3327_v48 = vmul.f32 %v7632_v27, %v11974_v33  ;;  %v7636_v36 = vunpack.c.l.bf16 %v7906_v55  ;;  %v8864_v7 = vld [vmem:[%s12631_s2 + $0x5d0] ss:$60 sps:$4 sm:$0xff]   ;;  %v8867_v1 = vld [vmem:[%s12631_s2 + $0x628] ss:$60 sps:$4 sm:$0xff]   ;;  %v8876_v9 = vld [vmem:[%s12631_s2 + $0x6c0] ss:$60 sps:$4 sm:$0xff]  }
 0x264   :  { %v7640_v3 = vunpack.c.l.bf16 %v7907_v28  ;;  %v8870_v32 = vld [vmem:[%s12631_s2 + $0x648] ss:$60 sps:$4 sm:$0xff]   ;;  %v8883_v19 = vld [vmem:[%s12631_s2 + $0x794] ss:$60 sps:$4 sm:$0xff]  }
 0x265   :  { %v3548_v49 = vpack.c.bf16 %v3434_v29, %v3433_v62  ;;  %5763 = vmatmul.mubr.bf16.gmra.mrb[12].mxu1 %v8807_v45  ;;  %v7641_v29 = vunpack.c.h.bf16 %v7907_v28  ;;  %v3495_v21 = vpack.c.bf16 %v3328_v26, %v3327_v48  ;;  %v3330_v33 = vmul.f32 %v7637_v39, %v11980_v31  ;;  %v8832_v62 = vld [vmem:[%s12631_s2 + $0x37c] ss:$60 sps:$4 sm:$0xff]   ;;  %v8874_v34 = vld [vmem:[%s12631_s2 + $0x6c4] ss:$60 sps:$4 sm:$0xff]   ;;  %v8886_v55 = vld [vmem:[%s12631_s2 + $0x7b4] ss:$60 sps:$4 sm:$0xff]  }
 0x266   :  { %5904 = vmatpush1.bf16.msra.mxu1 %v3489_v8  ;;  %5770 = vmatprep.mubr.bf16.mxu1 %v8811_v63  ;;  %v3329_v45 = vmul.f32 %v7636_v36, %v11990_v54  ;;  %v7908_v63 = vld [vmem:[%s12630_s1 + $0x1f8] sm:$0xff]   ;;  %v3331_v53 = vmul.f32 %v7640_v3, %v12009_v60  ;;  %v8888_v39 = vld [vmem:[%s12631_s2 + $0x7b0] ss:$60 sps:$4 sm:$0xff]   ;;  %v8891_v26 = vld [vmem:[%s12631_s2 + $0x808] ss:$60 sps:$4 sm:$0xff]  }
 0x267   :  { %7983 = vmatpush3.bf16.msra.mxu0 %v3548_v49  ;;  %5905 = vmatprep.subr.bf16.mxu1 %v9889_v0  ;;  %v7645_v8 = vunpack.c.h.bf16 %v7908_v63  ;;  %v3332_v54 = vmul.f32 %v7641_v29, %v11999_v59  ;;  %v7644_v11 = vunpack.c.l.bf16 %v7908_v63  ;;  %v8834_v60 = vld [vmem:[%s12631_s2 + $0x378] ss:$60 sps:$4 sm:$0xff]   ;;  %v8895_v48 = vld [vmem:[%s12631_s2 + $0x884] ss:$60 sps:$4 sm:$0xff]   ;;  %v8907_v3 = vld [vmem:[%s12631_s2 + $0x90] ss:$60 sps:$4 sm:$0xff]  }
 0x268   :  { %v3496_v31 = vpack.c.bf16 %v3330_v33, %v3329_v45  ;;  %v8882_v27 = vld [vmem:[%s12631_s2 + $0x738] ss:$60 sps:$4 sm:$0xff]   ;;  %v8894_v36 = vld [vmem:[%s12631_s2 + $0x828] ss:$60 sps:$4 sm:$0xff]   ;;  %v8900_v29 = vld [vmem:[%s12631_s2 + $0x8a0] ss:$60 sps:$4 sm:$0xff]  }
 0x269   :  { %6503 = vmatmul.mubr.bf16.gmra.mrb[12].mxu0 %v8810_v23  ;;  %v3497_v49 = vpack.c.bf16 %v3332_v54, %v3331_v53  ;;  %v3334_v23 = vmul.f32 %v7645_v8, %v12030_v56  ;;  %v3333_v59 = vmul.f32 %v7644_v11, %v12040_v42  ;;  %v8837_v56 = vld [vmem:[%s12631_s2 + $0x3d0] ss:$60 sps:$4 sm:$0xff]   ;;  %v8898_v28 = vld [vmem:[%s12631_s2 + $0x8a4] ss:$60 sps:$4 sm:$0xff]   ;;  %v8904_v45 = vld [vmem:[%s12631_s2 + $0x38] ss:$60 sps:$4 sm:$0xff]  }
 0x26a   :  { %5906 = vmatpush1.bf16.msra.mxu1 %v3490_v37  ;;  %6510 = vmatprep.mubr.bf16.mxu0 %v8814_v5  ;;  %v8838_v5 = vld [vmem:[%s12631_s2 + $0x3f4] ss:$60 sps:$4 sm:$0xff]   ;;  %v8841_v42 = vld [vmem:[%s12631_s2 + $0x44c] ss:$60 sps:$4 sm:$0xff]   ;;  %v8913_v8 = vld [vmem:[%s12631_s2 + $0x184] ss:$60 sps:$4 sm:$0xff]  }
 0x26b   :  { %5907 = vmatprep.subr.bf16.mxu1 %v9889_v0  ;;  %v3498_v4 = vpack.c.bf16 %v3334_v23, %v3333_v59  ;;  %v8840_v37 = vld [vmem:[%s12631_s2 + $0x3f0] ss:$60 sps:$4 sm:$0xff]   ;;  %v8915_v54 = vld [vmem:[%s12631_s2 + $0x180] ss:$60 sps:$4 sm:$0xff]  }
 0x26c   :  { %v8905_v33 = vld [vmem:[%s12631_s2 + $0x94] ss:$60 sps:$4 sm:$0xff]   ;;  %v8909_v63 = vld [vmem:[%s12631_s2 + $0x10c] ss:$60 sps:$4 sm:$0xff]   ;;  %v8917_v53 = vld [vmem:[%s12631_s2 + $0x1fc] ss:$60 sps:$4 sm:$0xff]  }
 0x26d   :  { %5771 = vmatmul.mubr.bf16.gmra.mrb[16].mxu1 %v8813_v22  ;;  %v8849_v22 = vld [vmem:[%s12631_s2 + $0x4c0] ss:$60 sps:$4 sm:$0xff]   ;;  %v8923_v23 = vld [vmem:[%s12631_s2 + $0x270] ss:$60 sps:$4 sm:$0xff]  }
 0x26e   :  { %5908 = vmatpush1.bf16.msra.mxu1 %v3491_v51  ;;  %5778 = vmatprep.mubr.bf16.mxu1 %v8817_v16  ;;  %v8853_v16 = vld [vmem:[%s12631_s2 + $0x53c] ss:$60 sps:$4 sm:$0xff]   ;;  %v8925_v59 = vld [vmem:[%s12631_s2 + $0x2ec] ss:$60 sps:$4 sm:$0xff]  }
 0x26f   :  { %5909 = vmatprep.subr.bf16.mxu1 %v9889_v0  ;;  %v8856_v51 = vld [vmem:[%s12631_s2 + $0x55c] ss:$60 sps:$4 sm:$0xff]  }
 0x270   :  { %v8916_v11 = vld [vmem:[%s12631_s2 + $0x1a0] ss:$60 sps:$4 sm:$0xff]  }
 0x271   :  { %6511 = vmatmul.mubr.bf16.gmra.mrb[16].mxu0 %v8816_v52  ;;  %v8861_v52 = vld [vmem:[%s12631_s2 + $0x5b0] ss:$60 sps:$4 sm:$0xff]  }
 0x272   :  { %5910 = vmatpush1.bf16.msra.mxu1 %v3492_v57  ;;  %6518 = vmatprep.mubr.bf16.mxu0 %v8820_v10  ;;  %v8865_v10 = vld [vmem:[%s12631_s2 + $0x62c] ss:$60 sps:$4 sm:$0xff]  }
 0x273   :  { %5911 = vmatprep.subr.bf16.mxu1 %v9889_v0  ;;  %v8868_v57 = vld [vmem:[%s12631_s2 + $0x64c] ss:$60 sps:$4 sm:$0xff]  }
 0x275   :  { %5779 = vmatmul.mubr.bf16.gmra.mrb[20].mxu1 %v8819_v15  ;;  %v8873_v15 = vld [vmem:[%s12631_s2 + $0x6a0] ss:$60 sps:$4 sm:$0xff]  }
 0x276   :  { %5912 = vmatpush1.bf16.msra.mxu1 %v3493_v13  ;;  %5786 = vmatprep.mubr.bf16.mxu1 %v8823_v38  ;;  %v8877_v38 = vld [vmem:[%s12631_s2 + $0x71c] ss:$60 sps:$4 sm:$0xff]  }
 0x277   :  { %5913 = vmatprep.subr.bf16.mxu1 %v9889_v0  ;;  %v8880_v13 = vld [vmem:[%s12631_s2 + $0x73c] ss:$60 sps:$4 sm:$0xff]  }
 0x279   :  { %6519 = vmatmul.mubr.bf16.gmra.mrb[20].mxu0 %v8822_v58  ;;  %v8885_v58 = vld [vmem:[%s12631_s2 + $0x790] ss:$60 sps:$4 sm:$0xff]  }
 0x27a   :  { %5914 = vmatpush1.bf16.msra.mxu1 %v3494_v24  ;;  %6526 = vmatprep.mubr.bf16.mxu0 %v8826_v43  ;;  %v8889_v43 = vld [vmem:[%s12631_s2 + $0x80c] ss:$60 sps:$4 sm:$0xff]  }
 0x27b   :  { %5915 = vmatprep.subr.bf16.mxu1 %v9889_v0  ;;  %v8892_v24 = vld [vmem:[%s12631_s2 + $0x82c] ss:$60 sps:$4 sm:$0xff]  }
 0x27d   :  { %5787 = vmatmul.mubr.bf16.gmra.mrb[24].mxu1 %v8825_v47  ;;  %v8897_v47 = vld [vmem:[%s12631_s2 + $0x880] ss:$60 sps:$4 sm:$0xff]  }
 0x27e   :  { %5916 = vmatpush1.bf16.msra.mxu1 %v3495_v21  ;;  %5794 = vmatprep.mubr.bf16.mxu1 %v8829_v46  ;;  %v8903_v46 = vld [vmem:[%s12631_s2 + $0x1c] ss:$60 sps:$4 sm:$0xff]  }
 0x27f   :  { %5917 = vmatprep.subr.bf16.mxu1 %v9889_v0  ;;  %v8901_v21 = vld [vmem:[%s12631_s2 + $0x18] ss:$60 sps:$4 sm:$0xff]  }
 0x281   :  { %6527 = vmatmul.mubr.bf16.gmra.mrb[24].mxu0 %v8828_v2  ;;  %v8908_v2 = vld [vmem:[%s12631_s2 + $0xb0] ss:$60 sps:$4 sm:$0xff]  }
 0x282   :  { %5918 = vmatpush1.bf16.msra.mxu1 %v3496_v31  ;;  %6534 = vmatprep.mubr.bf16.mxu0 %v8832_v62  ;;  %v8911_v62 = vld [vmem:[%s12631_s2 + $0x108] ss:$60 sps:$4 sm:$0xff]  }
 0x283   :  { %5919 = vmatprep.subr.bf16.mxu1 %v9889_v0  ;;  %v8912_v31 = vld [vmem:[%s12631_s2 + $0x128] ss:$60 sps:$4 sm:$0xff]  }
 0x285   :  { %5795 = vmatmul.mubr.bf16.gmra.mrb[28].mxu1 %v8831_v40  ;;  %v8919_v40 = vld [vmem:[%s12631_s2 + $0x1f8] ss:$60 sps:$4 sm:$0xff]  }
 0x286   :  { %5920 = vmatpush1.bf16.msra.mxu1 %v3497_v49  ;;  %5802 = vmatprep.mubr.bf16.mxu1 %v8835_v44  ;;  %v8921_v44 = vld [vmem:[%s12631_s2 + $0x274] ss:$60 sps:$4 sm:$0xff]  }
 0x287   :  { %5921 = vmatprep.subr.bf16.mxu1 %v9889_v0  ;;  %v8844_v0 = vld [vmem:[%s12631_s2 + $0x46c] ss:$60 sps:$4 sm:$0xff]   ;;  %v8920_v49 = vld [vmem:[%s12631_s2 + $0x218] ss:$60 sps:$4 sm:$0xff]  }
 0x289   :  { %6535 = vmatmul.mubr.bf16.gmra.mrb[28].mxu0 %v8834_v60  ;;  %v8924_v60 = vld [vmem:[%s12631_s2 + $0x290] ss:$60 sps:$4 sm:$0xff]  }
 0x28a   :  { %5922 = vmatpush1.bf16.msra.mxu1 %v3498_v4  ;;  %6542 = vmatprep.mubr.bf16.mxu0 %v8838_v5  ;;  %v8927_v5 = vld [vmem:[%s12631_s2 + $0x2e8] ss:$60 sps:$4 sm:$0xff]  }
 0x28b   :  { %v8929_v4 = vld [vmem:[%s12631_s2 + $0x364] ss:$60 sps:$4 sm:$0xff]  }
 0x28d   :  { %5803 = vmatmul.mubr.bf16.gmra.mrb[32].mxu1 %v8837_v56  ;;  %v8928_v56 = vld [vmem:[%s12631_s2 + $0x308] ss:$60 sps:$4 sm:$0xff]  }
 0x28e   :  { %5810 = vmatprep.mubr.bf16.mxu1 %v8841_v42  ;;  %v8931_v42 = vld [vmem:[%s12631_s2 + $0x360] ss:$60 sps:$4 sm:$0xff]  }
 0x291   :  { %6543 = vmatmul.mubr.bf16.gmra.mrb[32].mxu0 %v8840_v37  ;;  %v8933_v37 = vld [vmem:[%s12631_s2 + $0x3dc] ss:$60 sps:$4 sm:$0xff]  }
 0x292   :  { %6550 = vmatprep.mubr.bf16.mxu0 %v8844_v0  ;;  %v8932_v0 = vld [vmem:[%s12631_s2 + $0x380] ss:$60 sps:$4 sm:$0xff]  }
 0x295   :  { %5811 = vmatmul.mubr.bf16.gmra.mrb[36].mxu1 %v8843_v14  ;;  %v8935_v14 = vld [vmem:[%s12631_s2 + $0x3d8] ss:$60 sps:$4 sm:$0xff]  }
 0x296   :  { %5818 = vmatprep.mubr.bf16.mxu1 %v8847_v17  ;;  %v8937_v17 = vld [vmem:[%s12631_s2 + $0x454] ss:$60 sps:$4 sm:$0xff]  }
 0x299   :  { %6551 = vmatmul.mubr.bf16.gmra.mrb[36].mxu0 %v8846_v18  ;;  %v8936_v18 = vld [vmem:[%s12631_s2 + $0x3f8] ss:$60 sps:$4 sm:$0xff]  }
 0x29a   :  { %6558 = vmatprep.mubr.bf16.mxu0 %v8850_v20  ;;  %v8939_v20 = vld [vmem:[%s12631_s2 + $0x450] ss:$60 sps:$4 sm:$0xff]  }
 0x29d   :  { %5819 = vmatmul.mubr.bf16.gmra.mrb[40].mxu1 %v8849_v22  ;;  %v8941_v22 = vld [vmem:[%s12631_s2 + $0x4cc] ss:$60 sps:$4 sm:$0xff]  }
 0x29e   :  { %5826 = vmatprep.mubr.bf16.mxu1 %v8853_v16  ;;  %v8940_v16 = vld [vmem:[%s12631_s2 + $0x470] ss:$60 sps:$4 sm:$0xff]  }
 0x2a1   :  { %6559 = vmatmul.mubr.bf16.gmra.mrb[40].mxu0 %v8852_v35  ;;  %v8943_v35 = vld [vmem:[%s12631_s2 + $0x4c8] ss:$60 sps:$4 sm:$0xff]  }
 0x2a2   :  { %6566 = vmatprep.mubr.bf16.mxu0 %v8856_v51  ;;  %v8945_v51 = vld [vmem:[%s12631_s2 + $0x544] ss:$60 sps:$4 sm:$0xff]  }
 0x2a5   :  { %5827 = vmatmul.mubr.bf16.gmra.mrb[44].mxu1 %v8855_v12  ;;  %v8944_v12 = vld [vmem:[%s12631_s2 + $0x4e8] ss:$60 sps:$4 sm:$0xff]  }
 0x2a6   :  { %5834 = vmatprep.mubr.bf16.mxu1 %v8859_v6  ;;  %v8947_v6 = vld [vmem:[%s12631_s2 + $0x540] ss:$60 sps:$4 sm:$0xff]  }
 0x2a9   :  { %6567 = vmatmul.mubr.bf16.gmra.mrb[44].mxu0 %v8858_v25  ;;  %v8949_v25 = vld [vmem:[%s12631_s2 + $0x5bc] ss:$60 sps:$4 sm:$0xff]  }
 0x2aa   :  { %6574 = vmatprep.mubr.bf16.mxu0 %v8862_v30  ;;  %v8948_v30 = vld [vmem:[%s12631_s2 + $0x560] ss:$60 sps:$4 sm:$0xff]  }
 0x2ad   :  { %5835 = vmatmul.mubr.bf16.gmra.mrb[48].mxu1 %v8861_v52  ;;  %v8951_v52 = vld [vmem:[%s12631_s2 + $0x5b8] ss:$60 sps:$4 sm:$0xff]  }
 0x2ae   :  { %5842 = vmatprep.mubr.bf16.mxu1 %v8865_v10  ;;  %v8953_v10 = vld [vmem:[%s12631_s2 + $0x634] ss:$60 sps:$4 sm:$0xff]  }
 0x2b1   :  { %6575 = vmatmul.mubr.bf16.gmra.mrb[48].mxu0 %v8864_v7  ;;  %v8952_v7 = vld [vmem:[%s12631_s2 + $0x5d8] ss:$60 sps:$4 sm:$0xff]  }
 0x2b2   :  { %6582 = vmatprep.mubr.bf16.mxu0 %v8868_v57  ;;  %v8955_v57 = vld [vmem:[%s12631_s2 + $0x630] ss:$60 sps:$4 sm:$0xff]  }
 0x2b5   :  { %5843 = vmatmul.mubr.bf16.gmra.mrb[52].mxu1 %v8867_v1  ;;  %v8957_v1 = vld [vmem:[%s12631_s2 + $0x6ac] ss:$60 sps:$4 sm:$0xff]  }
 0x2b6   :  { %5850 = vmatprep.mubr.bf16.mxu1 %v8871_v61  ;;  %v8956_v61 = vld [vmem:[%s12631_s2 + $0x650] ss:$60 sps:$4 sm:$0xff]  }
 0x2b9   :  { %6583 = vmatmul.mubr.bf16.gmra.mrb[52].mxu0 %v8870_v32  ;;  %v8959_v32 = vld [vmem:[%s12631_s2 + $0x6a8] ss:$60 sps:$4 sm:$0xff]  }
 0x2ba   :  { %6590 = vmatprep.mubr.bf16.mxu0 %v8874_v34  ;;  %v8961_v34 = vld [vmem:[%s12631_s2 + $0x724] ss:$60 sps:$4 sm:$0xff]  }
 0x2bd   :  { %5851 = vmatmul.mubr.bf16.gmra.mrb[56].mxu1 %v8873_v15  ;;  %v8960_v15 = vld [vmem:[%s12631_s2 + $0x6c8] ss:$60 sps:$4 sm:$0xff]  }
 0x2be   :  { %5858 = vmatprep.mubr.bf16.mxu1 %v8877_v38  ;;  %v8963_v38 = vld [vmem:[%s12631_s2 + $0x720] ss:$60 sps:$4 sm:$0xff]  }
 0x2c1   :  { %6591 = vmatmul.mubr.bf16.gmra.mrb[56].mxu0 %v8876_v9  ;;  %v8965_v9 = vld [vmem:[%s12631_s2 + $0x79c] ss:$60 sps:$4 sm:$0xff]  }
 0x2c2   :  { %6598 = vmatprep.mubr.bf16.mxu0 %v8880_v13  ;;  %v8964_v13 = vld [vmem:[%s12631_s2 + $0x740] ss:$60 sps:$4 sm:$0xff]  }
 0x2c5   :  { %5859 = vmatmul.mubr.bf16.gmra.mrb[60].mxu1 %v8879_v50  ;;  %v8967_v50 = vld [vmem:[%s12631_s2 + $0x798] ss:$60 sps:$4 sm:$0xff]  }
 0x2c6   :  { %5866 = vmatprep.mubr.bf16.mxu1 %v8883_v19  ;;  %v8969_v19 = vld [vmem:[%s12631_s2 + $0x814] ss:$60 sps:$4 sm:$0xff]  }
 0x2c9   :  { %6599 = vmatmul.mubr.bf16.gmra.mrb[60].mxu0 %v8882_v27  ;;  %v8968_v27 = vld [vmem:[%s12631_s2 + $0x7b8] ss:$60 sps:$4 sm:$0xff]  }
 0x2ca   :  { %6606 = vmatprep.mubr.bf16.mxu0 %v8886_v55  ;;  %v8971_v55 = vld [vmem:[%s12631_s2 + $0x810] ss:$60 sps:$4 sm:$0xff]  }
 0x2cd   :  { %5867 = vmatmul.mubr.bf16.gmra.mrb[64].mxu1 %v8885_v58  ;;  %v8973_v58 = vld [vmem:[%s12631_s2 + $0x88c] ss:$60 sps:$4 sm:$0xff]  }
 0x2ce   :  { %5874 = vmatprep.mubr.bf16.mxu1 %v8889_v43  ;;  %v8972_v43 = vld [vmem:[%s12631_s2 + $0x830] ss:$60 sps:$4 sm:$0xff]  }
 0x2d1   :  { %6607 = vmatmul.mubr.bf16.gmra.mrb[64].mxu0 %v8888_v39  ;;  %v8975_v39 = vld [vmem:[%s12631_s2 + $0x888] ss:$60 sps:$4 sm:$0xff]  }
 0x2d2   :  { %6614 = vmatprep.mubr.bf16.mxu0 %v8892_v24  ;;  %v8976_v24 = vld [vmem:[%s12631_s2 + $0x8a8] ss:$60 sps:$4 sm:$0xff]  }
 0x2d5   :  { %5875 = vmatmul.mubr.bf16.gmra.mrb[68].mxu1 %v8891_v26 }
 0x2d6   :  { %5882 = vmatprep.mubr.bf16.mxu1 %v8895_v48 }
 0x2d9   :  { %6615 = vmatmul.mubr.bf16.gmra.mrb[68].mxu0 %v8894_v36 }
 0x2da   :  { %6622 = vmatprep.mubr.bf16.mxu0 %v8898_v28 }
 0x2dd   :  { %5883 = vmatmul.mubr.bf16.gmra.mrb[72].mxu1 %v8897_v47 }
 0x2de   :  { %5923 = vmatprep.mubr.bf16.mxu1 %v8903_v46 }
 0x2e1   :  { %6623 = vmatmul.mubr.bf16.gmra.mrb[72].mxu0 %v8900_v29 }
 0x2e2   :  { %7984 = vmatprep.mubr.msk.bf16.mxu0 %vm9891_vm0, %v9890_v41 }
 0x2e5   :  { %5924 = vmatmul.mubr.bf16.vlgmr.msra.gmra.mrb[0].mxu1 %v8901_v21 }
 0x2e6   :  { %5931 = vmatprep.mubr.bf16.mxu1 %v8905_v33 }
 0x2e9   :  { %7985 = vmatmul.mubr.msk.bf16.vlgmr.msra.gmra.mrb[0].mxu0 %vm5278_vm1, %v8904_v45 }
 0x2ea   :  { %7988 = vmatprep.mubr.msk.bf16.mxu0 %vm9891_vm0, %v9890_v41 }
 0x2ed   :  { %5932 = vmatmul.mubr.bf16.gmra.mrb[4].mxu1 %v8907_v3 }
 0x2ee   :  { %5939 = vmatprep.mubr.bf16.mxu1 %v8909_v63 }
 0x2f1   :  { %7989 = vmatmul.mubr.msk.bf16.gmra.mrb[4].mxu0 %vm5278_vm1, %v8908_v2 }
 0x2f2   :  { %7992 = vmatprep.mubr.msk.bf16.mxu0 %vm9891_vm0, %v9890_v41 }
 0x2f5   :  { %5940 = vmatmul.mubr.bf16.gmra.mrb[8].mxu1 %v8911_v62 }
 0x2f6   :  { %5947 = vmatprep.mubr.bf16.mxu1 %v8913_v8 }
 0x2f9   :  { %7993 = vmatmul.mubr.msk.bf16.gmra.mrb[8].mxu0 %vm5278_vm1, %v8912_v31 }
 0x2fa   :  { %7996 = vmatprep.mubr.msk.bf16.mxu0 %vm9891_vm0, %v9890_v41 }
 0x2fd   :  { %5948 = vmatmul.mubr.bf16.gmra.mrb[12].mxu1 %v8915_v54 }
 0x2fe   :  { %5955 = vmatprep.mubr.bf16.mxu1 %v8917_v53 }
 0x301   :  { %7997 = vmatmul.mubr.msk.bf16.gmra.mrb[12].mxu0 %vm5278_vm1, %v8916_v11 }
 0x302   :  { %8000 = vmatprep.mubr.msk.bf16.mxu0 %vm9891_vm0, %v9890_v41 }
 0x305   :  { %5956 = vmatmul.mubr.bf16.gmra.mrb[16].mxu1 %v8919_v40 }
 0x306   :  { %5963 = vmatprep.mubr.bf16.mxu1 %v8921_v44 }
 0x309   :  { %8001 = vmatmul.mubr.msk.bf16.gmra.mrb[16].mxu0 %vm5278_vm1, %v8920_v49 }
 0x30a   :  { %8004 = vmatprep.mubr.msk.bf16.mxu0 %vm9891_vm0, %v9890_v41 }
 0x30d   :  { %5964 = vmatmul.mubr.bf16.gmra.mrb[20].mxu1 %v8923_v23 }
 0x30e   :  { %5971 = vmatprep.mubr.bf16.mxu1 %v8925_v59 }
 0x311   :  { %8005 = vmatmul.mubr.msk.bf16.gmra.mrb[20].mxu0 %vm5278_vm1, %v8924_v60 }
 0x312   :  { %8008 = vmatprep.mubr.msk.bf16.mxu0 %vm9891_vm0, %v9890_v41 }
 0x315   :  { %5972 = vmatmul.mubr.bf16.gmra.mrb[24].mxu1 %v8927_v5 }
 0x316   :  { %5979 = vmatprep.mubr.bf16.mxu1 %v8929_v4 }
 0x319   :  { %8009 = vmatmul.mubr.msk.bf16.gmra.mrb[24].mxu0 %vm5278_vm1, %v8928_v56 }
 0x31a   :  { %8012 = vmatprep.mubr.msk.bf16.mxu0 %vm9891_vm0, %v9890_v41 }
 0x31d   :  { %5980 = vmatmul.mubr.bf16.gmra.mrb[28].mxu1 %v8931_v42 }
 0x31e   :  { %5987 = vmatprep.mubr.bf16.mxu1 %v8933_v37 }
 0x321   :  { %8013 = vmatmul.mubr.msk.bf16.gmra.mrb[28].mxu0 %vm5278_vm1, %v8932_v0 }
 0x322   :  { %8016 = vmatprep.mubr.msk.bf16.mxu0 %vm9891_vm0, %v9890_v41 }
 0x325   :  { %5988 = vmatmul.mubr.bf16.gmra.mrb[32].mxu1 %v8935_v14 }
 0x326   :  { %5995 = vmatprep.mubr.bf16.mxu1 %v8937_v17 }
 0x329   :  { %8017 = vmatmul.mubr.msk.bf16.gmra.mrb[32].mxu0 %vm5278_vm1, %v8936_v18 }
 0x32a   :  { %8020 = vmatprep.mubr.msk.bf16.mxu0 %vm9891_vm0, %v9890_v41 }
 0x32d   :  { %5996 = vmatmul.mubr.bf16.gmra.mrb[36].mxu1 %v8939_v20 }
 0x32e   :  { %6003 = vmatprep.mubr.bf16.mxu1 %v8941_v22 }
 0x331   :  { %8021 = vmatmul.mubr.msk.bf16.gmra.mrb[36].mxu0 %vm5278_vm1, %v8940_v16 }
 0x332   :  { %8024 = vmatprep.mubr.msk.bf16.mxu0 %vm9891_vm0, %v9890_v41 }
 0x335   :  { %6004 = vmatmul.mubr.bf16.gmra.mrb[40].mxu1 %v8943_v35 }
 0x336   :  { %6011 = vmatprep.mubr.bf16.mxu1 %v8945_v51 }
 0x339   :  { %8025 = vmatmul.mubr.msk.bf16.gmra.mrb[40].mxu0 %vm5278_vm1, %v8944_v12 }
 0x33a   :  { %8028 = vmatprep.mubr.msk.bf16.mxu0 %vm9891_vm0, %v9890_v41 }
 0x33d   :  { %6012 = vmatmul.mubr.bf16.gmra.mrb[44].mxu1 %v8947_v6 }
 0x33e   :  { %6019 = vmatprep.mubr.bf16.mxu1 %v8949_v25 }
 0x341   :  { %8029 = vmatmul.mubr.msk.bf16.gmra.mrb[44].mxu0 %vm5278_vm1, %v8948_v30 }
 0x342   :  { %8032 = vmatprep.mubr.msk.bf16.mxu0 %vm9891_vm0, %v9890_v41 }
 0x345   :  { %6020 = vmatmul.mubr.bf16.gmra.mrb[48].mxu1 %v8951_v52 }
 0x346   :  { %6027 = vmatprep.mubr.bf16.mxu1 %v8953_v10 }
 0x349   :  { %8033 = vmatmul.mubr.msk.bf16.gmra.mrb[48].mxu0 %vm5278_vm1, %v8952_v7 }
 0x34a   :  { %8036 = vmatprep.mubr.msk.bf16.mxu0 %vm9891_vm0, %v9890_v41 }
 0x34d   :  { %6028 = vmatmul.mubr.bf16.gmra.mrb[52].mxu1 %v8955_v57 }
 0x34e   :  { %6035 = vmatprep.mubr.bf16.mxu1 %v8957_v1 }
 0x351   :  { %8037 = vmatmul.mubr.msk.bf16.gmra.mrb[52].mxu0 %vm5278_vm1, %v8956_v61 }
 0x352   :  { %8040 = vmatprep.mubr.msk.bf16.mxu0 %vm9891_vm0, %v9890_v41 }
 0x355   :  { %6036 = vmatmul.mubr.bf16.gmra.mrb[56].mxu1 %v8959_v32 }
 0x356   :  { %6043 = vmatprep.mubr.bf16.mxu1 %v8961_v34 }
 0x359   :  { %8041 = vmatmul.mubr.msk.bf16.gmra.mrb[56].mxu0 %vm5278_vm1, %v8960_v15 }
 0x35a   :  { %8044 = vmatprep.mubr.msk.bf16.mxu0 %vm9891_vm0, %v9890_v41 }
 0x35d   :  { %6044 = vmatmul.mubr.bf16.gmra.mrb[60].mxu1 %v8963_v38 }
 0x35e   :  { %6051 = vmatprep.mubr.bf16.mxu1 %v8965_v9 }
 0x361   :  { %8045 = vmatmul.mubr.msk.bf16.gmra.mrb[60].mxu0 %vm5278_vm1, %v8964_v13 }
 0x362   :  { %8048 = vmatprep.mubr.msk.bf16.mxu0 %vm9891_vm0, %v9890_v41 }
 0x365   :  { %6052 = vmatmul.mubr.bf16.gmra.mrb[64].mxu1 %v8967_v50 }
 0x366   :  { %6059 = vmatprep.mubr.bf16.mxu1 %v8969_v19 }
 0x369   :  { %8049 = vmatmul.mubr.msk.bf16.gmra.mrb[64].mxu0 %vm5278_vm1, %v8968_v27 }
 0x36a   :  { %8052 = vmatprep.mubr.msk.bf16.mxu0 %vm9891_vm0, %v9890_v41 }
 0x36d   :  { %6060 = vmatmul.mubr.bf16.gmra.mrb[68].mxu1 %v8971_v55 }
 0x36e   :  { %6067 = vmatprep.mubr.bf16.mxu1 %v8973_v58 }
 0x371   :  { %8053 = vmatmul.mubr.msk.bf16.gmra.mrb[68].mxu0 %vm5278_vm1, %v8972_v43 }
 0x372   :  { %8056 = vmatprep.mubr.msk.bf16.mxu0 %vm9891_vm0, %v9890_v41 }
 0x375   :  { %6068 = vmatmul.mubr.bf16.gmra.mrb[72].mxu1 %v8975_v39 }
 0x379   :  { %8057 = vmatmul.mubr.msk.bf16.gmra.mrb[72].mxu0 %vm5278_vm1, %v8976_v24 }
 0x3b8   :  { %v5925_v26 = vpop.f32.mrb[0].mxu1 }
 0x3b9   :  { %v5927_v48 = vpop.f32.mrb[1].mxu1 }
 0x3ba   :  { %v5928_v36 = vpop.f32.mrb[2].mxu1 }
 0x3bb   :  { %v5930_v28 = vpop.f32.mrb[3].mxu1 }
 0x3bc   :  { %v6665_v47 = vpop.f32.mrb[0].mxu0 }
 0x3bd   :  { %v8060_v46 = vadd.f32 %v6665_v47, %v5925_v26  ;;  %v7986_v29 = vpop.f32.mrb[1].mxu0 }
 0x3be   :  { %v6668_v21 = vpop.f32.mrb[2].mxu0 }
 0x3bf   :  { %6816 = vst [vmem:[%s12632_s3] sm:$0xff] %v8060_v46  ;;  %v8061_v41 = vadd.f32 %v6668_v21, %v5928_v36  ;;  %v7987_v33 = vpop.f32.mrb[3].mxu0 }
 0x3c0   :  { %v5933_v45 = vpop.f32.mrb[4].mxu1 }
 0x3c1   :  { %6817 = vst [vmem:[%s12632_s3 + $0x8] sm:$0xff] %v8061_v41  ;;  %v5935_v3 = vpop.f32.mrb[5].mxu1 }
 0x3c2   :  { %v5936_v63 = vpop.f32.mrb[6].mxu1 }
 0x3c3   :  { %v5938_v2 = vpop.f32.mrb[7].mxu1 }
 0x3c4   :  { %v6673_v62 = vpop.f32.mrb[4].mxu0 }
 0x3c5   :  { %v8062_v8 = vadd.f32 %v6673_v62, %v5933_v45  ;;  %v7990_v31 = vpop.f32.mrb[5].mxu0 }
 0x3c6   :  { %v6676_v54 = vpop.f32.mrb[6].mxu0 }
 0x3c7   :  { %6818 = vst [vmem:[%s12632_s3 + $0x10] sm:$0xff] %v8062_v8  ;;  %v8063_v53 = vadd.f32 %v6676_v54, %v5936_v63  ;;  %v7991_v11 = vpop.f32.mrb[7].mxu0 }
 0x3c8   :  { %v5941_v40 = vpop.f32.mrb[8].mxu1 }
 0x3c9   :  { %6819 = vst [vmem:[%s12632_s3 + $0x18] sm:$0xff] %v8063_v53  ;;  %v5943_v44 = vpop.f32.mrb[9].mxu1 }
 0x3ca   :  { %v5944_v49 = vpop.f32.mrb[10].mxu1 }
 0x3cb   :  { %v5946_v23 = vpop.f32.mrb[11].mxu1 }
 0x3cc   :  { %v6681_v59 = vpop.f32.mrb[8].mxu0 }
 0x3cd   :  { %v8064_v60 = vadd.f32 %v6681_v59, %v5941_v40  ;;  %v7994_v5 = vpop.f32.mrb[9].mxu0 }
 0x3ce   :  { %v6684_v4 = vpop.f32.mrb[10].mxu0 }
 0x3cf   :  { %6820 = vst [vmem:[%s12632_s3 + $0x20] sm:$0xff] %v8064_v60  ;;  %v8065_v56 = vadd.f32 %v6684_v4, %v5944_v49  ;;  %v7995_v42 = vpop.f32.mrb[11].mxu0 }
 0x3d0   :  { %v5949_v37 = vpop.f32.mrb[12].mxu1 }
 0x3d1   :  { %6821 = vst [vmem:[%s12632_s3 + $0x28] sm:$0xff] %v8065_v56  ;;  %v5951_v0 = vpop.f32.mrb[13].mxu1 }
 0x3d2   :  { %v5952_v14 = vpop.f32.mrb[14].mxu1 }
 0x3d3   :  { %v5954_v17 = vpop.f32.mrb[15].mxu1 }
 0x3d4   :  { %v6689_v18 = vpop.f32.mrb[12].mxu0 }
 0x3d5   :  { %v8066_v20 = vadd.f32 %v6689_v18, %v5949_v37  ;;  %v7998_v22 = vpop.f32.mrb[13].mxu0 }
 0x3d6   :  { %v6692_v16 = vpop.f32.mrb[14].mxu0 }
 0x3d7   :  { %6822 = vst [vmem:[%s12632_s3 + $0x30] sm:$0xff] %v8066_v20  ;;  %v8067_v35 = vadd.f32 %v6692_v16, %v5952_v14  ;;  %v7999_v51 = vpop.f32.mrb[15].mxu0 }
 0x3d8   :  { %v5957_v12 = vpop.f32.mrb[16].mxu1 }
 0x3d9   :  { %6823 = vst [vmem:[%s12632_s3 + $0x38] sm:$0xff] %v8067_v35  ;;  %v5959_v6 = vpop.f32.mrb[17].mxu1 }
 0x3da   :  { %v5960_v25 = vpop.f32.mrb[18].mxu1 }
 0x3db   :  { %v5962_v30 = vpop.f32.mrb[19].mxu1 }
 0x3dc   :  { %v6697_v52 = vpop.f32.mrb[16].mxu0 }
 0x3dd   :  { %v8068_v10 = vadd.f32 %v6697_v52, %v5957_v12  ;;  %v8002_v7 = vpop.f32.mrb[17].mxu0 }
 0x3de   :  { %v6700_v57 = vpop.f32.mrb[18].mxu0 }
 0x3df   :  { %6824 = vst [vmem:[%s12632_s3 + $0x40] sm:$0xff] %v8068_v10  ;;  %v8069_v1 = vadd.f32 %v6700_v57, %v5960_v25  ;;  %v8003_v61 = vpop.f32.mrb[19].mxu0 }
 0x3e0   :  { %v5965_v32 = vpop.f32.mrb[20].mxu1 }
 0x3e1   :  { %6825 = vst [vmem:[%s12632_s3 + $0x48] sm:$0xff] %v8069_v1  ;;  %v5967_v34 = vpop.f32.mrb[21].mxu1 }
 0x3e2   :  { %v5968_v15 = vpop.f32.mrb[22].mxu1 }
 0x3e3   :  { %v5970_v38 = vpop.f32.mrb[23].mxu1 }
 0x3e4   :  { %v6705_v9 = vpop.f32.mrb[20].mxu0 }
 0x3e5   :  { %v8070_v13 = vadd.f32 %v6705_v9, %v5965_v32  ;;  %v8006_v50 = vpop.f32.mrb[21].mxu0 }
 0x3e6   :  { %v6708_v19 = vpop.f32.mrb[22].mxu0 }
 0x3e7   :  { %6826 = vst [vmem:[%s12632_s3 + $0x50] sm:$0xff] %v8070_v13  ;;  %v8071_v27 = vadd.f32 %v6708_v19, %v5968_v15  ;;  %v8007_v55 = vpop.f32.mrb[23].mxu0 }
 0x3e8   :  { %v5973_v58 = vpop.f32.mrb[24].mxu1 }
 0x3e9   :  { %6827 = vst [vmem:[%s12632_s3 + $0x58] sm:$0xff] %v8071_v27  ;;  %v5975_v43 = vpop.f32.mrb[25].mxu1 }
 0x3ea   :  { %v5976_v39 = vpop.f32.mrb[26].mxu1 }
 0x3eb   :  { %v5978_v24 = vpop.f32.mrb[27].mxu1 }
 0x3ec   :  { %v6713_v26 = vpop.f32.mrb[24].mxu0 }
 0x3ed   :  { %v8072_v48 = vadd.f32 %v6713_v26, %v5973_v58  ;;  %v8010_v36 = vpop.f32.mrb[25].mxu0 }
 0x3ee   :  { %v6716_v28 = vpop.f32.mrb[26].mxu0 }
 0x3ef   :  { %6828 = vst [vmem:[%s12632_s3 + $0x60] sm:$0xff] %v8072_v48  ;;  %v8073_v47 = vadd.f32 %v6716_v28, %v5976_v39  ;;  %v8011_v46 = vpop.f32.mrb[27].mxu0 }
 0x3f0   :  { %v5981_v29 = vpop.f32.mrb[28].mxu1 }
 0x3f1   :  { %6829 = vst [vmem:[%s12632_s3 + $0x68] sm:$0xff] %v8073_v47  ;;  %v5983_v21 = vpop.f32.mrb[29].mxu1 }
 0x3f2   :  { %v5984_v41 = vpop.f32.mrb[30].mxu1 }
 0x3f3   :  { %v5986_v33 = vpop.f32.mrb[31].mxu1 }
 0x3f4   :  { %v6721_v45 = vpop.f32.mrb[28].mxu0 }
 0x3f5   :  { %v8074_v3 = vadd.f32 %v6721_v45, %v5981_v29  ;;  %v8014_v63 = vpop.f32.mrb[29].mxu0 }
 0x3f6   :  { %v6724_v2 = vpop.f32.mrb[30].mxu0 }
 0x3f7   :  { %6830 = vst [vmem:[%s12632_s3 + $0x70] sm:$0xff] %v8074_v3  ;;  %v8075_v62 = vadd.f32 %v6724_v2, %v5984_v41  ;;  %v8015_v8 = vpop.f32.mrb[31].mxu0 }
 0x3f8   :  { %v5989_v31 = vpop.f32.mrb[32].mxu1 }
 0x3f9   :  { %6831 = vst [vmem:[%s12632_s3 + $0x78] sm:$0xff] %v8075_v62  ;;  %v5991_v54 = vpop.f32.mrb[33].mxu1 }
 0x3fa   :  { %v5992_v53 = vpop.f32.mrb[34].mxu1 }
 0x3fb   :  { %v5994_v11 = vpop.f32.mrb[35].mxu1 }
 0x3fc   :  { %v6729_v40 = vpop.f32.mrb[32].mxu0 }
 0x3fd   :  { %v8076_v44 = vadd.f32 %v6729_v40, %v5989_v31  ;;  %v8018_v49 = vpop.f32.mrb[33].mxu0 }
 0x3fe   :  { %v6732_v23 = vpop.f32.mrb[34].mxu0 }
 0x3ff   :  { %6832 = vst [vmem:[%s12632_s3 + $0x80] sm:$0xff] %v8076_v44  ;;  %v8077_v59 = vadd.f32 %v6732_v23, %v5992_v53  ;;  %v8019_v60 = vpop.f32.mrb[35].mxu0 }
 0x400   :  { %v5997_v5 = vpop.f32.mrb[36].mxu1 }
 0x401   :  { %6833 = vst [vmem:[%s12632_s3 + $0x88] sm:$0xff] %v8077_v59  ;;  %v5999_v4 = vpop.f32.mrb[37].mxu1 }
 0x402   :  { %v6000_v56 = vpop.f32.mrb[38].mxu1 }
 0x403   :  { %v6002_v42 = vpop.f32.mrb[39].mxu1 }
 0x404   :  { %v6737_v37 = vpop.f32.mrb[36].mxu0 }
 0x405   :  { %v8078_v0 = vadd.f32 %v6737_v37, %v5997_v5  ;;  %v8022_v14 = vpop.f32.mrb[37].mxu0 }
 0x406   :  { %v6740_v17 = vpop.f32.mrb[38].mxu0 }
 0x407   :  { %6834 = vst [vmem:[%s12632_s3 + $0x90] sm:$0xff] %v8078_v0  ;;  %v8079_v18 = vadd.f32 %v6740_v17, %v6000_v56  ;;  %v8023_v20 = vpop.f32.mrb[39].mxu0 }
 0x408   :  { %v6005_v22 = vpop.f32.mrb[40].mxu1 }
 0x409   :  { %6835 = vst [vmem:[%s12632_s3 + $0x98] sm:$0xff] %v8079_v18  ;;  %v6007_v16 = vpop.f32.mrb[41].mxu1 }
 0x40a   :  { %v6008_v35 = vpop.f32.mrb[42].mxu1 }
 0x40b   :  { %v6010_v51 = vpop.f32.mrb[43].mxu1 }
 0x40c   :  { %v6745_v12 = vpop.f32.mrb[40].mxu0 }
 0x40d   :  { %v8080_v6 = vadd.f32 %v6745_v12, %v6005_v22  ;;  %v8026_v25 = vpop.f32.mrb[41].mxu0 }
 0x40e   :  { %v6748_v30 = vpop.f32.mrb[42].mxu0 }
 0x40f   :  { %6836 = vst [vmem:[%s12632_s3 + $0xa0] sm:$0xff] %v8080_v6  ;;  %v8081_v52 = vadd.f32 %v6748_v30, %v6008_v35  ;;  %v8027_v10 = vpop.f32.mrb[43].mxu0 }
 0x410   :  { %v6013_v7 = vpop.f32.mrb[44].mxu1 }
 0x411   :  { %6837 = vst [vmem:[%s12632_s3 + $0xa8] sm:$0xff] %v8081_v52  ;;  %v6015_v57 = vpop.f32.mrb[45].mxu1 }
 0x412   :  { %v6016_v1 = vpop.f32.mrb[46].mxu1 }
 0x413   :  { %v6018_v61 = vpop.f32.mrb[47].mxu1 }
 0x414   :  { %v6753_v32 = vpop.f32.mrb[44].mxu0 }
 0x415   :  { %v8082_v34 = vadd.f32 %v6753_v32, %v6013_v7  ;;  %v8030_v15 = vpop.f32.mrb[45].mxu0 }
 0x416   :  { %v6756_v38 = vpop.f32.mrb[46].mxu0 }
 0x417   :  { %6838 = vst [vmem:[%s12632_s3 + $0xb0] sm:$0xff] %v8082_v34  ;;  %v8083_v9 = vadd.f32 %v6756_v38, %v6016_v1  ;;  %v8031_v13 = vpop.f32.mrb[47].mxu0 }
 0x418   :  { %v6021_v50 = vpop.f32.mrb[48].mxu1 }
 0x419   :  { %6839 = vst [vmem:[%s12632_s3 + $0xb8] sm:$0xff] %v8083_v9  ;;  %v6023_v19 = vpop.f32.mrb[49].mxu1 }
 0x41a   :  { %v6024_v27 = vpop.f32.mrb[50].mxu1 }
 0x41b   :  { %v6026_v55 = vpop.f32.mrb[51].mxu1 }
 0x41c   :  { %v6761_v58 = vpop.f32.mrb[48].mxu0 }
 0x41d   :  { %v8084_v43 = vadd.f32 %v6761_v58, %v6021_v50  ;;  %v8034_v39 = vpop.f32.mrb[49].mxu0 }
 0x41e   :  { %v6764_v24 = vpop.f32.mrb[50].mxu0 }
 0x41f   :  { %6840 = vst [vmem:[%s12632_s3 + $0xc0] sm:$0xff] %v8084_v43  ;;  %v8085_v26 = vadd.f32 %v6764_v24, %v6024_v27  ;;  %v8035_v48 = vpop.f32.mrb[51].mxu0 }
 0x420   :  { %v6029_v36 = vpop.f32.mrb[52].mxu1 }
 0x421   :  { %6841 = vst [vmem:[%s12632_s3 + $0xc8] sm:$0xff] %v8085_v26  ;;  %v6031_v28 = vpop.f32.mrb[53].mxu1 }
 0x422   :  { %v6032_v47 = vpop.f32.mrb[54].mxu1 }
 0x423   :  { %v6034_v46 = vpop.f32.mrb[55].mxu1 }
 0x424   :  { %v6769_v29 = vpop.f32.mrb[52].mxu0 }
 0x425   :  { %v8086_v21 = vadd.f32 %v6769_v29, %v6029_v36  ;;  %v8038_v41 = vpop.f32.mrb[53].mxu0 }
 0x426   :  { %v6772_v33 = vpop.f32.mrb[54].mxu0 }
 0x427   :  { %6842 = vst [vmem:[%s12632_s3 + $0xd0] sm:$0xff] %v8086_v21  ;;  %v8087_v45 = vadd.f32 %v6772_v33, %v6032_v47  ;;  %v8039_v3 = vpop.f32.mrb[55].mxu0 }
 0x428   :  { %v6037_v63 = vpop.f32.mrb[56].mxu1 }
 0x429   :  { %6843 = vst [vmem:[%s12632_s3 + $0xd8] sm:$0xff] %v8087_v45  ;;  %v6039_v2 = vpop.f32.mrb[57].mxu1 }
 0x42a   :  { %v6040_v62 = vpop.f32.mrb[58].mxu1 }
 0x42b   :  { %v6042_v8 = vpop.f32.mrb[59].mxu1 }
 0x42c   :  { %v6777_v31 = vpop.f32.mrb[56].mxu0 }
 0x42d   :  { %v8088_v54 = vadd.f32 %v6777_v31, %v6037_v63  ;;  %v8042_v53 = vpop.f32.mrb[57].mxu0 }
 0x42e   :  { %v6780_v11 = vpop.f32.mrb[58].mxu0 }
 0x42f   :  { %6844 = vst [vmem:[%s12632_s3 + $0xe0] sm:$0xff] %v8088_v54  ;;  %v8089_v40 = vadd.f32 %v6780_v11, %v6040_v62  ;;  %v8043_v44 = vpop.f32.mrb[59].mxu0 }
 0x430   :  { %v6045_v49 = vpop.f32.mrb[60].mxu1 }
 0x431   :  { %6845 = vst [vmem:[%s12632_s3 + $0xe8] sm:$0xff] %v8089_v40  ;;  %v6047_v23 = vpop.f32.mrb[61].mxu1 }
 0x432   :  { %v6048_v59 = vpop.f32.mrb[62].mxu1 }
 0x433   :  { %v6050_v60 = vpop.f32.mrb[63].mxu1 }
 0x434   :  { %v6785_v5 = vpop.f32.mrb[60].mxu0 }
 0x435   :  { %v8090_v4 = vadd.f32 %v6785_v5, %v6045_v49  ;;  %v8046_v56 = vpop.f32.mrb[61].mxu0 }
 0x436   :  { %v6788_v42 = vpop.f32.mrb[62].mxu0 }
 0x437   :  { %6846 = vst [vmem:[%s12632_s3 + $0xf0] sm:$0xff] %v8090_v4  ;;  %v8091_v37 = vadd.f32 %v6788_v42, %v6048_v59  ;;  %v8047_v0 = vpop.f32.mrb[63].mxu0 }
 0x438   :  { %v6053_v14 = vpop.f32.mrb[64].mxu1 }
 0x439   :  { %6847 = vst [vmem:[%s12632_s3 + $0xf8] sm:$0xff] %v8091_v37  ;;  %v6055_v17 = vpop.f32.mrb[65].mxu1 }
 0x43a   :  { %v6056_v18 = vpop.f32.mrb[66].mxu1 }
 0x43b   :  { %v6058_v20 = vpop.f32.mrb[67].mxu1 }
 0x43c   :  { %v6793_v22 = vpop.f32.mrb[64].mxu0 }
 0x43d   :  { %v8092_v16 = vadd.f32 %v6793_v22, %v6053_v14  ;;  %v8050_v35 = vpop.f32.mrb[65].mxu0 }
 0x43e   :  { %v6796_v51 = vpop.f32.mrb[66].mxu0 }
 0x43f   :  { %6848 = vst [vmem:[%s12632_s3 + $0x100] sm:$0xff] %v8092_v16  ;;  %v8093_v12 = vadd.f32 %v6796_v51, %v6056_v18  ;;  %v8051_v6 = vpop.f32.mrb[67].mxu0 }
 0x440   :  { %v6061_v25 = vpop.f32.mrb[68].mxu1 }
 0x441   :  { %6849 = vst [vmem:[%s12632_s3 + $0x108] sm:$0xff] %v8093_v12  ;;  %v6063_v30 = vpop.f32.mrb[69].mxu1 }
 0x442   :  { %v6064_v52 = vpop.f32.mrb[70].mxu1 }
 0x443   :  { %v6066_v10 = vpop.f32.mrb[71].mxu1 }
 0x444   :  { %v6801_v7 = vpop.f32.mrb[68].mxu0 }
 0x445   :  { %v8094_v57 = vadd.f32 %v6801_v7, %v6061_v25  ;;  %v8054_v1 = vpop.f32.mrb[69].mxu0 }
 0x446   :  { %v6804_v61 = vpop.f32.mrb[70].mxu0 }
 0x447   :  { %6850 = vst [vmem:[%s12632_s3 + $0x110] sm:$0xff] %v8094_v57  ;;  %v8095_v32 = vadd.f32 %v6804_v61, %v6064_v52  ;;  %v8055_v34 = vpop.f32.mrb[71].mxu0 }
 0x448   :  { %v6069_v15 = vpop.f32.mrb[72].mxu1 }
 0x449   :  { %6851 = vst [vmem:[%s12632_s3 + $0x118] sm:$0xff] %v8095_v32  ;;  %v6071_v38 = vpop.f32.mrb[73].mxu1 }
 0x44a   :  { %v6072_v9 = vpop.f32.mrb[74].mxu1 }
 0x44b   :  { %v6074_v13 = vpop.f32.mrb[75].mxu1 }
 0x44c   :  { %v6809_v50 = vpop.f32.mrb[72].mxu0 }
 0x44d   :  { %v8096_v19 = vadd.f32 %v6809_v50, %v6069_v15  ;;  %v8058_v27 = vpop.f32.mrb[73].mxu0 }
 0x44e   :  { %v6812_v55 = vpop.f32.mrb[74].mxu0 }
 0x44f   :  { %6852 = vst [vmem:[%s12632_s3 + $0x120] sm:$0xff] %v8096_v19  ;;  %v8097_v58 = vadd.f32 %v6812_v55, %v6072_v9  ;;  %v8059_v43 = vpop.f32.mrb[75].mxu0 }
 0x451   :  { %6853 = vst [vmem:[%s12632_s3 + $0x128] sm:$0xff] %v8097_v58 }

</bundles_post_ra>
